<compile_context>
chip_gen: v6e
topology: v6e:2x2x1
jax: 0.10.0
libtpu: 0.0.40
codegen_flags: <defaults>
</compile_context>

<pallas_src>
import jax
import jax.numpy as jnp
from jax.experimental import pallas as pl
from jax.experimental.pallas import tpu as pltpu


def _sigmoid(x):
    # Explicit tanh form: guaranteed single EUP op per element (the exp +
    # reciprocal expansion would cost two pushes on the binding EUP slot).
    return 0.5 * jnp.tanh(0.5 * x) + 0.5


def _make_kernel(K):
    """Build the kernel closed over the (static) knowledge dim K."""

    def kernel(x_ref, w1_ref, b1_ref, w2_ref, b2_ref, w3_ref, b3_ref, out_ref):
        # ---- IRT-style prologue (f32, batch on lanes) -----------------------
        # x_ref rows: [0:K) student_emb, [K:2K) k_difficulty, [2K:3K) kn_emb,
        # [3K:3K+1) e_discrimination.  All row splits are 8-sublane aligned.
        stu = _sigmoid(x_ref[0:K, :])                         # (K, TB)
        kn = x_ref[2 * K:3 * K, :]                            # (K, TB)
        k_diff = _sigmoid(x_ref[K:2 * K, :]) * kn             # (K, TB)
        e_disc = _sigmoid(x_ref[3 * K:3 * K + 1, :]) * 10.0   # (1, TB)
        input_x = (e_disc * (stu - k_diff) * kn).astype(jnp.bfloat16)

        # ---- prednet_full1 -> sigmoid (drop_1 = identity in eval mode) ------
        h1 = jnp.dot(w1_ref[...], input_x,
                     preferred_element_type=jnp.float32) + b1_ref[...]
        h1 = _sigmoid(h1).astype(jnp.bfloat16)                # (L1, TB), one
        # bf16 materialization only (no live f32 copy kept alongside).
        # TODO(synk): on v6e/v7x the sigmoid itself could run in bf16 to halve
        # EUP pushes; kept f32 here so one kernel lowers cleanly on v5e too.

        # ---- prednet_full2 -> sigmoid (drop_2 = identity in eval mode) ------
        h2 = jnp.dot(w2_ref[...], h1,
                     preferred_element_type=jnp.float32) + b2_ref[...]
        h2 = _sigmoid(h2).astype(jnp.bfloat16)                # (L2, TB)

        # ---- prednet_full3 -> sigmoid: lane-dense (1, TB) output ------------
        logit = jnp.dot(w3_ref[...], h2,
                        preferred_element_type=jnp.float32) + b3_ref[...]
        out_ref[...] = _sigmoid(logit)                        # (1, TB)

    return kernel


def _round_up(x, m):
    return ((x + m - 1) // m) * m


def _pick_tb(B, max_tb=1024):
    """Batch rows per grid step.

    Large tiles (multiple of 256, up to 1024) amortize the ~0.35us per-step
    overhead; the cap at ceil(B/2) keeps n_tiles >= 2 so the "parallel" batch
    axis can shard across both v7x TensorCores (harmless on v5e/v6e).
    """
    if B <= 128:
        return 128
    half = (B + 1) // 2
    if half <= 256:
        return _round_up(half, 128)
    return min(max_tb, _round_up(half, 256))


def cdm_forward(params, stu_id, exer_id, kn_emb, *, tb=None):
    """NeuralCDM forward pass (eval mode)."""
    K = params["student_emb"].shape[1]
    L1 = params["w1"].shape[0]
    L2 = params["w2"].shape[0]

    # Embedding gathers stay as XLA glue.
    # TODO(synk): fold these gathers into the kernel via scalar-prefetch +
    # per-row DMA if wrapper gather/dispatch overhead ever dominates.
    stu_e = params["student_emb"][stu_id].astype(jnp.float32)       # (B, K)
    kd_e = params["k_difficulty"][exer_id].astype(jnp.float32)      # (B, K)
    ed_e = params["e_discrimination"][exer_id].astype(jnp.float32)  # (B, 1)
    kn = kn_emb.astype(jnp.float32)                                 # (B, K)

    B = stu_e.shape[0]
    if tb is None:
        tb = _pick_tb(B)
    n_tiles = pl.cdiv(B, tb)
    b_pad = n_tiles * tb

    # Single stacked, transposed prologue input: features on sublanes, batch on
    # the lane axis -> one contiguous lane-dense DMA per grid step.
    x = jnp.concatenate([stu_e, kd_e, kn, ed_e], axis=1).T          # (3K+1, B)
    if b_pad != B:
        # Padded batch lanes compute garbage (sigmoid of biases); they are
        # sliced off below — never consume the raw (1, b_pad) slab directly.
        x = jnp.pad(x, ((0, 0), (0, b_pad - B)))

    F = 3 * K + 1
    # bf16 MXU operands (f32 accumulation in-kernel); biases stay f32.
    w1 = params["w1"].astype(jnp.bfloat16)                # (L1, K)
    w2 = params["w2"].astype(jnp.bfloat16)                # (L2, L1)
    w3 = params["w3"].astype(jnp.bfloat16)                # (1,  L2)
    b1 = params["b1"].reshape(L1, 1).astype(jnp.float32)
    b2 = params["b2"].reshape(L2, 1).astype(jnp.float32)
    b3 = params["b3"].reshape(1, 1).astype(jnp.float32)

    def resident(shape):
        # Constant block index => DMA'd into VMEM once, resident across grid.
        return pl.BlockSpec(shape, lambda i: (0, 0))

    out = pl.pallas_call(
        _make_kernel(K),
        out_shape=jax.ShapeDtypeStruct((1, b_pad), jnp.float32),
        grid=(n_tiles,),
        in_specs=[
            pl.BlockSpec((F, tb), lambda i: (0, i)),   # stacked prologue input
            resident((L1, K)),    # w1 (bf16)
            resident((L1, 1)),    # b1
            resident((L2, L1)),   # w2 (bf16)
            resident((L2, 1)),    # b2
            resident((1, L2)),    # w3 (bf16)
            resident((1, 1)),     # b3
        ],
        out_specs=pl.BlockSpec((1, tb), lambda i: (0, i)),
        compiler_params=pltpu.CompilerParams(
            dimension_semantics=("parallel",)),
    )(x, w1, b1, w2, b2, w3, b3)

    # Lane-dense (1, b_pad) slab -> (B, 1)
    return out[0, :B].reshape(B, 1)


def init_params(key, student_n, exer_n, knowledge_n, q_matrix):
    """Deterministic synthetic init mirroring Net.__init__ shapes.

    Linear weights are kept in PyTorch (out, in) orientation.
    """
    L1, L2 = 512, 256
    ks = jax.random.split(key, 9)

    def xavier(k, shape):
        std = (2.0 / (shape[0] + shape[1])) ** 0.5
        return std * jax.random.normal(k, shape, dtype=jnp.float32)

    def bias(k, fan_in, n):
        bound = 1.0 / (fan_in ** 0.5)
        return jax.random.uniform(k, (n,), jnp.float32, -bound, bound)

    return {
        "student_emb": xavier(ks[0], (student_n, knowledge_n)),
        "k_difficulty": xavier(ks[1], (exer_n, knowledge_n)) * q_matrix,
        "e_discrimination": xavier(ks[2], (exer_n, 1)),
        "w1": xavier(ks[3], (L1, knowledge_n)),   # (out, in)
        "b1": bias(ks[6], knowledge_n, L1),
        "w2": xavier(ks[4], (L2, L1)),
        "b2": bias(ks[7], L1, L2),
        "w3": xavier(ks[5], (1, L2)),
        "b3": bias(ks[8], L2, 1),
    }


def reference_forward_f32(params, stu_id, exer_id, kn_emb):
    """Exact f32 mirror of the PyTorch Net.forward (eval mode)."""
    kn = kn_emb.astype(jnp.float32)
    stu = jax.nn.sigmoid(params["student_emb"][stu_id])
    kd = jax.nn.sigmoid(params["k_difficulty"][exer_id]) * kn
    ed = jax.nn.sigmoid(params["e_discrimination"][exer_id]) * 10.0
    x = ed * (stu - kd) * kn
    h1 = jax.nn.sigmoid(x @ params["w1"].T + params["b1"])
    h2 = jax.nn.sigmoid(h1 @ params["w2"].T + params["b2"])
    return jax.nn.sigmoid(h2 @ params["w3"].T + params["b3"])


def reference_forward_matched(params, stu_id, exer_id, kn_emb):
    """Plain-JAX reference with the kernel's numerics (bf16 MXU operands,
    f32 accumulation, bf16 activation materialization)."""
    kn = kn_emb.astype(jnp.float32)
    stu = jax.nn.sigmoid(params["student_emb"][stu_id])
    kd = jax.nn.sigmoid(params["k_difficulty"][exer_id]) * kn
    ed = jax.nn.sigmoid(params["e_discrimination"][exer_id]) * 10.0
    x = (ed * (stu - kd) * kn).astype(jnp.bfloat16)
    w1 = params["w1"].astype(jnp.bfloat16)
    w2 = params["w2"].astype(jnp.bfloat16)
    w3 = params["w3"].astype(jnp.bfloat16)
    h1 = jax.nn.sigmoid(
        jnp.dot(x, w1.T, preferred_element_type=jnp.float32)
        + params["b1"][None, :]).astype(jnp.bfloat16)
    h2 = jax.nn.sigmoid(
        jnp.dot(h1, w2.T, preferred_element_type=jnp.float32)
        + params["b2"][None, :]).astype(jnp.bfloat16)
    logit = (jnp.dot(h2, w3.T, preferred_element_type=jnp.float32)
             + params["b3"][None, :])
    return jax.nn.sigmoid(logit)


if __name__ == "__main__":
    student_n, exer_n, knowledge_n = 16, 20, 32
    B = 300   # not a multiple of the batch tile -> exercises padding + 2 tiles

    key = jax.random.PRNGKey(0)
    kq, kp, ks, ke = jax.random.split(key, 4)

    # Binary Q-matrix (exercise x knowledge relevancy), deterministic.
    q_matrix = (jax.random.uniform(kq, (exer_n, knowledge_n)) < 0.5
                ).astype(jnp.float32)

    params = init_params(kp, student_n, exer_n, knowledge_n, q_matrix)

    stu_id = jax.random.randint(ks, (B,), 0, student_n)
    exer_id = jax.random.randint(ke, (B,), 0, exer_n)
    kn_emb = q_matrix[exer_id]  # knowledge relevancy vectors per exercise

    fwd = jax.jit(cdm_forward)
    out = jax.block_until_ready(fwd(params, stu_id, exer_id, kn_emb))
    assert out.shape == (B, 1), out.shape

    # Tight check vs a reference with identical numerics (bf16 MXU operands).
    ref_match = reference_forward_matched(params, stu_id, exer_id, kn_emb)
    err_match = float(jnp.max(jnp.abs(out - ref_match)))
    assert err_match < 2e-4, f"matched-numerics mismatch: {err_match}"

    # Loose check vs the true f32 PyTorch-equivalent forward (covers bf16 drift).
    ref_f32 = reference_forward_f32(params, stu_id, exer_id, kn_emb)
    err_f32 = float(jnp.max(jnp.abs(out - ref_f32)))
    assert err_f32 < 1e-2, f"f32 reference mismatch: {err_f32}"

    print("KERNEL_OK")
</pallas_src>

<mosaic_0001>
module attributes {stable_mosaic.version = 11 : i64} {
  func.func @kernel(%arg0: i32, %arg1: memref<97x256xf32, #tpu.memory_space<vmem>>, %arg2: memref<512x32xbf16, #tpu.memory_space<vmem>>, %arg3: memref<512x1xf32, #tpu.memory_space<vmem>>, %arg4: memref<256x512xbf16, #tpu.memory_space<vmem>>, %arg5: memref<256x1xf32, #tpu.memory_space<vmem>>, %arg6: memref<1x256xbf16, #tpu.memory_space<vmem>>, %arg7: memref<1x1xf32, #tpu.memory_space<vmem>>, %arg8: memref<1x256xf32, #tpu.memory_space<vmem>>) attributes {dimension_semantics = [#tpu.dimension_semantics<parallel>], iteration_bounds = array<i64: 2>, scalar_prefetch = 0 : i64, scratch_operands = 0 : i64, tpu.core_type = #tpu.core_type<tc>, window_params = [{transform_indices = @transform_0, window_bounds = array<i64: 97, 256>}, {pipeline_mode = #tpu.pipeline_mode<synchronous>, transform_indices = @transform_1, window_bounds = array<i64: 512, 32>}, {pipeline_mode = #tpu.pipeline_mode<synchronous>, transform_indices = @transform_2, window_bounds = array<i64: 512, 1>}, {pipeline_mode = #tpu.pipeline_mode<synchronous>, transform_indices = @transform_3, window_bounds = array<i64: 256, 512>}, {pipeline_mode = #tpu.pipeline_mode<synchronous>, transform_indices = @transform_4, window_bounds = array<i64: 256, 1>}, {pipeline_mode = #tpu.pipeline_mode<synchronous>, transform_indices = @transform_5, window_bounds = array<i64: 1, 256>}, {pipeline_mode = #tpu.pipeline_mode<synchronous>, transform_indices = @transform_6, window_bounds = array<i64: 1, 1>}, {transform_indices = @transform_7, window_bounds = array<i64: 1, 256>}]} {
    %c0 = arith.constant 0 : index
    %c0_0 = arith.constant 0 : index
    %0 = vector.load %arg1[%c0, %c0_0] : memref<97x256xf32, #tpu.memory_space<vmem>>, vector<32x256xf32>
    %cst = arith.constant 5.000000e-01 : f32
    %1 = vector.broadcast %cst : f32 to vector<32x256xf32>
    %2 = arith.mulf %1, %0 : vector<32x256xf32>
    %3 = math.tanh %2 : vector<32x256xf32>
    %cst_1 = arith.constant 5.000000e-01 : f32
    %4 = vector.broadcast %cst_1 : f32 to vector<32x256xf32>
    %5 = arith.mulf %4, %3 : vector<32x256xf32>
    %cst_2 = arith.constant 5.000000e-01 : f32
    %6 = vector.broadcast %cst_2 : f32 to vector<32x256xf32>
    %7 = arith.addf %5, %6 : vector<32x256xf32>
    %c64 = arith.constant 64 : index
    %c0_3 = arith.constant 0 : index
    %8 = vector.load %arg1[%c64, %c0_3] : memref<97x256xf32, #tpu.memory_space<vmem>>, vector<32x256xf32>
    %c32 = arith.constant 32 : index
    %c0_4 = arith.constant 0 : index
    %9 = vector.load %arg1[%c32, %c0_4] : memref<97x256xf32, #tpu.memory_space<vmem>>, vector<32x256xf32>
    %cst_5 = arith.constant 5.000000e-01 : f32
    %10 = vector.broadcast %cst_5 : f32 to vector<32x256xf32>
    %11 = arith.mulf %10, %9 : vector<32x256xf32>
    %12 = math.tanh %11 : vector<32x256xf32>
    %cst_6 = arith.constant 5.000000e-01 : f32
    %13 = vector.broadcast %cst_6 : f32 to vector<32x256xf32>
    %14 = arith.mulf %13, %12 : vector<32x256xf32>
    %cst_7 = arith.constant 5.000000e-01 : f32
    %15 = vector.broadcast %cst_7 : f32 to vector<32x256xf32>
    %16 = arith.addf %14, %15 : vector<32x256xf32>
    %17 = arith.mulf %16, %8 : vector<32x256xf32>
    %c96 = arith.constant 96 : index
    %c0_8 = arith.constant 0 : index
    %18 = vector.load %arg1[%c96, %c0_8] : memref<97x256xf32, #tpu.memory_space<vmem>>, vector<1x256xf32>
    %cst_9 = arith.constant 5.000000e-01 : f32
    %19 = vector.broadcast %cst_9 : f32 to vector<1x256xf32>
    %20 = arith.mulf %19, %18 : vector<1x256xf32>
    %21 = math.tanh %20 : vector<1x256xf32>
    %cst_10 = arith.constant 5.000000e-01 : f32
    %22 = vector.broadcast %cst_10 : f32 to vector<1x256xf32>
    %23 = arith.mulf %22, %21 : vector<1x256xf32>
    %cst_11 = arith.constant 5.000000e-01 : f32
    %24 = vector.broadcast %cst_11 : f32 to vector<1x256xf32>
    %25 = arith.addf %23, %24 : vector<1x256xf32>
    %cst_12 = arith.constant 1.000000e+01 : f32
    %26 = vector.broadcast %cst_12 : f32 to vector<1x256xf32>
    %27 = arith.mulf %25, %26 : vector<1x256xf32>
    %28 = arith.subf %7, %17 : vector<32x256xf32>
    %29 = vector.broadcast %27 : vector<1x256xf32> to vector<32x256xf32>
    %30 = arith.mulf %29, %28 : vector<32x256xf32>
    %31 = arith.mulf %30, %8 : vector<32x256xf32>
    %32 = arith.truncf %31 : vector<32x256xf32> to vector<32x256xbf16>
    %c0_13 = arith.constant 0 : index
    %c0_14 = arith.constant 0 : index
    %33 = vector.load %arg2[%c0_13, %c0_14] : memref<512x32xbf16, #tpu.memory_space<vmem>>, vector<512x32xbf16>
    %cst_15 = arith.constant dense<0.000000e+00> : vector<512x256xf32>
    %34 = tpu.matmul %33, %32, %cst_15 {dimension_numbers = #tpu.dot_dimension_numbers<[1], [0], [0], [1], [0, 0, 1, 1], [], []>} : vector<512x32xbf16>, vector<32x256xbf16>, vector<512x256xf32> -> vector<512x256xf32>
    %c0_16 = arith.constant 0 : index
    %c0_17 = arith.constant 0 : index
    %35 = vector.load %arg3[%c0_16, %c0_17] : memref<512x1xf32, #tpu.memory_space<vmem>>, vector<512x1xf32>
    %36 = vector.broadcast %35 : vector<512x1xf32> to vector<512x256xf32>
    %37 = arith.addf %34, %36 : vector<512x256xf32>
    %cst_18 = arith.constant 5.000000e-01 : f32
    %38 = vector.broadcast %cst_18 : f32 to vector<512x256xf32>
    %39 = arith.mulf %38, %37 : vector<512x256xf32>
    %40 = math.tanh %39 : vector<512x256xf32>
    %cst_19 = arith.constant 5.000000e-01 : f32
    %41 = vector.broadcast %cst_19 : f32 to vector<512x256xf32>
    %42 = arith.mulf %41, %40 : vector<512x256xf32>
    %cst_20 = arith.constant 5.000000e-01 : f32
    %43 = vector.broadcast %cst_20 : f32 to vector<512x256xf32>
    %44 = arith.addf %42, %43 : vector<512x256xf32>
    %45 = arith.truncf %44 : vector<512x256xf32> to vector<512x256xbf16>
    %c0_21 = arith.constant 0 : index
    %c0_22 = arith.constant 0 : index
    %46 = vector.load %arg4[%c0_21, %c0_22] : memref<256x512xbf16, #tpu.memory_space<vmem>>, vector<256x512xbf16>
    %cst_23 = arith.constant dense<0.000000e+00> : vector<256x256xf32>
    %47 = tpu.matmul %46, %45, %cst_23 {dimension_numbers = #tpu.dot_dimension_numbers<[1], [0], [0], [1], [0, 0, 1, 1], [], []>} : vector<256x512xbf16>, vector<512x256xbf16>, vector<256x256xf32> -> vector<256x256xf32>
    %c0_24 = arith.constant 0 : index
    %c0_25 = arith.constant 0 : index
    %48 = vector.load %arg5[%c0_24, %c0_25] : memref<256x1xf32, #tpu.memory_space<vmem>>, vector<256x1xf32>
    %49 = vector.broadcast %48 : vector<256x1xf32> to vector<256x256xf32>
    %50 = arith.addf %47, %49 : vector<256x256xf32>
    %cst_26 = arith.constant 5.000000e-01 : f32
    %51 = vector.broadcast %cst_26 : f32 to vector<256x256xf32>
    %52 = arith.mulf %51, %50 : vector<256x256xf32>
    %53 = math.tanh %52 : vector<256x256xf32>
    %cst_27 = arith.constant 5.000000e-01 : f32
    %54 = vector.broadcast %cst_27 : f32 to vector<256x256xf32>
    %55 = arith.mulf %54, %53 : vector<256x256xf32>
    %cst_28 = arith.constant 5.000000e-01 : f32
    %56 = vector.broadcast %cst_28 : f32 to vector<256x256xf32>
    %57 = arith.addf %55, %56 : vector<256x256xf32>
    %58 = arith.truncf %57 : vector<256x256xf32> to vector<256x256xbf16>
    %c0_29 = arith.constant 0 : index
    %c0_30 = arith.constant 0 : index
    %59 = vector.load %arg6[%c0_29, %c0_30] : memref<1x256xbf16, #tpu.memory_space<vmem>>, vector<1x256xbf16>
    %cst_31 = arith.constant dense<0.000000e+00> : vector<1x256xf32>
    %60 = tpu.matmul %59, %58, %cst_31 {dimension_numbers = #tpu.dot_dimension_numbers<[1], [0], [0], [1], [0, 0, 1, 1], [], []>} : vector<1x256xbf16>, vector<256x256xbf16>, vector<1x256xf32> -> vector<1x256xf32>
    %c0_32 = arith.constant 0 : index
    %c0_33 = arith.constant 0 : index
    %61 = vector.load %arg7[%c0_32, %c0_33] : memref<1x1xf32, #tpu.memory_space<vmem>>, vector<1x1xf32>
    %62 = vector.broadcast %61 : vector<1x1xf32> to vector<1x256xf32>
    %63 = arith.addf %60, %62 : vector<1x256xf32>
    %cst_34 = arith.constant 5.000000e-01 : f32
    %64 = vector.broadcast %cst_34 : f32 to vector<1x256xf32>
    %65 = arith.mulf %64, %63 : vector<1x256xf32>
    %66 = math.tanh %65 : vector<1x256xf32>
    %cst_35 = arith.constant 5.000000e-01 : f32
    %67 = vector.broadcast %cst_35 : f32 to vector<1x256xf32>
    %68 = arith.mulf %67, %66 : vector<1x256xf32>
    %cst_36 = arith.constant 5.000000e-01 : f32
    %69 = vector.broadcast %cst_36 : f32 to vector<1x256xf32>
    %70 = arith.addf %68, %69 : vector<1x256xf32>
    %c0_37 = arith.constant 0 : index
    %c0_38 = arith.constant 0 : index
    %71 = vector.load %arg8[%c0_37, %c0_38] : memref<1x256xf32, #tpu.memory_space<vmem>>, vector<1x256xf32>
    tpu.vector_store %arg8[%c0_37, %c0_38], %70 {strides = array<i32>} : memref<1x256xf32, #tpu.memory_space<vmem>>, vector<1x256xf32>,
    return
  }
  func.func @transform_0(%arg0: i32) -> (i32, i32) {
    %c0_i32 = arith.constant 0 : i32
    %c0_i32_0 = arith.constant 0 : i32
    return %c0_i32, %arg0 : i32, i32
  }
  func.func @transform_1(%arg0: i32) -> (i32, i32) {
    %c0_i32 = arith.constant 0 : i32
    %c0_i32_0 = arith.constant 0 : i32
    %c0_i32_1 = arith.constant 0 : i32
    return %c0_i32, %c0_i32_0 : i32, i32
  }
  func.func @transform_2(%arg0: i32) -> (i32, i32) {
    %c0_i32 = arith.constant 0 : i32
    %c0_i32_0 = arith.constant 0 : i32
    %c0_i32_1 = arith.constant 0 : i32
    return %c0_i32, %c0_i32_0 : i32, i32
  }
  func.func @transform_3(%arg0: i32) -> (i32, i32) {
    %c0_i32 = arith.constant 0 : i32
    %c0_i32_0 = arith.constant 0 : i32
    %c0_i32_1 = arith.constant 0 : i32
    return %c0_i32, %c0_i32_0 : i32, i32
  }
  func.func @transform_4(%arg0: i32) -> (i32, i32) {
    %c0_i32 = arith.constant 0 : i32
    %c0_i32_0 = arith.constant 0 : i32
    %c0_i32_1 = arith.constant 0 : i32
    return %c0_i32, %c0_i32_0 : i32, i32
  }
  func.func @transform_5(%arg0: i32) -> (i32, i32) {
    %c0_i32 = arith.constant 0 : i32
    %c0_i32_0 = arith.constant 0 : i32
    %c0_i32_1 = arith.constant 0 : i32
    return %c0_i32, %c0_i32_0 : i32, i32
  }
  func.func @transform_6(%arg0: i32) -> (i32, i32) {
    %c0_i32 = arith.constant 0 : i32
    %c0_i32_0 = arith.constant 0 : i32
    %c0_i32_1 = arith.constant 0 : i32
    return %c0_i32, %c0_i32_0 : i32, i32
  }
  func.func @transform_7(%arg0: i32) -> (i32, i32) {
    %c0_i32 = arith.constant 0 : i32
    %c0_i32_0 = arith.constant 0 : i32
    return %c0_i32, %arg0 : i32, i32
  }
}

</mosaic_0001>

<bundles_post_ra>
// kernel: cdm_forward.1
= control target key start
LH: loop header
LB: loop body
LE: loop exit
PB: predicated region body
PF: predicated region fallthrough
CT: control target
= control target key end

     0   :  { %s6185_s0 = inlined_call_operand.vmem [shape: f32[97,512], index: 0, kind: input, shape index: {}]   ;;  %s6186_s1 = inlined_call_operand.vmem [shape: bf16[512,32], index: 1, kind: input, shape index: {}]   ;;  %s6187_s2 = inlined_call_operand.vmem [shape: f32[512,1], index: 2, kind: input, shape index: {}]   ;;  %s6188_s3 = inlined_call_operand.vmem [shape: bf16[256,512], index: 3, kind: input, shape index: {}]   ;;  %s6189_s4 = inlined_call_operand.vmem [shape: f32[256,1], index: 4, kind: input, shape index: {}]   ;;  %s6190_s5 = inlined_call_operand.vmem [shape: bf16[1,256], index: 5, kind: input, shape index: {}]   ;;  %s6191_s6 = inlined_call_operand.<no memory space> [shape: f32[1,1], index: 6, kind: input, shape index: {}]   ;;  %s6192_s7 = inlined_call_operand.vmem [shape: f32[1,512], index: 7, kind: output, shape index: {}]  }
   0x1   :  { %v12_v0 = vstv %s6191_s6 }
   0x2   :  { %13 = vst [vmem:[#allocation2] sm:$0x1] %v12_v0 }
   0x3   :  { %s4332_s26 = smov 0   ;;  %s4334_s27 = smov 0  }
   0x4   :  { %s4336_s28 = smov 0  }
   0x5 LB: > { %s3542_s6 = sadd.s32 4294967295, %s4285_s28   ;;  %s4349_s29 = sadd.s32 1, %s4285_s28   ;;  %s4285_s28 = sphi %s4336_s28, %s6308_s28   ;;  %s4281_s27 = sphi %s4334_s27, %s6307_s27   ;;  %s4277_s26 = sphi %s4332_s26, %s6306_s26  }
   0x6   : > { %s23_s30 = ssub.s32 %s4285_s28, %s4349_s29  ;;  %s26_s8 = sadd.s32 1, %s4281_s27 }
   0x7   : > { %p24_p0 = scmp.eq.s32.totalorder %s23_s30, 0  ;;  %p33_p1 = scmp.ne.s32.totalorder %s4281_s27, %s4277_s26 }
   0x8   : > { %p34_p2 = scmp.eq.s32.totalorder %s4285_s28, 0  ;;  %p3545_p4 = scmp.ge.s32.totalorder %s4285_s28, 2 }
   0x9   : > { %s4358_s9 = scalar_select %p24_p0, %s4281_s27, %s26_s8  }
   0xa   : > { %p35_p3 = por %p34_p2, %p33_p1  ;;  %229 = sbr.rel (%p3545_p4) target bundleno = 32 (0x20), region = 40 }
   0xf   : > { %232 = sbr.rel (!%p35_p3) target bundleno = 32 (0x20), region = 44  ;;  %s234_s10 = sand.u32 (%p35_p3), 1, %s4281_s27  }
  0x10   : > { %s3682_s11 = sshll.u32 (%p35_p3), %s4285_s28, 4  ;;  %s3683_s12 = smul.u32 (%p35_p3), 208, %s234_s10 }
  0x11   : > { %s4366_s15 = scalar_lea.vmem (%p35_p3), %s6185_s0, %s3682_s11 }
  0x12   : > { %v252_v1 = vld [vmem:[%s4366_s15] sm:$0xff] (%p35_p3)  ;;  %v254_v2 = vld [vmem:[%s4366_s15 + $0x8] sm:$0xff] (%p35_p3)  ;;  %s4374_s16 = scalar_lea.vmem (%p35_p3), [#allocation3], %s3683_s12 }
  0x13   : > { %v256_v3 = vld [vmem:[%s4366_s15 + $0x20] sm:$0xff] (%p35_p3)  ;;  %v258_v4 = vld [vmem:[%s4366_s15 + $0x28] sm:$0xff] (%p35_p3)  ;;  %253 = vst [vmem:[%s4374_s16] sm:$0xff] (%p35_p3), %v252_v1  ;;  %255 = vst [vmem:[%s4374_s16 + $0x8] sm:$0xff] (%p35_p3), %v254_v2 }
  0x14   : > { %v260_v5 = vld [vmem:[%s4366_s15 + $0x40] sm:$0xff]  ;;  %v262_v6 = vld [vmem:[%s4366_s15 + $0x48] sm:$0xff]  ;;  %257 = vst [vmem:[%s4374_s16 + $0x10] sm:$0xff] %v256_v3  ;;  %259 = vst [vmem:[%s4374_s16 + $0x18] sm:$0xff] %v258_v4 }
  0x15   : > { %261 = vst [vmem:[%s4374_s16 + $0x20] sm:$0xff] %v260_v5  ;;  %263 = vst [vmem:[%s4374_s16 + $0x28] sm:$0xff] %v262_v6  ;;  %v264_v7 = vld [vmem:[%s4366_s15 + $0x60] sm:$0xff]  ;;  %v266_v8 = vld [vmem:[%s4366_s15 + $0x68] sm:$0xff] }
  0x16   : > { %v268_v9 = vld [vmem:[%s4366_s15 + $0x80] sm:$0xff]  ;;  %265 = vst [vmem:[%s4374_s16 + $0x30] sm:$0xff] %v264_v7  ;;  %267 = vst [vmem:[%s4374_s16 + $0x38] sm:$0xff] %v266_v8  ;;  %v270_v10 = vld [vmem:[%s4366_s15 + $0x88] sm:$0xff] }
  0x17   : > { %269 = vst [vmem:[%s4374_s16 + $0x40] sm:$0xff] %v268_v9  ;;  %v272_v11 = vld [vmem:[%s4366_s15 + $0xa0] sm:$0xff]  ;;  %v274_v12 = vld [vmem:[%s4366_s15 + $0xa8] sm:$0xff]  ;;  %271 = vst [vmem:[%s4374_s16 + $0x48] sm:$0xff] %v270_v10 }
  0x18   : > { %273 = vst [vmem:[%s4374_s16 + $0x50] sm:$0xff] %v272_v11  ;;  %275 = vst [vmem:[%s4374_s16 + $0x58] sm:$0xff] %v274_v12  ;;  %v276_v13 = vld [vmem:[%s4366_s15 + $0xc0] sm:$0xff]  ;;  %v278_v14 = vld [vmem:[%s4366_s15 + $0xc8] sm:$0xff] }
  0x19   : > { %v280_v15 = vld [vmem:[%s4366_s15 + $0xe0] sm:$0xff]  ;;  %277 = vst [vmem:[%s4374_s16 + $0x60] sm:$0xff] %v276_v13  ;;  %279 = vst [vmem:[%s4374_s16 + $0x68] sm:$0xff] %v278_v14  ;;  %v282_v16 = vld [vmem:[%s4366_s15 + $0xe8] sm:$0xff] }
  0x1a   : > { %281 = vst [vmem:[%s4374_s16 + $0x70] sm:$0xff] %v280_v15  ;;  %v284_v17 = vld [vmem:[%s4366_s15 + $0x100] sm:$0xff]  ;;  %v286_v18 = vld [vmem:[%s4366_s15 + $0x108] sm:$0xff]  ;;  %283 = vst [vmem:[%s4374_s16 + $0x78] sm:$0xff] %v282_v16 }
  0x1b   : > { %285 = vst [vmem:[%s4374_s16 + $0x80] sm:$0xff] %v284_v17  ;;  %287 = vst [vmem:[%s4374_s16 + $0x88] sm:$0xff] %v286_v18  ;;  %v288_v19 = vld [vmem:[%s4366_s15 + $0x120] sm:$0xff]  ;;  %v290_v20 = vld [vmem:[%s4366_s15 + $0x128] sm:$0xff] }
  0x1c   : > { %v292_v21 = vld [vmem:[%s4366_s15 + $0x140] sm:$0xff]  ;;  %289 = vst [vmem:[%s4374_s16 + $0x90] sm:$0xff] %v288_v19  ;;  %291 = vst [vmem:[%s4374_s16 + $0x98] sm:$0xff] %v290_v20  ;;  %v294_v22 = vld [vmem:[%s4366_s15 + $0x148] sm:$0xff] }
  0x1d   : > { %293 = vst [vmem:[%s4374_s16 + $0xa0] sm:$0xff] %v292_v21  ;;  %v296_v23 = vld [vmem:[%s4366_s15 + $0x160] sm:$0xff]  ;;  %v298_v24 = vld [vmem:[%s4366_s15 + $0x168] sm:$0xff]  ;;  %295 = vst [vmem:[%s4374_s16 + $0xa8] sm:$0xff] %v294_v22 }
  0x1e   : > { %297 = vst [vmem:[%s4374_s16 + $0xb0] sm:$0xff] %v296_v23  ;;  %299 = vst [vmem:[%s4374_s16 + $0xb8] sm:$0xff] %v298_v24  ;;  %v300_v25 = vld [vmem:[%s4366_s15 + $0x180] sm:$0xff]  ;;  %v302_v26 = vld [vmem:[%s4366_s15 + $0x188] sm:$0xff] }
  0x1f   : > { %301 = vst [vmem:[%s4374_s16 + $0xc0] sm:$0xff] %v300_v25  ;;  %303 = vst [vmem:[%s4374_s16 + $0xc8] sm:$0xff] %v302_v26 }
  0x20 PF: > { %p3548_p5 = scmp.ge.s32.totalorder %s4285_s28, 1  ;;  %p308_p6 = scmp.lt.s32.totalorder %s4285_s28, 3 }
  0x22   : > { %p309_p7 = pnand %p3548_p5, %p308_p6 }
  0x24   : > { %312 = sbr.rel (%p309_p7) target bundleno = 1199 (0x4af), region = 67 }
  0x29   : > { %v572_v27 = vld [vmem:[%s6187_s2 + $0x70] sm:$0xff]  ;;  %v570_v28 = vld [vmem:[%s6187_s2 + $0x60] sm:$0xff]  ;;  %s315_s21 = sand.u32 1, %s4277_s26   ;;  %v4287_v29 = vmov 0   ;;  %v573_v30 = vld [vmem:[%s6187_s2 + $0x78] sm:$0xff]  ;;  %v6193_v8 = vlaneseq  ;;  %vm1102_vm0 = vcmask 261120  }
  0x2a   : > { %3711 = vset.pattern.permute.xlu0 %v4287_v29  ;;  %3712 = vset.pattern.permute.xlu1 %v4287_v29  ;;  %s3684_s22 = smul.u32 208, %s315_s21  ;;  %v571_v31 = vld [vmem:[%s6187_s2 + $0x68] sm:$0xff]  ;;  %v568_v42 = vld [vmem:[%s6187_s2 + $0x50] sm:$0xff]  ;;  %v569_v43 = vld [vmem:[%s6187_s2 + $0x58] sm:$0xff] }
  0x2b   : > { %694 = vperm.xlu0 %3711, %v572_v27   ;;  %684 = vperm.xlu1 %3712, %v570_v28   ;;  %v566_v53 = vld [vmem:[%s6187_s2 + $0x40] sm:$0xff]  ;;  %v567_v54 = vld [vmem:[%s6187_s2 + $0x48] sm:$0xff]  ;;  %v564_v63 = vld [vmem:[%s6187_s2 + $0x30] sm:$0xff]  ;;  %v4487_v19 = vshrl.u32 %v6193_v8, 7 }
  0x2c   : > { %1231 = vmatprep.mubr.bf16.mxu0 %v4287_v29  ;;  %s4440_s8 = scalar_lea.vmem [#allocation3], %s3684_s22  ;;  %v565_v0 = vld [vmem:[%s6187_s2 + $0x38] sm:$0xff]  ;;  %v562_v7 = vld [vmem:[%s6187_s2 + $0x20] sm:$0xff]  ;;  %v563_v9 = vld [vmem:[%s6187_s2 + $0x28] sm:$0xff] }
  0x2d   : > { %v357_v32 = vld [vmem:[%s4440_s8 + $0x28] sm:$0xff]  ;;  %v359_v33 = vld [vmem:[%s4440_s8 + $0x38] sm:$0xff]  ;;  %v356_v41 = vld [vmem:[%s4440_s8 + $0x20] sm:$0xff]  ;;  %6203 = vst [vmem:[#allocation4_spill] sm:$0xff] %v4487_v19 }
  0x2e   : > { %v365_v34 = vmul.f32 0.5, %v357_v32  ;;  %v367_v35 = vmul.f32 0.5, %v359_v33  ;;  %v405_v36 = vld [vmem:[%s4440_s8 + $0x68] sm:$0xff]  ;;  %v407_v37 = vld [vmem:[%s4440_s8 + $0x78] sm:$0xff]  ;;  %v358_v45 = vld [vmem:[%s4440_s8 + $0x30] sm:$0xff]  ;;  %v364_v46 = vmul.f32 0.5, %v356_v41 }
  0x2f   : > { %699 = vperm.xlu0 %3711, %v573_v30   ;;  %689 = vperm.xlu1 %3712, %v571_v31   ;;  %v413_v38 = vmul.f32 0.5, %v405_v36  ;;  %v415_v39 = vmul.f32 0.5, %v407_v37  ;;  %v3550_v40 = vld [vmem:[%s4440_s8 + $0xc0] ss:$8 sm:$0x3]  ;;  %v406_v48 = vld [vmem:[%s4440_s8 + $0x70] sm:$0xff] }
  0x30   : > { %3841 = vtanh.f32 %v365_v34  ;;  %v450_v44 = vmul.f32 0.5, %v3550_v40  ;;  %v404_v47 = vld [vmem:[%s4440_s8 + $0x60] sm:$0xff]  ;;  %v366_v49 = vmul.f32 0.5, %v358_v45  ;;  %v353_v50 = vld [vmem:[%s4440_s8 + $0x8] sm:$0xff]  ;;  %v355_v52 = vld [vmem:[%s4440_s8 + $0x18] sm:$0xff]  ;;  %v414_v55 = vmul.f32 0.5, %v406_v48 }
  0x31   : > { %3843 = vtanh.f32 %v367_v35  ;;  %v412_v51 = vmul.f32 0.5, %v404_v47  ;;  %v401_v56 = vld [vmem:[%s4440_s8 + $0x48] sm:$0xff]  ;;  %v361_v57 = vmul.f32 0.5, %v353_v50  ;;  %v403_v58 = vld [vmem:[%s4440_s8 + $0x58] sm:$0xff]  ;;  %v363_v59 = vmul.f32 0.5, %v355_v52  ;;  %v352_v60 = vld [vmem:[%s4440_s8] sm:$0xff] }
  0x32   : > { %3845 = vtanh.f32 %v413_v38  ;;  %v409_v61 = vmul.f32 0.5, %v401_v56  ;;  %v354_v62 = vld [vmem:[%s4440_s8 + $0x10] sm:$0xff]  ;;  %v411_v1 = vmul.f32 0.5, %v403_v58  ;;  %v400_v2 = vld [vmem:[%s4440_s8 + $0x40] sm:$0xff]  ;;  %v360_v3 = vmul.f32 0.5, %v352_v60  ;;  %v4493_v22 = vld [vmem:[%s4440_s8 + $0xa8] sm:$0xff] }
  0x33   : > { %674 = vperm.xlu0 %3711, %v568_v42   ;;  %679 = vperm.xlu1 %3712, %v569_v43   ;;  %3847 = vtanh.f32 %v415_v39  ;;  %v402_v4 = vld [vmem:[%s4440_s8 + $0x50] sm:$0xff]  ;;  %v362_v5 = vmul.f32 0.5, %v354_v62  ;;  %v408_v6 = vmul.f32 0.5, %v400_v2  ;;  %v399_v26 = vld [vmem:[%s4440_s8 + $0xb8] sm:$0xff]  ;;  %v470_v37 = vsub.s32 1, %v4487_v19  ;;  %v396_v48 = vld [vmem:[%s4440_s8 + $0xa0] sm:$0xff] }
  0x34   : > { %3849 = vtanh.f32 %v450_v44  ;;  %v410_v10 = vmul.f32 0.5, %v402_v4  ;;  %v560_v17 = vld [vmem:[%s6187_s2 + $0x10] sm:$0xff]  ;;  %v561_v20 = vld [vmem:[%s6187_s2 + $0x18] sm:$0xff]  ;;  %v558_v39 = vld [vmem:[%s6187_s2] sm:$0xff]  ;;  %v6194_v44 = vsub.s32 0, %v4487_v19 }
  0x35   : > { %3851 = vtanh.f32 %v364_v46  ;;  %v559_v40 = vld [vmem:[%s6187_s2 + $0x8] sm:$0xff]  ;;  %v588_v56 = vld [vmem:[%s6187_s2 + $0xf0] sm:$0xff]  ;;  %v589_v62 = vld [vmem:[%s6187_s2 + $0xf8] sm:$0xff] }
  0x36   : > { %3853 = vtanh.f32 %v366_v49  ;;  %v398_v49 = vld [vmem:[%s4440_s8 + $0xb0] sm:$0xff] }
  0x37   : > { %664 = vperm.xlu0 %3711, %v566_v53   ;;  %669 = vperm.xlu1 %3712, %v567_v54   ;;  %3855 = vtanh.f32 %v412_v51 }
  0x38   : > { %3857 = vtanh.f32 %v414_v55 }
  0x39   : > { %3859 = vtanh.f32 %v361_v57 }
  0x3a   : > { %3861 = vtanh.f32 %v363_v59 }
  0x3b   : > { %654 = vperm.xlu0 %3711, %v564_v63   ;;  %659 = vperm.xlu1 %3712, %v565_v0   ;;  %3863 = vtanh.f32 %v409_v61 }
  0x3c   : > { %3865 = vtanh.f32 %v411_v1 }
  0x3d   : > { %v3842_v11 = vpop.eup %3841  ;;  %3867 = vtanh.f32 %v360_v3 }
  0x3e   : > { %v3844_v12 = vpop.eup %3843  ;;  %v381_v13 = vmul.f32 0.5, %v3842_v11  ;;  %3869 = vtanh.f32 %v362_v5 }
  0x3f   : > { %v3846_v14 = vpop.eup %3845  ;;  %644 = vperm.xlu0 %3711, %v562_v7   ;;  %v383_v15 = vmul.f32 0.5, %v3844_v12  ;;  %649 = vperm.xlu1 %3712, %v563_v9   ;;  %3871 = vtanh.f32 %v408_v6  ;;  %v393_v9 = vld [vmem:[%s4440_s8 + $0x88] sm:$0xff] }
  0x40   : > { %v3848_v16 = vpop.eup %3847  ;;  %v429_v18 = vmul.f32 0.5, %v3846_v14  ;;  %3873 = vtanh.f32 %v410_v10  ;;  %v389_v25 = vadd.f32 0.5, %v381_v13  ;;  %v395_v13 = vld [vmem:[%s4440_s8 + $0x98] sm:$0xff] }
  0x41   : > { %v3850_v21 = vpop.eup %3849  ;;  %v431_v23 = vmul.f32 0.5, %v3848_v16  ;;  %v391_v31 = vadd.f32 0.5, %v383_v15  ;;  %v586_v16 = vld [vmem:[%s6187_s2 + $0xe0] sm:$0xff] }
  0x42   : > { %v3852_v24 = vpop.eup %3851  ;;  %v437_v27 = vadd.f32 0.5, %v429_v18  ;;  %v452_v28 = vmul.f32 0.5, %v3850_v21 }
  0x43   : > { %v3854_v30 = vpop.eup %3853  ;;  %634 = vperm.xlu0 %3711, %v560_v17   ;;  %v439_v32 = vadd.f32 0.5, %v431_v23  ;;  %v380_v33 = vmul.f32 0.5, %v3852_v24  ;;  %639 = vperm.xlu1 %3712, %v561_v20   ;;  %v587_v24 = vld [vmem:[%s6187_s2 + $0xe8] sm:$0xff] }
  0x44   : > { %v3856_v34 = vpop.eup %3855  ;;  %v445_v35 = vmul.f32 %v437_v27, %v4493_v22  ;;  %v453_v36 = vadd.f32 0.5, %v452_v28  ;;  %v382_v38 = vmul.f32 0.5, %v3854_v30 }
  0x45   : > { %v3858_v41 = vpop.eup %3857  ;;  %v447_v42 = vmul.f32 %v439_v32, %v399_v26  ;;  %v428_v43 = vmul.f32 0.5, %v3856_v34  ;;  %v388_v53 = vadd.f32 0.5, %v380_v33 }
  0x46   : > { %v3860_v45 = vpop.eup %3859  ;;  %v454_v46 = vmul.f32 10.0, %v453_v36  ;;  %v460_v47 = vsub.f32 %v389_v25, %v445_v35  ;;  %v430_v50 = vmul.f32 0.5, %v3858_v41  ;;  %v390_v59 = vadd.f32 0.5, %v382_v38  ;;  %v392_v36 = vld [vmem:[%s4440_s8 + $0x80] sm:$0xff] }
  0x47   : > { %v3862_v51 = vpop.eup %3861  ;;  %v462_v52 = vsub.f32 %v391_v31, %v447_v42  ;;  %v436_v54 = vadd.f32 0.5, %v428_v43  ;;  %624 = vperm.xlu0 %3711, %v558_v39   ;;  %v377_v55 = vmul.f32 0.5, %v3860_v45  ;;  %629 = vperm.xlu1 %3712, %v559_v40   ;;  %v394_v40 = vld [vmem:[%s4440_s8 + $0x90] sm:$0xff]  ;;  %s3549_s8 = sshll.u32 %s3542_s6, 1 }
  0x48   : > { %v3864_v57 = vpop.eup %3863  ;;  %v471_v58 = vrot.slane %v454_v46, %v470_v37  ;;  %v438_v60 = vadd.f32 0.5, %v430_v50  ;;  %v379_v61 = vmul.f32 0.5, %v3862_v51  ;;  %v4515_v1 = vrot.slane %v454_v46, %v6194_v44  ;;  %v584_v42 = vld [vmem:[%s6187_s2 + $0xd0] sm:$0xff]  ;;  %v585_v43 = vld [vmem:[%s6187_s2 + $0xd8] sm:$0xff]  ;;  %p347_p8 = scmp.lt.s32.totalorder %s3549_s8, 3 }
  0x49   : > { %v3866_v63 = vpop.eup %3865  ;;  %v444_v0 = vmul.f32 %v436_v54, %v396_v48  ;;  %v425_v2 = vmul.f32 0.5, %v3864_v57  ;;  %v385_v7 = vadd.f32 0.5, %v377_v55  ;;  %v582_v55 = vld [vmem:[%s6187_s2 + $0xc0] sm:$0xff] }
  0x4a   : > { %v3868_v3 = vpop.eup %3867  ;;  %v479_v4 = vmul.f32 %v471_v58, %v460_v47  ;;  %v481_v5 = vmul.f32 %v471_v58, %v462_v52  ;;  %v446_v6 = vmul.f32 %v438_v60, %v398_v49  ;;  %v387_v12 = vadd.f32 0.5, %v379_v61  ;;  %s6310_s8 = smov (!%p347_p8, %s3549_s8), 3 }
  0x4b   : > { %v3870_v10 = vpop.eup %3869  ;;  %v459_v11 = vsub.f32 %v388_v53, %v444_v0  ;;  %v427_v14 = vmul.f32 0.5, %v3866_v63  ;;  %v433_v15 = vadd.f32 0.5, %v425_v2  ;;  %774 = vperm.xlu0 %3711, %v588_v56   ;;  %779 = vperm.xlu1 %3712, %v589_v62   ;;  %v376_v23 = vmul.f32 0.5, %v3868_v3  ;;  %v583_v56 = vld [vmem:[%s6187_s2 + $0xc8] sm:$0xff]  ;;  %v580_v62 = vld [vmem:[%s6187_s2 + $0xb0] sm:$0xff]  ;;  %v581_v0 = vld [vmem:[%s6187_s2 + $0xb8] sm:$0xff]  ;;  %s349_s11 = scalar_lea.vmem %s6192_s7, %s6310_s8 }
  0x4c   : > { %v3872_v17 = vpop.eup %3871  ;;  %v487_v18 = vmul.f32 %v479_v4, %v4493_v22  ;;  %v489_v20 = vmul.f32 %v481_v5, %v399_v26  ;;  %v461_v21 = vsub.f32 %v390_v59, %v446_v6  ;;  %v378_v31 = vmul.f32 0.5, %v3870_v10  ;;  %v3713_v4 = vld [vmem:[%s6186_s1] sm:$0xff]   ;;  %v579_v5 = vld [vmem:[%s6187_s2 + $0xa8] sm:$0xff]  ;;  %v576_v6 = vld [vmem:[%s6187_s2 + $0x90] sm:$0xff] }
  0x4d   : > { %v3874_v25 = vpop.eup %3873  ;;  %v478_v27 = vmul.f32 %v4515_v1, %v459_v11  ;;  %v435_v28 = vadd.f32 0.5, %v427_v14  ;;  %v441_v30 = vmul.f32 %v433_v15, %v393_v9  ;;  %v424_v34 = vmul.f32 0.5, %v3872_v17  ;;  %v574_v10 = vld [vmem:[%s6187_s2 + $0x80] sm:$0xff]  ;;  %v575_v11 = vld [vmem:[%s6187_s2 + $0x88] sm:$0xff]  ;;  %v3715_v14 = vld [vmem:[%s6186_s1 + $0x10] sm:$0xff]  }
  0x4e   : > { %v493_v32 = vpack.c.bf16 %v489_v20, %v487_v18  ;;  %v480_v33 = vmul.f32 %v4515_v1, %v461_v21  ;;  %v426_v37 = vmul.f32 0.5, %v3874_v25  ;;  %v384_v39 = vadd.f32 0.5, %v376_v23  ;;  %v602_v15 = vld [vmem:[%s6187_s2 + $0x160] sm:$0xff]  ;;  %v600_v17 = vld [vmem:[%s6187_s2 + $0x150] sm:$0xff]  ;;  %v601_v18 = vld [vmem:[%s6187_s2 + $0x158] sm:$0xff] }
  0x4f   : > { %v486_v22 = vmul.f32 %v478_v27, %v396_v48  ;;  %v443_v35 = vmul.f32 %v435_v28, %v395_v13  ;;  %v456_v26 = vsub.f32 %v385_v7, %v441_v30  ;;  %764 = vperm.xlu0 %3711, %v586_v16   ;;  %769 = vperm.xlu1 %3712, %v587_v24   ;;  %v432_v41 = vadd.f32 0.5, %v424_v34  ;;  %v577_v7 = vld [vmem:[%s6187_s2 + $0x98] sm:$0xff]  ;;  %v603_v16 = vld [vmem:[%s6187_s2 + $0x168] sm:$0xff]  ;;  %v598_v21 = vld [vmem:[%s6187_s2 + $0x140] sm:$0xff] }
  0x50   : > { %1211 = vmatprep.subr.bf16.mxu0 %v493_v32  ;;  %v488_v38 = vmul.f32 %v480_v33, %v398_v49  ;;  %v386_v47 = vadd.f32 0.5, %v378_v31  ;;  %v434_v48 = vadd.f32 0.5, %v426_v37  ;;  %v3716_v20 = vld [vmem:[%s6186_s1 + $0x18] sm:$0xff]   ;;  %v599_v23 = vld [vmem:[%s6187_s2 + $0x148] sm:$0xff]  ;;  %v596_v24 = vld [vmem:[%s6187_s2 + $0x130] sm:$0xff] }
  0x51   : > { %v458_v45 = vsub.f32 %v387_v12, %v443_v35  ;;  %v475_v46 = vmul.f32 %v471_v58, %v456_v26  ;;  %v440_v51 = vmul.f32 %v432_v41, %v392_v36  ;;  %v604_v12 = vld [vmem:[%s6187_s2 + $0x170] sm:$0xff]  ;;  %v597_v25 = vld [vmem:[%s6187_s2 + $0x138] sm:$0xff]  ;;  %v3717_v27 = vld [vmem:[%s6186_s1 + $0x20] sm:$0xff]  }
  0x52   : > { %v492_v50 = vpack.c.bf16 %v488_v38, %v486_v22  ;;  %v442_v49 = vmul.f32 %v434_v48, %v394_v40  ;;  %v594_v28 = vld [vmem:[%s6187_s2 + $0x120] sm:$0xff]  ;;  %v595_v30 = vld [vmem:[%s6187_s2 + $0x128] sm:$0xff]  ;;  %v592_v31 = vld [vmem:[%s6187_s2 + $0x110] sm:$0xff] }
  0x53   : > { %v477_v52 = vmul.f32 %v471_v58, %v458_v45  ;;  %v483_v53 = vmul.f32 %v475_v46, %v393_v9  ;;  %754 = vperm.xlu0 %3711, %v584_v42   ;;  %759 = vperm.xlu1 %3712, %v585_v43   ;;  %v455_v54 = vsub.f32 %v384_v39, %v440_v51  ;;  %v3714_v9 = vld [vmem:[%s6186_s1 + $0x8] sm:$0xff]   ;;  %v593_v32 = vld [vmem:[%s6187_s2 + $0x118] sm:$0xff]  ;;  %v590_v34 = vld [vmem:[%s6187_s2 + $0x100] sm:$0xff] }
  0x54   : > { %1212 = vmatpush1.bf16.msra.mxu0 %v492_v50  ;;  %v457_v59 = vsub.f32 %v386_v47, %v442_v49  ;;  %v3718_v33 = vld [vmem:[%s6186_s1 + $0x28] sm:$0xff]   ;;  %v620_v35 = vld [vmem:[%s6187_s2 + $0x1f0] sm:$0xff]  ;;  %v621_v26 = vld [vmem:[%s6187_s2 + $0x1f8] sm:$0xff] }
  0x55   : > { %v485_v57 = vmul.f32 %v477_v52, %v395_v13  ;;  %v474_v60 = vmul.f32 %v4515_v1, %v455_v54  ;;  %v605_v13 = vld [vmem:[%s6187_s2 + $0x178] sm:$0xff]  ;;  %v591_v22 = vld [vmem:[%s6187_s2 + $0x108] sm:$0xff]  ;;  %v618_v37 = vld [vmem:[%s6187_s2 + $0x1e0] sm:$0xff] }
  0x56   : > { %v476_v58 = vmul.f32 %v4515_v1, %v457_v59  ;;  %v578_v1 = vld [vmem:[%s6187_s2 + $0xa0] sm:$0xff]  ;;  %v619_v38 = vld [vmem:[%s6187_s2 + $0x1e8] sm:$0xff]  ;;  %v616_v39 = vld [vmem:[%s6187_s2 + $0x1d0] sm:$0xff] }
  0x57   : > { %v491_v61 = vpack.c.bf16 %v485_v57, %v483_v53  ;;  %744 = vperm.xlu0 %3711, %v582_v55   ;;  %749 = vperm.xlu1 %3712, %v583_v56   ;;  %v482_v63 = vmul.f32 %v474_v60, %v392_v36  ;;  %v3719_v36 = vld [vmem:[%s6186_s1 + $0x30] sm:$0xff]   ;;  %v3720_v41 = vld [vmem:[%s6186_s1 + $0x38] sm:$0xff]   ;;  %v614_v42 = vld [vmem:[%s6187_s2 + $0x1c0] sm:$0xff] }
  0x58   : > { %v484_v2 = vmul.f32 %v476_v58, %v394_v40  ;;  %v617_v40 = vld [vmem:[%s6187_s2 + $0x1d8] sm:$0xff]  ;;  %v615_v43 = vld [vmem:[%s6187_s2 + $0x1c8] sm:$0xff]  ;;  %v612_v45 = vld [vmem:[%s6187_s2 + $0x1b0] sm:$0xff] }
  0x59   : > { %1213 = vmatprep.subr.bf16.mxu0 %v491_v61  ;;  %v613_v46 = vld [vmem:[%s6187_s2 + $0x1b8] sm:$0xff]  ;;  %v3721_v47 = vld [vmem:[%s6186_s1 + $0x40] sm:$0xff]   ;;  %v611_v50 = vld [vmem:[%s6187_s2 + $0x1a8] sm:$0xff] }
  0x5a   : > { %v490_v3 = vpack.c.bf16 %v484_v2, %v482_v63  ;;  %v610_v48 = vld [vmem:[%s6187_s2 + $0x1a0] sm:$0xff]  ;;  %v608_v51 = vld [vmem:[%s6187_s2 + $0x190] sm:$0xff]  ;;  %v609_v52 = vld [vmem:[%s6187_s2 + $0x198] sm:$0xff] }
  0x5b   : > { %734 = vperm.xlu0 %3711, %v580_v62   ;;  %739 = vperm.xlu1 %3712, %v581_v0   ;;  %v3722_v53 = vld [vmem:[%s6186_s1 + $0x48] sm:$0xff]   ;;  %v606_v49 = vld [vmem:[%s6187_s2 + $0x180] sm:$0xff]  ;;  %v2206_v55 = vld [vmem:[%s6189_s4 + $0x70] sm:$0xff] }
  0x5c   : > { %1214 = vmatpush1.bf16.msra.mxu0 %v490_v3  ;;  %v607_v54 = vld [vmem:[%s6187_s2 + $0x188] sm:$0xff]  ;;  %v2207_v56 = vld [vmem:[%s6189_s4 + $0x78] sm:$0xff]  ;;  %v3723_v57 = vld [vmem:[%s6186_s1 + $0x50] sm:$0xff]  }
  0x5d   : > { %v2204_v59 = vld [vmem:[%s6189_s4 + $0x60] sm:$0xff]  ;;  %v2205_v60 = vld [vmem:[%s6189_s4 + $0x68] sm:$0xff]  ;;  %v2202_v61 = vld [vmem:[%s6189_s4 + $0x50] sm:$0xff] }
  0x5e   : > { %v2203_v58 = vld [vmem:[%s6189_s4 + $0x58] sm:$0xff]  ;;  %v2200_v63 = vld [vmem:[%s6189_s4 + $0x40] sm:$0xff]  ;;  %v2201_v0 = vld [vmem:[%s6189_s4 + $0x48] sm:$0xff] }
  0x5f   : > { %724 = vperm.xlu0 %3711, %v578_v1   ;;  %729 = vperm.xlu1 %3712, %v579_v5   ;;  %v3724_v62 = vld [vmem:[%s6186_s1 + $0x58] sm:$0xff]   ;;  %v2198_v2 = vld [vmem:[%s6189_s4 + $0x30] sm:$0xff]  ;;  %v2196_v1 = vld [vmem:[%s6189_s4 + $0x20] sm:$0xff] }
  0x60   : > { %3583 = vmatmul.mubr.msk.bf16.vlgmr.msra.gmra.mxu0 %vm1102_vm0, %v3713_v4  ;;  %v2199_v3 = vld [vmem:[%s6189_s4 + $0x38] sm:$0xff]  ;;  %v3725_v4 = vld [vmem:[%s6186_s1 + $0x60] sm:$0xff]   ;;  %v2197_v5 = vld [vmem:[%s6189_s4 + $0x28] sm:$0xff] }
  0x61   : > { %1241 = vmatprep.mubr.bf16.mxu0 %v4287_v29 }
  0x63   : > { %714 = vperm.xlu0 %3711, %v576_v6   ;;  %719 = vperm.xlu1 %3712, %v577_v7   ;;  %v2194_v6 = vld [vmem:[%s6189_s4 + $0x10] sm:$0xff]  ;;  %v2195_v7 = vld [vmem:[%s6189_s4 + $0x18] sm:$0xff] }
  0x67   : > { %704 = vperm.xlu0 %3711, %v574_v10   ;;  %709 = vperm.xlu1 %3712, %v575_v11   ;;  %v2192_v10 = vld [vmem:[%s6189_s4] sm:$0xff]  ;;  %v2193_v11 = vld [vmem:[%s6189_s4 + $0x8] sm:$0xff] }
  0x68   : > { %3584 = vmatmul.mubr.msk.bf16.gmra.mxu0 %vm1102_vm0, %v3714_v9  ;;  %v3726_v9 = vld [vmem:[%s6186_s1 + $0x68] sm:$0xff]  }
  0x69   : > { %1251 = vmatprep.mubr.bf16.mxu0 %v4287_v29 }
  0x6b   : > { %854 = vperm.xlu0 %3711, %v604_v12   ;;  %859 = vperm.xlu1 %3712, %v605_v13   ;;  %v2222_v12 = vld [vmem:[%s6189_s4 + $0xf0] sm:$0xff]  ;;  %v2223_v13 = vld [vmem:[%s6189_s4 + $0xf8] sm:$0xff] }
  0x6f   : > { %844 = vperm.xlu0 %3711, %v602_v15   ;;  %849 = vperm.xlu1 %3712, %v603_v16   ;;  %v2220_v15 = vld [vmem:[%s6189_s4 + $0xe0] sm:$0xff]  ;;  %v2221_v16 = vld [vmem:[%s6189_s4 + $0xe8] sm:$0xff] }
  0x70   : > { %3585 = vmatmul.mubr.msk.bf16.gmra.mxu0 %vm1102_vm0, %v3715_v14  ;;  %v3727_v14 = vld [vmem:[%s6186_s1 + $0x70] sm:$0xff]  }
  0x71   : > { %1261 = vmatprep.mubr.bf16.mxu0 %v4287_v29 }
  0x73   : > { %834 = vperm.xlu0 %3711, %v600_v17   ;;  %839 = vperm.xlu1 %3712, %v601_v18   ;;  %v2218_v17 = vld [vmem:[%s6189_s4 + $0xd0] sm:$0xff]  ;;  %v2219_v18 = vld [vmem:[%s6189_s4 + $0xd8] sm:$0xff] }
  0x77   : > { %824 = vperm.xlu0 %3711, %v598_v21   ;;  %829 = vperm.xlu1 %3712, %v599_v23   ;;  %v2216_v21 = vld [vmem:[%s6189_s4 + $0xc0] sm:$0xff]  ;;  %v2217_v23 = vld [vmem:[%s6189_s4 + $0xc8] sm:$0xff] }
  0x78   : > { %3586 = vmatmul.mubr.msk.bf16.gmra.mxu0 %vm1102_vm0, %v3716_v20  ;;  %v3728_v20 = vld [vmem:[%s6186_s1 + $0x78] sm:$0xff]  }
  0x79   : > { %1271 = vmatprep.mubr.bf16.mxu0 %v4287_v29 }
  0x7b   : > { %814 = vperm.xlu0 %3711, %v596_v24   ;;  %819 = vperm.xlu1 %3712, %v597_v25   ;;  %v2214_v24 = vld [vmem:[%s6189_s4 + $0xb0] sm:$0xff]  ;;  %v2215_v25 = vld [vmem:[%s6189_s4 + $0xb8] sm:$0xff] }
  0x7f   : > { %804 = vperm.xlu0 %3711, %v594_v28   ;;  %809 = vperm.xlu1 %3712, %v595_v30   ;;  %v2212_v28 = vld [vmem:[%s6189_s4 + $0xa0] sm:$0xff]  ;;  %v2213_v30 = vld [vmem:[%s6189_s4 + $0xa8] sm:$0xff] }
  0x80   : > { %3587 = vmatmul.mubr.msk.bf16.gmra.mxu0 %vm1102_vm0, %v3717_v27  ;;  %v3729_v27 = vld [vmem:[%s6186_s1 + $0x80] sm:$0xff]  }
  0x81   : > { %1281 = vmatprep.mubr.bf16.mxu0 %v4287_v29 }
  0x83   : > { %794 = vperm.xlu0 %3711, %v592_v31   ;;  %799 = vperm.xlu1 %3712, %v593_v32   ;;  %v2210_v31 = vld [vmem:[%s6189_s4 + $0x90] sm:$0xff]  ;;  %v2211_v32 = vld [vmem:[%s6189_s4 + $0x98] sm:$0xff] }
  0x87   : > { %784 = vperm.xlu0 %3711, %v590_v34   ;;  %789 = vperm.xlu1 %3712, %v591_v22   ;;  %v2208_v34 = vld [vmem:[%s6189_s4 + $0x80] sm:$0xff]  ;;  %v2209_v22 = vld [vmem:[%s6189_s4 + $0x88] sm:$0xff] }
  0x88   : > { %3588 = vmatmul.mubr.msk.bf16.gmra.mxu0 %vm1102_vm0, %v3718_v33  ;;  %v3730_v33 = vld [vmem:[%s6186_s1 + $0x88] sm:$0xff]  }
  0x89   : > { %1291 = vmatprep.mubr.bf16.mxu0 %v4287_v29 }
  0x8b   : > { %934 = vperm.xlu0 %3711, %v620_v35   ;;  %939 = vperm.xlu1 %3712, %v621_v26   ;;  %v3379_v35 = vld [vmem:[#allocation2] sm:$0x1]  ;;  %v3731_v26 = vld [vmem:[%s6186_s1 + $0x90] sm:$0xff]  }
  0x8f   : > { %924 = vperm.xlu0 %3711, %v618_v37   ;;  %929 = vperm.xlu1 %3712, %v619_v38  }
  0x90   : > { %3589 = vmatmul.mubr.msk.bf16.gmra.mxu0 %vm1102_vm0, %v3719_v36  ;;  %v3732_v36 = vld [vmem:[%s6186_s1 + $0x98] sm:$0xff]  }
  0x91   : > { %1301 = vmatprep.mubr.bf16.mxu0 %v4287_v29 }
  0x93   : > { %914 = vperm.xlu0 %3711, %v616_v39   ;;  %919 = vperm.xlu1 %3712, %v617_v40   ;;  %v3733_v40 = vld [vmem:[%s6186_s1 + $0xa0] sm:$0xff]  }
  0x97   : > { %904 = vperm.xlu0 %3711, %v614_v42   ;;  %909 = vperm.xlu1 %3712, %v615_v43   ;;  %v3734_v43 = vld [vmem:[%s6186_s1 + $0xa8] sm:$0xff]  }
  0x98   : > { %3590 = vmatmul.mubr.msk.bf16.gmra.mxu0 %vm1102_vm0, %v3720_v41 }
  0x99   : > { %1311 = vmatprep.mubr.bf16.mxu0 %v4287_v29 }
  0x9b   : > { %894 = vperm.xlu0 %3711, %v612_v45   ;;  %899 = vperm.xlu1 %3712, %v613_v46  }
  0x9f   : > { %884 = vperm.xlu0 %3711, %v610_v48   ;;  %889 = vperm.xlu1 %3712, %v611_v50   ;;  %v3735_v48 = vld [vmem:[%s6186_s1 + $0xb0] sm:$0xff]  }
  0xa0   : > { %3591 = vmatmul.mubr.msk.bf16.gmra.mxu0 %vm1102_vm0, %v3721_v47 }
  0xa1   : > { %1321 = vmatprep.mubr.bf16.mxu0 %v4287_v29 }
  0xa3   : > { %874 = vperm.xlu0 %3711, %v608_v51   ;;  %879 = vperm.xlu1 %3712, %v609_v52  }
  0xa6   : > { %v4858_v37 = vpop.permute.xlu0 %694  ;;  %v4862_v38 = vpop.permute.xlu1 %684 }
  0xa7   : > { %864 = vperm.xlu0 %3711, %v606_v49   ;;  %869 = vperm.xlu1 %3712, %v607_v54  }
  0xa8   : > { %3592 = vmatmul.mubr.msk.bf16.gmra.mxu0 %vm1102_vm0, %v3722_v53  ;;  %v3736_v53 = vld [vmem:[%s6186_s1 + $0xb8] sm:$0xff]  }
  0xa9   : > { %1331 = vmatprep.mubr.bf16.mxu0 %v4287_v29 }
  0xaa   : > { %v4864_v39 = vpop.permute.xlu0 %699  ;;  %v4869_v41 = vpop.permute.xlu1 %689 }
  0xab   : > { %2296 = vperm.xlu0 %3711, %v2206_v55   ;;  %2301 = vperm.xlu1 %3712, %v2207_v56   ;;  %v3737_v55 = vld [vmem:[%s6186_s1 + $0xc0] sm:$0xff]  }
  0xae   : > { %v4873_v42 = vpop.permute.xlu0 %674  ;;  %v4878_v45 = vpop.permute.xlu1 %679 }
  0xaf   : > { %2286 = vperm.xlu0 %3711, %v2204_v59   ;;  %2291 = vperm.xlu1 %3712, %v2205_v60  }
  0xb0   : > { %3593 = vmatmul.mubr.msk.bf16.gmra.mxu0 %vm1102_vm0, %v3723_v57 }
  0xb1   : > { %1341 = vmatprep.mubr.bf16.mxu0 %v4287_v29 }
  0xb2   : > { %v4880_v46 = vpop.permute.xlu0 %664  ;;  %v4884_v47 = vpop.permute.xlu1 %669 }
  0xb3   : > { %2276 = vperm.xlu0 %3711, %v2202_v61   ;;  %2281 = vperm.xlu1 %3712, %v2203_v58  }
  0xb6   : > { %v4889_v50 = vpop.permute.xlu0 %654  ;;  %v4893_v51 = vpop.permute.xlu1 %659 }
  0xb7   : > { %2266 = vperm.xlu0 %3711, %v2200_v63   ;;  %2271 = vperm.xlu1 %3712, %v2201_v0  }
  0xb8   : > { %3594 = vmatmul.mubr.msk.bf16.gmra.mxu0 %vm1102_vm0, %v3724_v62 }
  0xb9   : > { %1351 = vmatprep.mubr.bf16.mxu0 %v4287_v29 }
  0xba   : > { %v4895_v52 = vpop.permute.xlu0 %644  ;;  %v4900_v49 = vpop.permute.xlu1 %649 }
  0xbb   : > { %2256 = vperm.xlu0 %3711, %v2198_v2   ;;  %2261 = vperm.xlu1 %3712, %v2199_v3   ;;  %v3738_v2 = vld [vmem:[%s6186_s1 + $0xc8] sm:$0xff]  }
  0xbe   : > { %v635_v54 = vpop.permute.xlu0 %634  ;;  %v640_v56 = vpop.permute.xlu1 %639 }
  0xbf   : > { %2246 = vperm.xlu0 %3711, %v2196_v1   ;;  %2251 = vperm.xlu1 %3712, %v2197_v5  }
  0xc0   : > { %3595 = vmatmul.mubr.msk.bf16.gmra.mxu0 %vm1102_vm0, %v3725_v4 }
  0xc1   : > { %1361 = vmatprep.mubr.bf16.mxu0 %v4287_v29 }
  0xc2   : > { %v625_v57 = vpop.permute.xlu0 %624  ;;  %v630_v63 = vpop.permute.xlu1 %629 }
  0xc3   : > { %2236 = vperm.xlu0 %3711, %v2194_v6   ;;  %2241 = vperm.xlu1 %3712, %v2195_v7  }
  0xc7   : > { %2226 = vperm.xlu0 %3711, %v2192_v10   ;;  %2231 = vperm.xlu1 %3712, %v2193_v11  }
  0xc8   : > { %3596 = vmatmul.mubr.msk.bf16.gmra.mxu0 %vm1102_vm0, %v3726_v9 }
  0xc9   : > { %1371 = vmatprep.mubr.bf16.mxu0 %v4287_v29 }
  0xcb   : > { %2376 = vperm.xlu0 %3711, %v2222_v12   ;;  %2381 = vperm.xlu1 %3712, %v2223_v13  }
  0xcf   : > { %2366 = vperm.xlu0 %3711, %v2220_v15   ;;  %2371 = vperm.xlu1 %3712, %v2221_v16   ;;  %v3739_v15 = vld [vmem:[%s6186_s1 + $0xd0] sm:$0xff]  }
  0xd0   : > { %3597 = vmatmul.mubr.msk.bf16.gmra.mxu0 %vm1102_vm0, %v3727_v14 }
  0xd1   : > { %1381 = vmatprep.mubr.bf16.mxu0 %v4287_v29 }
  0xd3   : > { %2356 = vperm.xlu0 %3711, %v2218_v17   ;;  %2361 = vperm.xlu1 %3712, %v2219_v18  }
  0xd7   : > { %2346 = vperm.xlu0 %3711, %v2216_v21   ;;  %2351 = vperm.xlu1 %3712, %v2217_v23  }
  0xd8   : > { %3598 = vmatmul.mubr.msk.bf16.gmra.mxu0 %vm1102_vm0, %v3728_v20 }
  0xd9   : > { %1391 = vmatprep.mubr.bf16.mxu0 %v4287_v29 }
  0xdb   : > { %2336 = vperm.xlu0 %3711, %v2214_v24   ;;  %2341 = vperm.xlu1 %3712, %v2215_v25  }
  0xdf   : > { %2326 = vperm.xlu0 %3711, %v2212_v28   ;;  %2331 = vperm.xlu1 %3712, %v2213_v30   ;;  %v3740_v30 = vld [vmem:[%s6186_s1 + $0xd8] sm:$0xff]  }
  0xe0   : > { %3599 = vmatmul.mubr.msk.bf16.gmra.mxu0 %vm1102_vm0, %v3729_v27 }
  0xe1   : > { %1401 = vmatprep.mubr.bf16.mxu0 %v4287_v29 }
  0xe3   : > { %2316 = vperm.xlu0 %3711, %v2210_v31   ;;  %2321 = vperm.xlu1 %3712, %v2211_v32  }
  0xe7   : > { %2306 = vperm.xlu0 %3711, %v2208_v34   ;;  %2311 = vperm.xlu1 %3712, %v2209_v22  }
  0xe8   : > { %3600 = vmatmul.mubr.msk.bf16.gmra.mxu0 %vm1102_vm0, %v3730_v33  ;;  %v4926_v33 = vpop.permute.xlu0 %774 }
  0xe9   : > { %1411 = vmatprep.mubr.bf16.mxu0 %v4287_v29 }
  0xeb   : > { %3382 = vperm.xlu0 %3711, %v3379_v35  }
  0xf0   : > { %3601 = vmatmul.mubr.msk.bf16.gmra.mxu0 %vm1102_vm0, %v3731_v26 }
  0xf1   : > { %1421 = vmatprep.mubr.bf16.mxu0 %v4287_v29 }
  0xf8   : > { %3602 = vmatmul.mubr.msk.bf16.gmra.mxu0 %vm1102_vm0, %v3732_v36 }
  0xf9   : > { %1431 = vmatprep.mubr.bf16.mxu0 %v4287_v29 }
 0x100   : > { %3603 = vmatmul.mubr.msk.bf16.gmra.mxu0 %vm1102_vm0, %v3733_v40 }
 0x101   : > { %1441 = vmatprep.mubr.bf16.mxu0 %v4287_v29 }
 0x108   : > { %3604 = vmatmul.mubr.msk.bf16.gmra.mxu0 %vm1102_vm0, %v3734_v43 }
 0x109   : > { %1451 = vmatprep.mubr.bf16.mxu0 %v4287_v29 }
 0x110   : > { %3605 = vmatmul.mubr.msk.bf16.gmra.mxu0 %vm1102_vm0, %v3735_v48 }
 0x111   : > { %1461 = vmatprep.mubr.bf16.mxu0 %v4287_v29 }
 0x118   : > { %3606 = vmatmul.mubr.msk.bf16.gmra.mxu0 %vm1102_vm0, %v3736_v53  ;;  %v4932_v53 = vpop.permute.xlu1 %779 }
 0x119   : > { %1471 = vmatprep.mubr.bf16.mxu0 %v4287_v29 }
 0x120   : > { %v1233_v59 = vpop.f32.mrf.mxu0  ;;  %3607 = vmatmul.mubr.msk.bf16.gmra.mxu0 %vm1102_vm0, %v3737_v55 }
 0x121   : > { %v1234_v60 = vadd.f32 %v1233_v59, %v625_v57  ;;  %1481 = vmatprep.mubr.bf16.mxu0 %v4287_v29 }
 0x122   : > { %v1235_v61 = vpop.f32.mrf.mxu0 }
 0x123   : > { %v1552_v58 = vmul.f32 0.5, %v1234_v60  ;;  %v1236_v62 = vadd.f32 %v1235_v61, %v625_v57  ;;  %v4938_v57 = vpop.permute.xlu0 %764  ;;  %v3741_v61 = vld [vmem:[%s6186_s1 + $0xe0] sm:$0xff]  }
 0x124   : > { %v1237_v0 = vpop.f32.mrf.mxu0 }
 0x125   : > { %v1553_v3 = vmul.f32 0.5, %v1236_v62  ;;  %v1238_v4 = vadd.f32 %v1237_v0, %v630_v63  ;;  %3875 = vtanh.f32 %v1552_v58 }
 0x126   : > { %v1239_v1 = vpop.f32.mrf.mxu0 }
 0x127   : > { %v1554_v5 = vmul.f32 0.5, %v1238_v4  ;;  %v1240_v6 = vadd.f32 %v1239_v1, %v630_v63  ;;  %3877 = vtanh.f32 %v1553_v3 }
 0x128   : > { %v1243_v7 = vpop.f32.mrf.mxu0  ;;  %3608 = vmatmul.mubr.msk.bf16.gmra.mxu0 %vm1102_vm0, %v3738_v2 }
 0x129   : > { %3879 = vtanh.f32 %v1554_v5  ;;  %v1555_v9 = vmul.f32 0.5, %v1240_v6  ;;  %v1244_v10 = vadd.f32 %v1243_v7, %v635_v54  ;;  %1491 = vmatprep.mubr.bf16.mxu0 %v4287_v29  ;;  %v4953_v6 = vpop.permute.xlu1 %769 }
 0x12a   : > { %v1245_v11 = vpop.f32.mrf.mxu0 }
 0x12b   : > { %3881 = vtanh.f32 %v1555_v9  ;;  %v1556_v12 = vmul.f32 0.5, %v1244_v10  ;;  %v1246_v13 = vadd.f32 %v1245_v11, %v635_v54 }
 0x12c   : > { %v1247_v14 = vpop.f32.mrf.mxu0 }
 0x12d   : > { %v1557_v16 = vmul.f32 0.5, %v1246_v13  ;;  %v1248_v17 = vadd.f32 %v1247_v14, %v640_v56  ;;  %3883 = vtanh.f32 %v1556_v12  ;;  %v4961_v12 = vpop.permute.xlu0 %754 }
 0x12e   : > { %v1249_v18 = vpop.f32.mrf.mxu0 }
 0x12f   : > { %v1558_v20 = vmul.f32 0.5, %v1248_v17  ;;  %v1250_v21 = vadd.f32 %v1249_v18, %v640_v56  ;;  %3885 = vtanh.f32 %v1557_v16  ;;  %v3742_v17 = vld [vmem:[%s6186_s1 + $0xe8] sm:$0xff]  }
 0x130   : > { %v4917_v23 = vpop.f32.mrf.mxu0  ;;  %3609 = vmatmul.mubr.msk.bf16.gmra.mxu0 %vm1102_vm0, %v3739_v15 }
 0x131   : > { %3887 = vtanh.f32 %v1558_v20  ;;  %v1559_v24 = vmul.f32 0.5, %v1250_v21  ;;  %1501 = vmatprep.mubr.bf16.mxu0 %v4287_v29  ;;  %v4976_v21 = vpop.permute.xlu1 %759 }
 0x132   : > { %v1255_v25 = vpop.f32.mrf.mxu0  ;;  %v3876_v27 = vpop.eup %3875 }
 0x133   : > { %3889 = vtanh.f32 %v1559_v24  ;;  %v1808_v34 = vmul.f32 0.5, %v3876_v27 }
 0x134   : > { %v4921_v28 = vpop.f32.mrf.mxu0  ;;  %v3878_v31 = vpop.eup %3877 }
 0x135   : > { %v1809_v36 = vmul.f32 0.5, %v3878_v31  ;;  %v4934_v54 = vadd.f32 0.5, %v1808_v34  ;;  %v4984_v34 = vpop.permute.xlu1 %749 }
 0x136   : > { %v3880_v32 = vpop.eup %3879  ;;  %v1259_v22 = vpop.f32.mrf.mxu0 }
 0x137   : > { %v1810_v35 = vmul.f32 0.5, %v3880_v32  ;;  %v4940_v59 = vadd.f32 0.5, %v1809_v36  ;;  %v1256_v36 = vadd.f32 %v1255_v25, %v4895_v52 }
 0x138   : > { %v3882_v26 = vpop.eup %3881  ;;  %v1263_v40 = vpop.f32.mrf.mxu0  ;;  %3610 = vmatmul.mubr.msk.bf16.gmra.mxu0 %vm1102_vm0, %v3740_v30 }
 0x139   : > { %v4929_v43 = vadd.f32 0.5, %v1810_v35  ;;  %v1811_v48 = vmul.f32 0.5, %v3882_v26  ;;  %1511 = vmatprep.mubr.bf16.mxu0 %v4287_v29  ;;  %v4980_v30 = vpop.permute.xlu0 %744  ;;  %v3743_v26 = vld [vmem:[%s6186_s1 + $0xf0] sm:$0xff]  }
 0x13a   : > { %v4936_v55 = vpop.f32.mrf.mxu0  ;;  %v3884_v56 = vpop.eup %3883 }
 0x13b   : > { %v4947_v58 = vadd.f32 0.5, %v1811_v48  ;;  %v1812_v2 = vmul.f32 0.5, %v3884_v56  ;;  %v1260_v56 = vadd.f32 %v1259_v22, %v4900_v49 }
 0x13c   : > { %v4942_v60 = vpop.f32.mrf.mxu0  ;;  %v3886_v63 = vpop.eup %3885 }
 0x13d   : > { %v1813_v7 = vmul.f32 0.5, %v3886_v63  ;;  %v4963_v13 = vadd.f32 0.5, %v1812_v2  ;;  %v4990_v48 = vpop.permute.xlu0 %734  ;;  %v1264_v63 = vadd.f32 %v1263_v40, %v4889_v50  ;;  %v1563_v25 = vmul.f32 0.5, %v1260_v56 }
 0x13e   : > { %v3888_v0 = vpop.eup %3887  ;;  %v1269_v3 = vpop.f32.mrf.mxu0 }
 0x13f   : > { %v1814_v1 = vmul.f32 0.5, %v3888_v0  ;;  %v4965_v15 = vadd.f32 0.5, %v1813_v7  ;;  %v1270_v0 = vadd.f32 %v1269_v3, %v4893_v51  ;;  %v4998_v7 = vpop.permute.xlu1 %739  ;;  %v1564_v22 = vmul.f32 0.5, %v1264_v63 }
 0x140   : > { %v3890_v5 = vpop.eup %3889  ;;  %v4955_v9 = vpop.f32.mrf.mxu0  ;;  %3611 = vmatmul.mubr.msk.bf16.gmra.mxu0 %vm1102_vm0, %v3741_v61 }
 0x141   : > { %v4958_v10 = vadd.f32 0.5, %v1814_v1  ;;  %v1815_v11 = vmul.f32 0.5, %v3890_v5  ;;  %1521 = vmatprep.mubr.bf16.mxu0 %v4287_v29  ;;  %v1561_v1 = vmul.f32 0.5, %v1256_v36  ;;  %v5002_v40 = vpop.permute.xlu0 %724  ;;  %v1567_v3 = vmul.f32 0.5, %v1270_v0 }
 0x142   : > { %v1275_v14 = vpop.f32.mrf.mxu0 }
 0x143   : > { %v4972_v18 = vadd.f32 0.5, %v1815_v11  ;;  %v1276_v5 = vadd.f32 %v1275_v14, %v4880_v46  ;;  %v3744_v14 = vld [vmem:[%s6186_s1 + $0xf8] sm:$0xff]   ;;  %3891 = vtanh.f32 %v1561_v1  ;;  %v5014_v0 = vpop.permute.xlu1 %729 }
 0x144   : > { %v4967_v16 = vpop.f32.mrf.mxu0  ;;  %3893 = vtanh.f32 %v1563_v25 }
 0x145   : > { %3895 = vtanh.f32 %v1564_v22 }
 0x146   : > { %v1279_v24 = vpop.f32.mrf.mxu0  ;;  %3897 = vtanh.f32 %v1567_v3 }
 0x147   : > { %v1280_v11 = vadd.f32 %v1279_v24, %v4884_v47  ;;  %v3747_v24 = vld [vmem:[%s6188_s3 + $0x4] ss:$16 sps:$4 sm:$0xff]  }
 0x148   : > { %v1283_v31 = vpop.f32.mrf.mxu0  ;;  %3612 = vmatmul.mubr.msk.bf16.gmra.mxu0 %vm1102_vm0, %v3742_v17  ;;  %2736 = vmatprep.mubr.bf16.mxu1 %v3747_v24 }
 0x149   : > { %1531 = vmatprep.mubr.bf16.mxu0 %v4287_v29  ;;  %v1284_v8 = vadd.f32 %v1283_v31, %v4873_v42  ;;  %v1571_v31 = vmul.f32 0.5, %v1280_v11  ;;  %v5018_v11 = vpop.permute.xlu0 %714 }
 0x14a   : > { %v1285_v32 = vpop.f32.mrf.mxu0 }
 0x14b   : > { %v1286_v44 = vadd.f32 %v1285_v32, %v4873_v42  ;;  %v1572_v42 = vmul.f32 0.5, %v1284_v8 }
 0x14c   : > { %v1287_v35 = vpop.f32.mrf.mxu0 }
 0x14d   : > { %v1573_v1 = vmul.f32 0.5, %v1286_v44 }
 0x14e   : > { %v1289_v61 = vpop.f32.mrf.mxu0 }
 0x14f   : > { %v1290_v3 = vadd.f32 %v1289_v61, %v4878_v45 }
 0x150   : > { %v1293_v2 = vpop.f32.mrf.mxu0  ;;  %3613 = vmatmul.mubr.msk.bf16.gmra.mxu0 %vm1102_vm0, %v3743_v26 }
 0x151   : > { %1541 = vmatprep.mubr.bf16.mxu0 %v4287_v29  ;;  %v1569_v29 = vmul.f32 0.5, %v1276_v5  ;;  %v1294_v24 = vadd.f32 %v1293_v2, %v4862_v38 }
 0x152   : > { %v1295_v17 = vpop.f32.mrf.mxu0 }
 0x153   : > { %v1296_v36 = vadd.f32 %v1295_v17, %v4862_v38  ;;  %3899 = vtanh.f32 %v1569_v29  ;;  %v1576_v38 = vmul.f32 0.5, %v1294_v24 }
 0x154   : > { %v1297_v26 = vpop.f32.mrf.mxu0  ;;  %3901 = vtanh.f32 %v1571_v31 }
 0x155   : > { %v1298_v56 = vadd.f32 %v1297_v26, %v4869_v41  ;;  %v1577_v17 = vmul.f32 0.5, %v1296_v36  ;;  %3903 = vtanh.f32 %v1572_v42  ;;  %v5023_v36 = vpop.permute.xlu1 %719  ;;  %v705_v42 = vpop.permute.xlu0 %704 }
 0x156   : > { %v1299_v63 = vpop.f32.mrf.mxu0  ;;  %3905 = vtanh.f32 %v1573_v1 }
 0x157   : > { %v1300_v32 = vadd.f32 %v1299_v63, %v4869_v41  ;;  %v1578_v26 = vmul.f32 0.5, %v1298_v56  ;;  %3907 = vtanh.f32 %v1577_v17  ;;  %v1288_v63 = vadd.f32 %v1287_v35, %v4878_v45  ;;  %v5028_v17 = vpop.eup %3891 }
 0x158   : > { %v1303_v5 = vpop.f32.mrf.mxu0  ;;  %3614 = vmatmul.mubr.msk.bf16.gmra.mxu0 %vm1102_vm0, %v3744_v14  ;;  %v5032_v45 = vpop.eup %3893 }
 0x159   : > { %v1304_v25 = vadd.f32 %v1303_v5, %v4858_v37  ;;  %v1579_v8 = vmul.f32 0.5, %v1300_v32  ;;  %3909 = vtanh.f32 %v1578_v26  ;;  %v1575_v32 = vmul.f32 0.5, %v1290_v3 }
 0x15a   : > { %v1305_v22 = vpop.f32.mrf.mxu0  ;;  %v1574_v35 = vmul.f32 0.5, %v1288_v63 }
 0x15b   : > { %v1306_v41 = vadd.f32 %v1305_v22, %v4858_v37  ;;  %v1580_v14 = vmul.f32 0.5, %v1304_v25  ;;  %3911 = vtanh.f32 %v1579_v8  ;;  %v1278_v25 = vadd.f32 %v4967_v16, %v4884_v47  ;;  %v5034_v22 = vpop.eup %3895  ;;  %v710_v8 = vpop.permute.xlu1 %709 }
 0x15c   : > { %v1307_v44 = vpop.f32.mrf.mxu0  ;;  %v5038_v24 = vpop.eup %3897  ;;  %v1274_v47 = vadd.f32 %v4955_v9, %v4880_v46 }
 0x15d   : > { %v1581_v29 = vmul.f32 0.5, %v1306_v41  ;;  %v1308_v31 = vadd.f32 %v1307_v44, %v4864_v39  ;;  %v1266_v41 = vadd.f32 %v4936_v55, %v4889_v50  ;;  %v1268_v50 = vadd.f32 %v4942_v60, %v4893_v51 }
 0x15e   : > { %v1309_v56 = vpop.f32.mrf.mxu0  ;;  %v1258_v51 = vadd.f32 %v4921_v28, %v4900_v49 }
 0x15f   : > { %v1310_v37 = vadd.f32 %v1309_v56, %v4864_v39  ;;  %3913 = vtanh.f32 %v1581_v29  ;;  %v1582_v61 = vmul.f32 0.5, %v1308_v31  ;;  %v1570_v29 = vmul.f32 0.5, %v1278_v25 }
 0x160   : > { %v1313_v1 = vpop.f32.mrf.mxu0  ;;  %3915 = vtanh.f32 %v1580_v14  ;;  %v5042_v14 = vpop.eup %3899 }
 0x161   : > { %v1583_v2 = vmul.f32 0.5, %v1310_v37  ;;  %v1314_v5 = vadd.f32 %v1313_v1, %v705_v42  ;;  %3917 = vtanh.f32 %v1582_v61  ;;  %v5044_v63 = vpop.eup %3901  ;;  %v1568_v61 = vmul.f32 0.5, %v1274_v47 }
 0x162   : > { %v1315_v26 = vpop.f32.mrf.mxu0 }
 0x163   : > { %3919 = vtanh.f32 %v1583_v2  ;;  %v1584_v39 = vmul.f32 0.5, %v1314_v5  ;;  %v1316_v3 = vadd.f32 %v1315_v26, %v705_v42  ;;  %v5048_v42 = vpop.eup %3903  ;;  %v1254_v5 = vadd.f32 %v4917_v23, %v4895_v52 }
 0x164   : > { %3921 = vtanh.f32 %v1575_v32  ;;  %v1317_v44 = vpop.f32.mrf.mxu0  ;;  %v1565_v32 = vmul.f32 0.5, %v1266_v41  ;;  %v3906_v9 = vpop.eup %3905  ;;  %v1566_v26 = vmul.f32 0.5, %v1268_v50  ;;  %v1562_v23 = vmul.f32 0.5, %v1258_v51 }
 0x165   : > { %3923 = vtanh.f32 %v1576_v38  ;;  %v1318_v16 = vadd.f32 %v1317_v44, %v710_v8  ;;  %v1585_v31 = vmul.f32 0.5, %v1316_v3  ;;  %v3908_v2 = vpop.eup %3907 }
 0x166   : > { %3925 = vtanh.f32 %v1584_v39  ;;  %v1319_v56 = vpop.f32.mrf.mxu0  ;;  %v3910_v25 = vpop.eup %3909  ;;  %v1833_v51 = vmul.f32 0.5, %v3908_v2  ;;  %v1829_v2 = vmul.f32 0.5, %v3906_v9 }
 0x167   : > { %3927 = vtanh.f32 %v1574_v35  ;;  %v1586_v55 = vmul.f32 0.5, %v1318_v16  ;;  %v1320_v37 = vadd.f32 %v1319_v56, %v710_v8  ;;  %v1560_v16 = vmul.f32 0.5, %v1254_v5 }
 0x168   : > { %3929 = vtanh.f32 %v1585_v31  ;;  %v1323_v46 = vpop.f32.mrf.mxu0  ;;  %v3912_v8 = vpop.eup %3911 }
 0x169   : > { %3931 = vtanh.f32 %v1586_v55  ;;  %v1587_v1 = vmul.f32 0.5, %v1320_v37  ;;  %v1324_v38 = vadd.f32 %v1323_v46, %v5018_v11 }
 0x16a   : > { %3933 = vtanh.f32 %v1570_v29  ;;  %v1325_v60 = vpop.f32.mrf.mxu0 }
 0x16b   : > { %3935 = vtanh.f32 %v1587_v1  ;;  %v1588_v35 = vmul.f32 0.5, %v1324_v38  ;;  %v1326_v39 = vadd.f32 %v1325_v60, %v5018_v11  ;;  %v1835_v11 = vmul.f32 0.5, %v3912_v8 }
 0x16c   : > { %3937 = vtanh.f32 %v1565_v32  ;;  %v1327_v41 = vpop.f32.mrf.mxu0  ;;  %v3914_v3 = vpop.eup %3913 }
 0x16d   : > { %3939 = vtanh.f32 %v1568_v61  ;;  %v1589_v44 = vmul.f32 0.5, %v1326_v39  ;;  %v1328_v47 = vadd.f32 %v1327_v41, %v5023_v36  ;;  %v3916_v52 = vpop.eup %3915  ;;  %v1837_v55 = vmul.f32 0.5, %v3914_v3 }
 0x16e   : > { %3941 = vtanh.f32 %v1588_v35  ;;  %v1329_v49 = vpop.f32.mrf.mxu0  ;;  %v3918_v28 = vpop.eup %3917  ;;  %v1836_v1 = vmul.f32 0.5, %v3916_v52  ;;  %v1963_v8 = vadd.f32 0.5, %v1835_v11 }
 0x16f   : > { %3943 = vtanh.f32 %v1566_v26  ;;  %v1590_v29 = vmul.f32 0.5, %v1328_v47  ;;  %v1330_v31 = vadd.f32 %v1329_v49, %v5023_v36  ;;  %v1838_v37 = vmul.f32 0.5, %v3918_v28 }
 0x170   : > { %v3920_v56 = vpop.eup %3919  ;;  %3945 = vtanh.f32 %v1589_v44  ;;  %v5058_v50 = vpop.f32.mrf.mxu0  ;;  %v1834_v26 = vmul.f32 0.5, %v3910_v25  ;;  %v1965_v3 = vadd.f32 0.5, %v1837_v55  ;;  %v1964_v52 = vadd.f32 0.5, %v1836_v1 }
 0x171   : > { %v3922_v32 = vpop.eup %3921  ;;  %3947 = vtanh.f32 %v1590_v29  ;;  %v1591_v46 = vmul.f32 0.5, %v1330_v31  ;;  %v1839_v61 = vmul.f32 0.5, %v3920_v56  ;;  %v1966_v36 = vadd.f32 0.5, %v1838_v37 }
 0x172   : > { %v3924_v38 = vpop.eup %3923  ;;  %3949 = vtanh.f32 %v1562_v23  ;;  %v5060_v5 = vpop.f32.mrf.mxu0  ;;  %v1831_v39 = vmul.f32 0.5, %v3922_v32  ;;  %v1961_v29 = vadd.f32 0.5, %v1833_v51  ;;  %v1962_v11 = vadd.f32 0.5, %v1834_v26 }
 0x173   : > { %v3926_v60 = vpop.eup %3925  ;;  %3951 = vtanh.f32 %v1591_v46  ;;  %v1967_v44 = vadd.f32 0.5, %v1839_v61  ;;  %v1832_v49 = vmul.f32 0.5, %v3924_v38  ;;  %v5064_v23 = vpop.permute.xlu0 %854  ;;  %v2078_v62 = vpack.c.bf16 %v1966_v36, %v1964_v52 }
 0x174   : > { %v3928_v35 = vpop.eup %3927  ;;  %v5062_v41 = vpop.f32.mrf.mxu0  ;;  %3953 = vtanh.f32 %v1560_v16  ;;  %6204 = vst [vmem:[#allocation5_spill] sm:$0xff] %v5064_v23  ;;  %v1840_v31 = vmul.f32 0.5, %v3926_v60  ;;  %v1827_v61 = vmul.f32 0.5, %v5044_v63  ;;  %v1959_v16 = vadd.f32 0.5, %v1831_v39 }
 0x175   : > { %v3930_v47 = vpop.eup %3929  ;;  %v2079_v56 = vpack.c.bf16 %v1967_v44, %v1965_v3  ;;  %v1830_v32 = vmul.f32 0.5, %v3928_v35  ;;  %v2077_v4 = vpack.c.bf16 %v1963_v8, %v1961_v29  ;;  %v1828_v51 = vmul.f32 0.5, %v5048_v42 }
 0x176   : > { %v3932_v28 = vpop.eup %3931  ;;  %v5066_v25 = vpop.f32.mrf.mxu0  ;;  %v1841_v38 = vmul.f32 0.5, %v3930_v47  ;;  %v1960_v60 = vadd.f32 0.5, %v1832_v49  ;;  %v1823_v36 = vmul.f32 0.5, %v5038_v24  ;;  %v1825_v35 = vmul.f32 0.5, %v5042_v14 }
 0x177   : > { %v3934_v37 = vpop.eup %3933  ;;  %v1842_v46 = vmul.f32 0.5, %v3932_v28  ;;  %2704 = vmatprep.subr.bf16.mxu1 %v2079_v56  ;;  %v1957_v63 = vadd.f32 0.5, %v1829_v2  ;;  %v5076_v39 = vadd.f32 0.5, %v1840_v31  ;;  %v5080_v47 = vpop.permute.xlu1 %859  ;;  %v1958_v49 = vadd.f32 0.5, %v1830_v32 }
 0x178   : > { %v3936_v55 = vpop.eup %3935  ;;  %v5069_v1 = vpop.f32.mrf.mxu0  ;;  %2705 = vmatpush1.bf16.msra.mxu1 %v2078_v62  ;;  %6205 = vst [vmem:[#allocation6_spill] sm:$0xff] %v5080_v47  ;;  %v1826_v42 = vmul.f32 0.5, %v3934_v37  ;;  %v2076_v28 = vpack.c.bf16 %v1962_v11, %v1960_v60  ;;  %v5086_v24 = vadd.f32 0.5, %v1841_v38  ;;  %v1955_v31 = vadd.f32 0.5, %v1827_v61 }
 0x179   : > { %v3938_v9 = vpop.eup %3937  ;;  %v5072_v20 = vadd.f32 0.5, %v1842_v46  ;;  %v1843_v3 = vmul.f32 0.5, %v3936_v55  ;;  %2706 = vmatprep.subr.bf16.mxu1 %v2077_v4  ;;  %v5084_v29 = vpop.permute.xlu0 %844  ;;  %v2075_v2 = vpack.c.bf16 %v1959_v16, %v1957_v63  ;;  %v1956_v55 = vadd.f32 0.5, %v1828_v51 }
 0x17a   : > { %v3940_v26 = vpop.eup %3939  ;;  %v5078_v44 = vpop.f32.mrf.mxu0  ;;  %v1821_v32 = vmul.f32 0.5, %v3938_v9  ;;  %v1954_v16 = vadd.f32 0.5, %v1826_v42  ;;  %v1819_v4 = vmul.f32 0.5, %v5032_v45  ;;  %v1951_v9 = vadd.f32 0.5, %v1823_v36 }
 0x17b   : > { %v3942_v8 = vpop.eup %3941  ;;  %v5082_v52 = vadd.f32 0.5, %v1843_v3  ;;  %v1824_v46 = vmul.f32 0.5, %v3940_v26  ;;  %v1953_v3 = vadd.f32 0.5, %v1825_v35  ;;  %v2074_v63 = vpack.c.bf16 %v1958_v49, %v1956_v55  ;;  %v5097_v35 = vpop.permute.xlu1 %849 }
 0x17c   : > { %v3944_v62 = vpop.eup %3943  ;;  %v5088_v14 = vpop.f32.mrf.mxu0  ;;  %2707 = vmatpush1.bf16.msra.mxu1 %v2076_v28  ;;  %v1844_v11 = vmul.f32 0.5, %v3942_v8  ;;  %6206 = vst [vmem:[#allocation7_spill] sm:$0xff] %v5097_v35  ;;  %v1820_v8 = vmul.f32 0.5, %v5034_v22  ;;  %v1817_v49 = vmul.f32 0.5, %v5028_v17  ;;  %v1949_v45 = vadd.f32 0.5, %v1821_v32 }
 0x17d   : > { %v3946_v56 = vpop.eup %3945  ;;  %2708 = vmatprep.subr.bf16.mxu1 %v2075_v2  ;;  %v1822_v19 = vmul.f32 0.5, %v3944_v62  ;;  %v2073_v28 = vpack.c.bf16 %v1955_v31, %v1953_v3  ;;  %v1952_v2 = vadd.f32 0.5, %v1824_v46  ;;  %v5102_v62 = vpop.permute.xlu0 %834 }
 0x17e   : > { %v3948_v37 = vpop.eup %3947  ;;  %v1349_v60 = vpop.f32.mrf.mxu0  ;;  %v1845_v26 = vmul.f32 0.5, %v3946_v56  ;;  %v5105_v56 = vadd.f32 0.5, %v1844_v11  ;;  %v1948_v17 = vadd.f32 0.5, %v1820_v8  ;;  %v1945_v32 = vadd.f32 0.5, %v1817_v49 }
 0x17f   : > { %v3950_v27 = vpop.eup %3949  ;;  %v1846_v61 = vmul.f32 0.5, %v3948_v37  ;;  %v1950_v55 = vadd.f32 0.5, %v1822_v19  ;;  %v2072_v22 = vpack.c.bf16 %v1954_v16, %v1952_v2 }
 0x180   : > { %v3952_v47 = vpop.eup %3951  ;;  %v5095_v51 = vpop.f32.mrf.mxu0  ;;  %2709 = vmatpush1.bf16.msra.mxu1 %v2074_v63  ;;  %v1818_v36 = vmul.f32 0.5, %v3950_v27  ;;  %v5109_v46 = vadd.f32 0.5, %v1845_v26 }
 0x181   : > { %v5100_v23 = vadd.f32 0.5, %v1846_v61  ;;  %v1847_v38 = vmul.f32 0.5, %v3952_v47  ;;  %v3954_v42 = vpop.eup %3953  ;;  %2710 = vmatprep.subr.bf16.mxu1 %v2073_v28  ;;  %v2071_v47 = vpack.c.bf16 %v1951_v9, %v1949_v45  ;;  %v1947_v61 = vadd.f32 0.5, %v1819_v4  ;;  %v5117_v27 = vpop.permute.xlu1 %839 }
 0x182   : > { %v1355_v31 = vpop.f32.mrf.mxu0  ;;  %v1816_v35 = vmul.f32 0.5, %v3954_v42  ;;  %v2070_v16 = vpack.c.bf16 %v1950_v55, %v1948_v17  ;;  %v5119_v26 = vpop.permute.xlu0 %824  ;;  %v1336_v45 = vadd.f32 %v5060_v5, %v5002_v40  ;;  %v6207_v55 = vpack.c.bf16 %v4972_v18, %v4965_v15 }
 0x183   : > { %v5107_v37 = vadd.f32 0.5, %v1847_v38  ;;  %v1946_v38 = vadd.f32 0.5, %v1818_v36  ;;  %v2069_v28 = vpack.c.bf16 %v1947_v61, %v1945_v32  ;;  %v1340_v36 = vadd.f32 %v5066_v25, %v5014_v0 }
 0x184   : > { %v1357_v3 = vpop.f32.mrf.mxu0  ;;  %2711 = vmatpush1.bf16.msra.mxu1 %v2072_v22  ;;  %v1944_v9 = vadd.f32 0.5, %v1816_v35  ;;  %v1350_v61 = vadd.f32 %v1349_v60, %v4998_v7  ;;  %v1593_v32 = vmul.f32 0.5, %v1336_v45  ;;  %v1356_v5 = vadd.f32 %v1355_v31, %v4980_v30 }
 0x185   : > { %2712 = vmatprep.subr.bf16.mxu1 %v2071_v47  ;;  %v2083_v19 = vpack.c.bf16 %v5107_v37, %v5109_v46  ;;  %v5123_v49 = vpop.permute.xlu1 %829  ;;  %v1346_v47 = vadd.f32 %v5078_v44, %v4990_v48  ;;  %v1358_v25 = vadd.f32 %v1357_v3, %v4984_v34  ;;  %v6209_v15 = vpack.c.bf16 %v4947_v58, %v4940_v59 }
 0x186   : > { %v5113_v11 = vpop.f32.mrf.mxu0  ;;  %v2068_v2 = vpack.c.bf16 %v1946_v38, %v1944_v9  ;;  %v5127_v22 = vpop.permute.xlu0 %814  ;;  %v6208_v38 = vpack.c.bf16 %v4958_v10, %v4963_v13  ;;  %v1599_v31 = vmul.f32 0.5, %v1350_v61  ;;  %3955 = vtanh.f32 %v1593_v32 }
 0x187   : > { %v1597_v44 = vmul.f32 0.5, %v1346_v47  ;;  %v1601_v13 = vmul.f32 0.5, %v1356_v5  ;;  %v6210_v59 = vpack.c.bf16 %v4929_v43, %v4934_v54  ;;  %v1602_v58 = vmul.f32 0.5, %v1358_v25 }
 0x188   : > { %v5121_v4 = vpop.f32.mrf.mxu0  ;;  %2713 = vmatpush1.bf16.msra.mxu1 %v2070_v16  ;;  %v1595_v16 = vmul.f32 0.5, %v1340_v36 }
 0x189   : > { %2714 = vmatprep.subr.bf16.mxu1 %v2069_v28  ;;  %v5145_v28 = vpop.permute.xlu1 %819 }
 0x18a   : > { %v1365_v8 = vpop.f32.mrf.mxu0  ;;  %v5148_v9 = vpop.permute.xlu0 %804  ;;  %3957 = vtanh.f32 %v1595_v16 }
 0x18b   : > { %v1366_v60 = vadd.f32 %v1365_v8, %v4961_v12  ;;  %3959 = vtanh.f32 %v1597_v44 }
 0x18c   : > { %v1367_v42 = vpop.f32.mrf.mxu0  ;;  %2715 = vmatpush1.bf16.msra.mxu1 %v2068_v2  ;;  %3961 = vtanh.f32 %v1599_v31 }
 0x18d   : > { %2716 = vmatprep.subr.bf16.mxu1 %v6207_v55  ;;  %v1368_v2 = vadd.f32 %v1367_v42, %v4976_v21  ;;  %v1605_v36 = vmul.f32 0.5, %v1366_v60  ;;  %v5156_v42 = vpop.permute.xlu1 %809  ;;  %3963 = vtanh.f32 %v1601_v13 }
 0x18e   : > { %v1369_v35 = vpop.f32.mrf.mxu0  ;;  %v5159_v5 = vpop.permute.xlu0 %794  ;;  %3965 = vtanh.f32 %v1602_v58 }
 0x18f   : > { %v1606_v55 = vmul.f32 0.5, %v1368_v2  ;;  %3967 = vtanh.f32 %v1605_v36  ;;  %v1370_v25 = vadd.f32 %v1369_v35, %v4976_v21 }
 0x190   : > { %v1373_v17 = vpop.f32.mrf.mxu0  ;;  %2717 = vmatpush1.bf16.msra.mxu1 %v6208_v38 }
 0x191   : > { %2718 = vmatprep.subr.bf16.mxu1 %v6209_v15  ;;  %3969 = vtanh.f32 %v1606_v55  ;;  %v1374_v44 = vadd.f32 %v1373_v17, %v4938_v57  ;;  %v1607_v21 = vmul.f32 0.5, %v1370_v25 }
 0x192   : > { %v1375_v18 = vpop.f32.mrf.mxu0 }
 0x193   : > { %v1376_v3 = vadd.f32 %v1375_v18, %v4938_v57  ;;  %v1364_v57 = vadd.f32 %v5121_v4, %v4961_v12  ;;  %v1608_v17 = vmul.f32 0.5, %v1374_v44  ;;  %v5173_v36 = vpop.eup %3955  ;;  %v1354_v12 = vadd.f32 %v5095_v51, %v4980_v30 }
 0x194   : > { %v1377_v10 = vpop.f32.mrf.mxu0  ;;  %2719 = vmatpush1.bf16.msra.mxu1 %v6210_v59  ;;  %v785_v59 = vpop.permute.xlu0 %784  ;;  %v1344_v30 = vadd.f32 %v5069_v1, %v4990_v48 }
 0x195   : > { %v1609_v61 = vmul.f32 0.5, %v1376_v3  ;;  %v1378_v43 = vadd.f32 %v1377_v10, %v4953_v6 }
 0x196   : > { %v1379_v45 = vpop.f32.mrf.mxu0 }
 0x197   : > { %v1380_v8 = vadd.f32 %v1379_v45, %v4953_v6  ;;  %3971 = vtanh.f32 %v1609_v61  ;;  %v1610_v31 = vmul.f32 0.5, %v1378_v43  ;;  %v5166_v6 = vpop.permute.xlu1 %799  ;;  %v5175_v55 = vpop.eup %3957  ;;  %v1604_v43 = vmul.f32 0.5, %v1364_v57 }
 0x198   : > { %v1383_v47 = vpop.f32.mrf.mxu0 }
 0x199   : > { %v1384_v32 = vadd.f32 %v1383_v47, %v4926_v33  ;;  %v1611_v54 = vmul.f32 0.5, %v1380_v8 }
 0x19a   : > { %v1385_v38 = vpop.f32.mrf.mxu0 }
 0x19b   : > { %v1612_v16 = vmul.f32 0.5, %v1384_v32  ;;  %v1386_v15 = vadd.f32 %v1385_v38, %v4926_v33  ;;  %3973 = vtanh.f32 %v1611_v54  ;;  %v1360_v33 = vadd.f32 %v5113_v11, %v4984_v34  ;;  %v5177_v34 = vpop.eup %3959  ;;  %v790_v32 = vpop.permute.xlu1 %789 }
 0x19c   : > { %v1387_v18 = vpop.f32.mrf.mxu0  ;;  %v5181_v61 = vpop.eup %3961 }
 0x19d   : > { %v1388_v60 = vadd.f32 %v1387_v18, %v4932_v53  ;;  %v1613_v2 = vmul.f32 0.5, %v1386_v15  ;;  %3975 = vtanh.f32 %v1612_v16  ;;  %v1603_v11 = vmul.f32 0.5, %v1360_v33  ;;  %v5183_v38 = vpop.eup %3963 }
 0x19e   : > { %v1389_v13 = vpop.f32.mrf.mxu0  ;;  %v1348_v16 = vadd.f32 %v5088_v14, %v4998_v7  ;;  %v5187_v18 = vpop.eup %3965  ;;  %v1596_v33 = vmul.f32 0.5, %v1344_v30 }
 0x19f   : > { %v1614_v10 = vmul.f32 0.5, %v1388_v60  ;;  %v1390_v3 = vadd.f32 %v1389_v13, %v4932_v53  ;;  %3977 = vtanh.f32 %v1613_v2  ;;  %v5191_v44 = vpop.eup %3967  ;;  %v1600_v60 = vmul.f32 0.5, %v1354_v12 }
 0x1a0   : > { %v1393_v35 = vpop.f32.mrf.mxu0  ;;  %v5193_v13 = vpop.eup %3969 }
 0x1a1   : > { %3979 = vtanh.f32 %v1614_v10  ;;  %v1615_v58 = vmul.f32 0.5, %v1390_v3  ;;  %v1394_v45 = vadd.f32 %v1393_v35, %v785_v59  ;;  %v1338_v3 = vadd.f32 %v5062_v41, %v5014_v0 }
 0x1a2   : > { %3981 = vtanh.f32 %v1610_v31  ;;  %v1395_v8 = vpop.f32.mrf.mxu0  ;;  %v1334_v35 = vadd.f32 %v5058_v50, %v5002_v40 }
 0x1a3   : > { %3983 = vtanh.f32 %v1615_v58  ;;  %v1616_v53 = vmul.f32 0.5, %v1394_v45  ;;  %v1396_v47 = vadd.f32 %v1395_v8, %v785_v59  ;;  %v1598_v59 = vmul.f32 0.5, %v1348_v16 }
 0x1a4   : > { %3985 = vtanh.f32 %v1607_v21  ;;  %v1397_v4 = vpop.f32.mrf.mxu0  ;;  %v3972_v10 = vpop.eup %3971  ;;  %v1594_v41 = vmul.f32 0.5, %v1338_v3  ;;  %v1592_v50 = vmul.f32 0.5, %v1334_v35 }
 0x1a5   : > { %3987 = vtanh.f32 %v1608_v17  ;;  %v1617_v54 = vmul.f32 0.5, %v1396_v47  ;;  %v1398_v25 = vadd.f32 %v1397_v4, %v790_v32 }
 0x1a6   : > { %3989 = vtanh.f32 %v1616_v53  ;;  %v1399_v15 = vpop.f32.mrf.mxu0 }
 0x1a7   : > { %3991 = vtanh.f32 %v1617_v54  ;;  %v1400_v51 = vadd.f32 %v1399_v15, %v790_v32  ;;  %v1618_v31 = vmul.f32 0.5, %v1398_v25 }
 0x1a8   : > { %3993 = vtanh.f32 %v1603_v11  ;;  %v1403_v2 = vpop.f32.mrf.mxu0  ;;  %v3974_v1 = vpop.eup %3973 }
 0x1a9   : > { %3995 = vtanh.f32 %v1604_v43  ;;  %v1619_v7 = vmul.f32 0.5, %v1400_v51  ;;  %v1404_v14 = vadd.f32 %v1403_v2, %v5159_v5  ;;  %v1867_v43 = vmul.f32 0.5, %v3974_v1 }
 0x1aa   : > { %3997 = vtanh.f32 %v1618_v31  ;;  %v1405_v48 = vpop.f32.mrf.mxu0  ;;  %v3976_v21 = vpop.eup %3975 }
 0x1ab   : > { %3999 = vtanh.f32 %v1619_v7  ;;  %v1620_v57 = vmul.f32 0.5, %v1404_v14  ;;  %v1406_v17 = vadd.f32 %v1405_v48, %v5159_v5  ;;  %v1868_v25 = vmul.f32 0.5, %v3976_v21 }
 0x1ac   : > { %4001 = vtanh.f32 %v1600_v60  ;;  %v1407_v58 = vpop.f32.mrf.mxu0  ;;  %v3978_v45 = vpop.eup %3977  ;;  %v1865_v60 = vmul.f32 0.5, %v3972_v10  ;;  %v1995_v48 = vadd.f32 0.5, %v1867_v43  ;;  %v1861_v10 = vmul.f32 0.5, %v5191_v44 }
 0x1ad   : > { %4003 = vtanh.f32 %v1620_v57  ;;  %v1408_v8 = vadd.f32 %v1407_v58, %v5166_v6  ;;  %v1621_v53 = vmul.f32 0.5, %v1406_v17  ;;  %v1869_v5 = vmul.f32 0.5, %v3978_v45  ;;  %v5209_v58 = vpop.permute.xlu0 %934 }
 0x1ae   : > { %v3980_v0 = vpop.eup %3979  ;;  %4005 = vtanh.f32 %v1598_v59  ;;  %v1409_v47 = vpop.f32.mrf.mxu0  ;;  %v1996_v35 = vadd.f32 0.5, %v1868_v25  ;;  %v1993_v45 = vadd.f32 0.5, %v1865_v60  ;;  %v1857_v25 = vmul.f32 0.5, %v5183_v38 }
 0x1af   : > { %v3982_v12 = vpop.eup %3981  ;;  %4007 = vtanh.f32 %v1596_v33  ;;  %v1870_v11 = vmul.f32 0.5, %v3980_v0  ;;  %v1622_v4 = vmul.f32 0.5, %v1408_v8  ;;  %v1410_v32 = vadd.f32 %v1409_v47, %v5166_v6 }
 0x1b0   : > { %v3984_v40 = vpop.eup %3983  ;;  %4009 = vtanh.f32 %v1621_v53  ;;  %v5203_v54 = vpop.f32.mrf.mxu0  ;;  %v1866_v7 = vmul.f32 0.5, %v3982_v12  ;;  %v1997_v1 = vadd.f32 0.5, %v1869_v5  ;;  %v1862_v47 = vmul.f32 0.5, %v5193_v13 }
 0x1b1   : > { %v3986_v16 = vpop.eup %3985  ;;  %v1871_v15 = vmul.f32 0.5, %v3984_v40  ;;  %4011 = vtanh.f32 %v1622_v4  ;;  %v1623_v30 = vmul.f32 0.5, %v1410_v32  ;;  %v1998_v6 = vadd.f32 0.5, %v1870_v11  ;;  %v5218_v13 = vpop.permute.xlu1 %939 }
 0x1b2   : > { %v3988_v51 = vpop.eup %3987  ;;  %4013 = vtanh.f32 %v1594_v41  ;;  %v5205_v31 = vpop.f32.mrf.mxu0  ;;  %v1863_v59 = vmul.f32 0.5, %v3986_v16  ;;  %v1994_v12 = vadd.f32 0.5, %v1866_v7  ;;  %v2093_v16 = vpack.c.bf16 %v1995_v48, %v1993_v45 }
 0x1b3   : > { %v3990_v2 = vpop.eup %3989  ;;  %v1999_v14 = vadd.f32 0.5, %v1871_v15  ;;  %4015 = vtanh.f32 %v1623_v30  ;;  %v1864_v21 = vmul.f32 0.5, %v3988_v51  ;;  %v2094_v4 = vpack.c.bf16 %v1998_v6, %v1996_v35  ;;  %v5231_v35 = vpop.permute.xlu0 %924 }
 0x1b4   : > { %v3992_v3 = vpop.eup %3991  ;;  %v5207_v33 = vpop.f32.mrf.mxu0  ;;  %4017 = vtanh.f32 %v1592_v50  ;;  %v1872_v8 = vmul.f32 0.5, %v3990_v2  ;;  %v1991_v50 = vadd.f32 0.5, %v1863_v59  ;;  %v1858_v2 = vmul.f32 0.5, %v5187_v18 }
 0x1b5   : > { %v3994_v57 = vpop.eup %3993  ;;  %v2095_v41 = vpack.c.bf16 %v1999_v14, %v1997_v1  ;;  %v1873_v11 = vmul.f32 0.5, %v3992_v3  ;;  %v1992_v30 = vadd.f32 0.5, %v1864_v21  ;;  %v1989_v7 = vadd.f32 0.5, %v1861_v10 }
 0x1b6   : > { %v3996_v17 = vpop.eup %3995  ;;  %v5212_v0 = vpop.f32.mrf.mxu0  ;;  %v1859_v40 = vmul.f32 0.5, %v3994_v57  ;;  %v5221_v6 = vadd.f32 0.5, %v1872_v8  ;;  %v1990_v48 = vadd.f32 0.5, %v1862_v47  ;;  %v1855_v18 = vmul.f32 0.5, %v5181_v61 }
 0x1b7   : > { %v3998_v53 = vpop.eup %3997  ;;  %2720 = vmatprep.subr.bf16.mxu1 %v2095_v41  ;;  %v1860_v15 = vmul.f32 0.5, %v3996_v17  ;;  %v5227_v38 = vadd.f32 0.5, %v1873_v11  ;;  %v2092_v57 = vpack.c.bf16 %v1994_v12, %v1992_v30  ;;  %v2091_v45 = vpack.c.bf16 %v1991_v50, %v1989_v7 }
 0x1b8   : > { %v4000_v32 = vpop.eup %3999  ;;  %v1874_v43 = vmul.f32 0.5, %v3998_v53  ;;  %v5215_v5 = vpop.f32.mrf.mxu0  ;;  %2721 = vmatpush2.bf16.msra.mxu1 %v2094_v4  ;;  %v1987_v17 = vadd.f32 0.5, %v1859_v40  ;;  %v1985_v61 = vadd.f32 0.5, %v1857_v25  ;;  %v1983_v8 = vadd.f32 0.5, %v1855_v18 }
 0x1b9   : > { %v4002_v44 = vpop.eup %4001  ;;  %v1875_v51 = vmul.f32 0.5, %v4000_v32  ;;  %2722 = vmatprep.subr.bf16.mxu1 %v2093_v16  ;;  %v1988_v47 = vadd.f32 0.5, %v1860_v15  ;;  %v1853_v32 = vmul.f32 0.5, %v5177_v34  ;;  %v1986_v16 = vadd.f32 0.5, %v1858_v2  ;;  %v5243_v15 = vpop.permute.xlu1 %929 }
 0x1ba   : > { %v4004_v60 = vpop.eup %4003  ;;  %v5223_v14 = vadd.f32 0.5, %v1874_v43  ;;  %v5225_v3 = vpop.f32.mrf.mxu0  ;;  %v1856_v53 = vmul.f32 0.5, %v4002_v44  ;;  %v2089_v34 = vpack.c.bf16 %v1987_v17, %v1985_v61 }
 0x1bb   : > { %v4006_v59 = vpop.eup %4005  ;;  %v5229_v1 = vadd.f32 0.5, %v1875_v51  ;;  %v1876_v11 = vmul.f32 0.5, %v4004_v60  ;;  %v2090_v7 = vpack.c.bf16 %v1990_v48, %v1988_v47  ;;  %v1851_v60 = vmul.f32 0.5, %v5175_v55 }
 0x1bc   : > { %v4008_v21 = vpop.eup %4007  ;;  %v5234_v10 = vpop.f32.mrf.mxu0  ;;  %2723 = vmatpush2.bf16.msra.mxu1 %v2092_v57  ;;  %v1854_v43 = vmul.f32 0.5, %v4006_v59  ;;  %v1984_v59 = vadd.f32 0.5, %v1856_v53  ;;  %v1849_v48 = vmul.f32 0.5, %v5173_v36 }
 0x1bd   : > { %v4010_v41 = vpop.eup %4009  ;;  %2724 = vmatprep.subr.bf16.mxu1 %v2091_v45  ;;  %v1852_v57 = vmul.f32 0.5, %v4008_v21  ;;  %v5248_v25 = vadd.f32 0.5, %v1876_v11  ;;  %v1979_v61 = vadd.f32 0.5, %v1851_v60 }
 0x1be   : > { %v4012_v4 = vpop.eup %4011  ;;  %v5241_v40 = vpop.f32.mrf.mxu0  ;;  %v1877_v30 = vmul.f32 0.5, %v4010_v41  ;;  %v1982_v55 = vadd.f32 0.5, %v1854_v43  ;;  %v2088_v53 = vpack.c.bf16 %v1986_v16, %v1984_v59 }
 0x1bf   : > { %v4014_v50 = vpop.eup %4013  ;;  %v1878_v51 = vmul.f32 0.5, %v4012_v4  ;;  %v5252_v41 = vpop.permute.xlu0 %914  ;;  %v1981_v4 = vadd.f32 0.5, %v1853_v32  ;;  %v1980_v36 = vadd.f32 0.5, %v1852_v57 }
 0x1c0   : > { %v4016_v44 = vpop.eup %4015  ;;  %v5246_v12 = vpop.f32.mrf.mxu0  ;;  %2725 = vmatpush2.bf16.msra.mxu1 %v2090_v7  ;;  %v1850_v47 = vmul.f32 0.5, %v4014_v50  ;;  %v5257_v18 = vadd.f32 0.5, %v1877_v30  ;;  %v1977_v50 = vadd.f32 0.5, %v1849_v48  ;;  %v1418_v48 = vadd.f32 %v5207_v33, %v5156_v42 }
 0x1c1   : > { %v5250_v45 = vadd.f32 0.5, %v1878_v51  ;;  %v1879_v63 = vmul.f32 0.5, %v4016_v44  ;;  %v4018_v2 = vpop.eup %4017  ;;  %2726 = vmatprep.subr.bf16.mxu1 %v2089_v34  ;;  %v2087_v7 = vpack.c.bf16 %v1983_v8, %v1981_v4  ;;  %v5267_v43 = vpop.permute.xlu1 %919  ;;  %v2086_v16 = vpack.c.bf16 %v1982_v55, %v1980_v36 }
 0x1c2   : > { %v5255_v21 = vpop.f32.mrf.mxu0  ;;  %v1848_v44 = vmul.f32 0.5, %v4018_v2  ;;  %v1978_v30 = vadd.f32 0.5, %v1850_v47  ;;  %v2085_v60 = vpack.c.bf16 %v1979_v61, %v1977_v50  ;;  %v1416_v4 = vadd.f32 %v5205_v31, %v5148_v9 }
 0x1c3   : > { %v5259_v17 = vadd.f32 0.5, %v1879_v63  ;;  %v5269_v34 = vpop.permute.xlu0 %904  ;;  %v1420_v55 = vadd.f32 %v5212_v0, %v5156_v42  ;;  %v1426_v61 = vadd.f32 %v5225_v3, %v5127_v22  ;;  %v1626_v33 = vmul.f32 0.5, %v1418_v48 }
 0x1c4   : > { %v5263_v51 = vpop.f32.mrf.mxu0  ;;  %2727 = vmatpush2.bf16.msra.mxu1 %v2088_v53  ;;  %v1976_v11 = vadd.f32 0.5, %v1848_v44  ;;  %v1625_v31 = vmul.f32 0.5, %v1416_v4  ;;  %v1430_v36 = vadd.f32 %v5241_v40, %v5145_v28  ;;  %v6211_v42 = vpack.c.bf16 %v5100_v23, %v5105_v56  ;;  %v3745_v40 = vld [vmem:[%s6188_s3] ss:$16 sps:$4 sm:$0xff]  }
 0x1c5   : > { %2728 = vmatprep.subr.bf16.mxu1 %v2087_v7  ;;  %v5271_v2 = vpop.permute.xlu1 %909  ;;  %v1428_v7 = vadd.f32 %v5234_v10, %v5145_v28  ;;  %v1627_v37 = vmul.f32 0.5, %v1420_v55  ;;  %v1629_v10 = vmul.f32 0.5, %v1426_v61  ;;  %v6215_v61 = vld [vmem:[#allocation5_spill] sm:$0xff] }
 0x1c6   : > { %v1439_v63 = vpop.f32.mrf.mxu0  ;;  %v2084_v57 = vpack.c.bf16 %v1978_v30, %v1976_v11  ;;  %4019 = vtanh.f32 %v1625_v31 }
 0x1c7   : > { %v5279_v47 = vpop.permute.xlu0 %894  ;;  %v1440_v46 = vadd.f32 %v1439_v63, %v5123_v49  ;;  %v1630_v28 = vmul.f32 0.5, %v1428_v7  ;;  %4021 = vtanh.f32 %v1626_v33  ;;  %v1631_v63 = vmul.f32 0.5, %v1430_v36 }
 0x1c8   : > { %v1443_v59 = vpop.f32.mrf.mxu0  ;;  %2729 = vmatpush2.bf16.msra.mxu1 %v2086_v16  ;;  %v3748_v16 = vld [vmem:[%s6188_s3 + $0x24] ss:$16 sps:$4 sm:$0xff]   ;;  %4023 = vtanh.f32 %v1627_v37 }
 0x1c9   : > { %2730 = vmatprep.subr.bf16.mxu1 %v2085_v60  ;;  %v5295_v0 = vpop.permute.xlu1 %899  ;;  %v1444_v50 = vadd.f32 %v1443_v59, %v5102_v62  ;;  %v1635_v59 = vmul.f32 0.5, %v1440_v46  ;;  %4025 = vtanh.f32 %v1629_v10 }
 0x1ca   : > { %v1445_v8 = vpop.f32.mrf.mxu0  ;;  %4027 = vtanh.f32 %v1630_v28 }
 0x1cb   : > { %v5302_v30 = vpop.permute.xlu0 %884  ;;  %v1446_v23 = vadd.f32 %v1445_v8, %v5102_v62  ;;  %v6214_v62 = vld [vmem:[#allocation7_spill] sm:$0xff]  ;;  %4029 = vtanh.f32 %v1631_v63 }
 0x1cc   : > { %v5275_v53 = vpop.f32.mrf.mxu0  ;;  %2731 = vmatpush2.bf16.msra.mxu1 %v2084_v57  ;;  %v1636_v57 = vmul.f32 0.5, %v1444_v50  ;;  %4031 = vtanh.f32 %v1635_v59 }
 0x1cd   : > { %2732 = vmatprep.subr.bf16.mxu1 %v2083_v19  ;;  %v6212_v19 = vpack.c.bf16 %v5082_v52, %v5086_v24  ;;  %v6213_v24 = vpack.c.bf16 %v5072_v20, %v5076_v39  ;;  %v5316_v4 = vpop.permute.xlu1 %889  ;;  %v1637_v48 = vmul.f32 0.5, %v1446_v23  ;;  %v3751_v23 = vld [vmem:[%s6188_s3 + $0x44] ss:$16 sps:$4 sm:$0xff]  }
 0x1ce   : > { %v1449_v11 = vpop.f32.mrf.mxu0  ;;  %4033 = vtanh.f32 %v1636_v57 }
 0x1cf   : > { %v5320_v7 = vpop.permute.xlu0 %874  ;;  %4035 = vtanh.f32 %v1637_v48  ;;  %v1450_v46 = vadd.f32 %v1449_v11, %v5117_v27 }
 0x1d0   : > { %v1453_v44 = vpop.f32.mrf.mxu0  ;;  %2733 = vmatpush2.bf16.msra.mxu1 %v6211_v42 }
 0x1d1   : > { %2734 = vmatprep.subr.bf16.mxu1 %v6212_v19  ;;  %v1454_v10 = vadd.f32 %v1453_v44, %v5084_v29  ;;  %v1639_v44 = vmul.f32 0.5, %v1450_v46 }
 0x1d2   : > { %v1455_v3 = vpop.f32.mrf.mxu0 }
 0x1d3   : > { %v1456_v52 = vadd.f32 %v1455_v3, %v5084_v29  ;;  %v3750_v3 = vld [vmem:[%s6188_s3 + $0x20] ss:$16 sps:$4 sm:$0xff]   ;;  %v865_v29 = vpop.permute.xlu0 %864 }
 0x1d4   : > { %v1457_v56 = vpop.f32.mrf.mxu0  ;;  %2735 = vmatpush2.bf16.msra.mxu1 %v6213_v24 }
 0x1d5   : > { %v1458_v60 = vadd.f32 %v1457_v56, %v6214_v62  ;;  %v1641_v39 = vmul.f32 0.5, %v1456_v52  ;;  %v5331_v56 = vpop.permute.xlu1 %879  ;;  %v1448_v52 = vadd.f32 %v5275_v53, %v5117_v27  ;;  %v1436_v27 = vadd.f32 %v5255_v21, %v5119_v26  ;;  %v3753_v21 = vld [vmem:[%s6188_s3 + $0x40] ss:$16 sps:$4 sm:$0xff]  }
 0x1d6   : > { %v1459_v8 = vpop.f32.mrf.mxu0  ;;  %v1438_v53 = vadd.f32 %v5263_v51, %v5123_v49  ;;  %v1434_v49 = vadd.f32 %v5246_v12, %v5119_v26 }
 0x1d7   : > { %v1460_v55 = vadd.f32 %v1459_v8, %v6214_v62  ;;  %2737 = vmatmul.mubr.bf16.vlgmr.msra.gmra.mxu1 %v3745_v40  ;;  %v1642_v33 = vmul.f32 0.5, %v1458_v60  ;;  %4037 = vtanh.f32 %v1641_v39  ;;  %v6216_v40 = vld [vmem:[#allocation6_spill] sm:$0xff]  ;;  %v5337_v62 = vpop.eup %4019  ;;  %v1640_v60 = vmul.f32 0.5, %v1454_v10 }
 0x1d8   : > { %v1463_v20 = vpop.f32.mrf.mxu0  ;;  %2746 = vmatprep.mubr.bf16.mxu1 %v3748_v16  ;;  %v5339_v48 = vpop.eup %4021  ;;  %v1638_v39 = vmul.f32 0.5, %v1448_v52  ;;  %v1633_v10 = vmul.f32 0.5, %v1436_v27  ;;  %v1424_v52 = vadd.f32 %v5215_v5, %v5127_v22  ;;  %v3756_v5 = vld [vmem:[%s6188_s3 + $0x60] ss:$16 sps:$4 sm:$0xff]  }
 0x1d9   : > { %v1464_v31 = vadd.f32 %v1463_v20, %v6215_v61  ;;  %v1643_v42 = vmul.f32 0.5, %v1460_v55  ;;  %4039 = vtanh.f32 %v1642_v33  ;;  %v5345_v20 = vpop.eup %4023 }
 0x1da   : > { %v1465_v36 = vpop.f32.mrf.mxu0  ;;  %v5347_v33 = vpop.eup %4025 }
 0x1db   : > { %v1466_v37 = vadd.f32 %v1465_v36, %v6215_v61  ;;  %v1644_v50 = vmul.f32 0.5, %v1464_v31  ;;  %4041 = vtanh.f32 %v1643_v42  ;;  %v870_v36 = vpop.permute.xlu1 %869 }
 0x1dc   : > { %v1467_v19 = vpop.f32.mrf.mxu0 }
 0x1dd   : > { %v1645_v28 = vmul.f32 0.5, %v1466_v37  ;;  %v1468_v63 = vadd.f32 %v1467_v19, %v6216_v40  ;;  %v5352_v37 = vpop.eup %4027  ;;  %v3754_v19 = vld [vmem:[%s6188_s3 + $0x64] ss:$16 sps:$4 sm:$0xff]  }
 0x1de   : > { %v1469_v11 = vpop.f32.mrf.mxu0 }
 0x1df   : > { %v1470_v24 = vadd.f32 %v1469_v11, %v6216_v40  ;;  %4043 = vtanh.f32 %v1645_v28  ;;  %v1646_v16 = vmul.f32 0.5, %v1468_v63  ;;  %2747 = vmatmul.mubr.bf16.gmra.mxu1 %v3750_v3  ;;  %v5359_v3 = vpop.eup %4029 }
 0x1e0   : > { %v1473_v59 = vpop.f32.mrf.mxu0  ;;  %4045 = vtanh.f32 %v1644_v50  ;;  %2756 = vmatprep.mubr.bf16.mxu1 %v3751_v23  ;;  %v5361_v28 = vpop.eup %4031  ;;  %v1634_v23 = vmul.f32 0.5, %v1438_v53 }
 0x1e1   : > { %v1647_v8 = vmul.f32 0.5, %v1470_v24  ;;  %v1474_v57 = vadd.f32 %v1473_v59, %v865_v29  ;;  %4047 = vtanh.f32 %v1646_v16  ;;  %v5363_v63 = vpop.eup %4033  ;;  %v1632_v24 = vmul.f32 0.5, %v1434_v49 }
 0x1e2   : > { %v1475_v55 = vpop.f32.mrf.mxu0  ;;  %v5365_v11 = vpop.eup %4035 }
 0x1e3   : > { %4049 = vtanh.f32 %v1647_v8  ;;  %v1648_v61 = vmul.f32 0.5, %v1474_v57  ;;  %v1476_v31 = vadd.f32 %v1475_v55, %v865_v29  ;;  %v1414_v8 = vadd.f32 %v5203_v54, %v5148_v9 }
 0x1e4   : > { %4051 = vtanh.f32 %v1639_v44  ;;  %v1477_v42 = vpop.f32.mrf.mxu0  ;;  %v4038_v44 = vpop.eup %4037 }
 0x1e5   : > { %4053 = vtanh.f32 %v1640_v60  ;;  %v1649_v51 = vmul.f32 0.5, %v1476_v31  ;;  %v1478_v46 = vadd.f32 %v1477_v42, %v870_v36  ;;  %v3757_v31 = vld [vmem:[%s6188_s3 + $0x84] ss:$16 sps:$4 sm:$0xff]   ;;  %v1624_v42 = vmul.f32 0.5, %v1414_v8 }
 0x1e6   : > { %4055 = vtanh.f32 %v1648_v61  ;;  %v1479_v50 = vpop.f32.mrf.mxu0  ;;  %v4040_v60 = vpop.eup %4039 }
 0x1e7   : > { %4057 = vtanh.f32 %v1638_v39  ;;  %v1650_v40 = vmul.f32 0.5, %v1478_v46  ;;  %v1480_v26 = vadd.f32 %v1479_v50, %v870_v36  ;;  %2757 = vmatmul.mubr.bf16.gmra.mxu1 %v3753_v21  ;;  %v1628_v39 = vmul.f32 0.5, %v1424_v52 }
 0x1e8   : > { %4059 = vtanh.f32 %v1649_v51  ;;  %v1483_v12 = vpop.f32.mrf.mxu0  ;;  %2766 = vmatprep.mubr.bf16.mxu1 %v3754_v19  ;;  %v4042_v53 = vpop.eup %4041 }
 0x1e9   : > { %4061 = vtanh.f32 %v1650_v40  ;;  %v1484_v29 = vadd.f32 %v1483_v12, %v5320_v7  ;;  %v1651_v16 = vmul.f32 0.5, %v1480_v26  ;;  %v1899_v51 = vmul.f32 0.5, %v4042_v53 }
 0x1ea   : > { %4063 = vtanh.f32 %v1633_v10  ;;  %v1485_v59 = vpop.f32.mrf.mxu0 }
 0x1eb   : > { %4065 = vtanh.f32 %v1634_v23  ;;  %v1652_v57 = vmul.f32 0.5, %v1484_v29  ;;  %v1486_v27 = vadd.f32 %v1485_v59, %v5320_v7  ;;  %v2027_v53 = vadd.f32 0.5, %v1899_v51 }
 0x1ec   : > { %4067 = vtanh.f32 %v1651_v16  ;;  %v1487_v22 = vpop.f32.mrf.mxu0  ;;  %v4044_v55 = vpop.eup %4043  ;;  %v1898_v16 = vmul.f32 0.5, %v4040_v60  ;;  %v3760_v60 = vld [vmem:[%s6188_s3 + $0xa4] ss:$16 sps:$4 sm:$0xff]  }
 0x1ed   : > { %4069 = vtanh.f32 %v1632_v24  ;;  %v1653_v61 = vmul.f32 0.5, %v1486_v27  ;;  %v4046_v9 = vpop.eup %4045  ;;  %v1488_v54 = vadd.f32 %v1487_v22, %v5331_v56  ;;  %v1901_v46 = vmul.f32 0.5, %v4044_v55  ;;  %v3759_v55 = vld [vmem:[%s6188_s3 + $0x80] ss:$16 sps:$4 sm:$0xff]  }
 0x1ee   : > { %4071 = vtanh.f32 %v1652_v57  ;;  %v1489_v7 = vpop.f32.mrf.mxu0  ;;  %v4048_v36 = vpop.eup %4047  ;;  %v1900_v40 = vmul.f32 0.5, %v4046_v9  ;;  %v1897_v24 = vmul.f32 0.5, %v4038_v44  ;;  %v1891_v44 = vmul.f32 0.5, %v5361_v28 }
 0x1ef   : > { %4073 = vtanh.f32 %v1653_v61  ;;  %v1490_v21 = vadd.f32 %v1489_v7, %v5331_v56  ;;  %v1902_v19 = vmul.f32 0.5, %v4048_v36  ;;  %v1654_v10 = vmul.f32 0.5, %v1488_v54  ;;  %2767 = vmatmul.mubr.bf16.gmra.mxu1 %v3756_v5 }
 0x1f0   : > { %v4050_v49 = vpop.eup %4049  ;;  %v5381_v50 = vpop.f32.mrf.mxu0  ;;  %4075 = vtanh.f32 %v1628_v39  ;;  %2776 = vmatprep.mubr.bf16.mxu1 %v3757_v31  ;;  %v2029_v22 = vadd.f32 0.5, %v1901_v46  ;;  %v2028_v31 = vadd.f32 0.5, %v1900_v40  ;;  %v1893_v54 = vmul.f32 0.5, %v5365_v11 }
 0x1f1   : > { %v4052_v23 = vpop.eup %4051  ;;  %v1903_v26 = vmul.f32 0.5, %v4050_v49  ;;  %v1655_v12 = vmul.f32 0.5, %v1490_v21  ;;  %4077 = vtanh.f32 %v1654_v10  ;;  %v2030_v59 = vadd.f32 0.5, %v1902_v19 }
 0x1f2   : > { %v4054_v52 = vpop.eup %4053  ;;  %v5383_v29 = vpop.f32.mrf.mxu0  ;;  %v1895_v27 = vmul.f32 0.5, %v4052_v23  ;;  %v2025_v7 = vadd.f32 0.5, %v1897_v24  ;;  %v2026_v19 = vadd.f32 0.5, %v1898_v16  ;;  %v1887_v11 = vmul.f32 0.5, %v5359_v3 }
 0x1f3   : > { %v4056_v56 = vpop.eup %4055  ;;  %v2031_v8 = vadd.f32 0.5, %v1903_v26  ;;  %4079 = vtanh.f32 %v1655_v12  ;;  %v1896_v61 = vmul.f32 0.5, %v4054_v52  ;;  %v2110_v10 = vpack.c.bf16 %v2030_v59, %v2028_v31 }
 0x1f4   : > { %v4058_v57 = vpop.eup %4057  ;;  %v5385_v5 = vpop.f32.mrf.mxu0  ;;  %4081 = vtanh.f32 %v1624_v42  ;;  %v1904_v36 = vmul.f32 0.5, %v4056_v56  ;;  %v2023_v23 = vadd.f32 0.5, %v1895_v27  ;;  %v2109_v12 = vpack.c.bf16 %v2027_v53, %v2025_v7 }
 0x1f5   : > { %v4060_v39 = vpop.eup %4059  ;;  %v2111_v49 = vpack.c.bf16 %v2031_v8, %v2029_v22  ;;  %v1894_v46 = vmul.f32 0.5, %v4058_v57  ;;  %v1892_v24 = vmul.f32 0.5, %v5363_v63  ;;  %v2024_v56 = vadd.f32 0.5, %v1896_v61 }
 0x1f6   : > { %v4062_v9 = vpop.eup %4061  ;;  %v5395_v21 = vpop.f32.mrf.mxu0  ;;  %v1905_v40 = vmul.f32 0.5, %v4060_v39  ;;  %v2021_v57 = vadd.f32 0.5, %v1893_v54  ;;  %v5403_v27 = vadd.f32 0.5, %v1904_v36  ;;  %v2019_v31 = vadd.f32 0.5, %v1891_v44  ;;  %v3762_v54 = vld [vmem:[%s6188_s3 + $0xa0] ss:$16 sps:$4 sm:$0xff]  }
 0x1f7   : > { %v4064_v51 = vpop.eup %4063  ;;  %v1906_v42 = vmul.f32 0.5, %v4062_v9  ;;  %2777 = vmatmul.mubr.bf16.gmra.mxu1 %v3759_v55  ;;  %2897 = vmatprep.subr.bf16.mxu1 %v2111_v49  ;;  %v2022_v3 = vadd.f32 0.5, %v1894_v46  ;;  %v2108_v9 = vpack.c.bf16 %v2026_v19, %v2024_v56  ;;  %v3763_v44 = vld [vmem:[%s6188_s3 + $0xc4] ss:$16 sps:$4 sm:$0xff]   ;;  %v1885_v19 = vmul.f32 0.5, %v5347_v33 }
 0x1f8   : > { %v4066_v28 = vpop.eup %4065  ;;  %v5397_v26 = vpop.f32.mrf.mxu0  ;;  %2898 = vmatpush1.bf16.msra.mxu1 %v2110_v10  ;;  %2786 = vmatprep.mubr.bf16.mxu1 %v3760_v60  ;;  %v1889_v59 = vmul.f32 0.5, %v4064_v51  ;;  %v5407_v61 = vadd.f32 0.5, %v1905_v40  ;;  %v2107_v49 = vpack.c.bf16 %v2023_v23, %v2021_v57 }
 0x1f9   : > { %v4068_v52 = vpop.eup %4067  ;;  %v5401_v8 = vadd.f32 0.5, %v1906_v42  ;;  %2899 = vmatprep.subr.bf16.mxu1 %v2109_v12  ;;  %v1890_v39 = vmul.f32 0.5, %v4066_v28  ;;  %v2020_v42 = vadd.f32 0.5, %v1892_v24 }
 0x1fa   : > { %v4070_v16 = vpop.eup %4069  ;;  %v1907_v22 = vmul.f32 0.5, %v4068_v52  ;;  %v5405_v55 = vpop.f32.mrf.mxu0  ;;  %v2017_v10 = vadd.f32 0.5, %v1889_v59  ;;  %v1886_v52 = vmul.f32 0.5, %v5352_v37 }
 0x1fb   : > { %v4072_v53 = vpop.eup %4071  ;;  %v1888_v51 = vmul.f32 0.5, %v4070_v16  ;;  %v2018_v24 = vadd.f32 0.5, %v1890_v39  ;;  %v2106_v16 = vpack.c.bf16 %v2022_v3, %v2020_v42  ;;  %v1882_v39 = vmul.f32 0.5, %v5339_v48  ;;  %v3765_v48 = vld [vmem:[%s6188_s3 + $0xc0] ss:$16 sps:$4 sm:$0xff]  }
 0x1fc   : > { %v4074_v63 = vpop.eup %4073  ;;  %v5409_v7 = vadd.f32 0.5, %v1907_v22  ;;  %v5411_v60 = vpop.f32.mrf.mxu0  ;;  %2900 = vmatpush1.bf16.msra.mxu1 %v2108_v9  ;;  %v1908_v28 = vmul.f32 0.5, %v4072_v53  ;;  %v1883_v22 = vmul.f32 0.5, %v5345_v20  ;;  %v2015_v9 = vadd.f32 0.5, %v1887_v11 }
 0x1fd   : > { %v4076_v46 = vpop.eup %4075  ;;  %2901 = vmatprep.subr.bf16.mxu1 %v2107_v49  ;;  %v1909_v56 = vmul.f32 0.5, %v4074_v63  ;;  %v2105_v59 = vpack.c.bf16 %v2019_v31, %v2017_v10  ;;  %v1881_v53 = vmul.f32 0.5, %v5337_v62  ;;  %v2016_v32 = vadd.f32 0.5, %v1888_v51 }
 0x1fe   : > { %v5422_v23 = vpop.f32.mrf.mxu0  ;;  %v4078_v12 = vpop.eup %4077  ;;  %v1884_v49 = vmul.f32 0.5, %v4076_v46  ;;  %v2013_v3 = vadd.f32 0.5, %v1885_v19  ;;  %v5432_v63 = vadd.f32 0.5, %v1908_v28  ;;  %v2011_v42 = vadd.f32 0.5, %v1883_v22  ;;  %v3766_v28 = vld [vmem:[%s6188_s3 + $0xe4] ss:$16 sps:$4 sm:$0xff]  }
 0x1ff   : > { %v1910_v36 = vmul.f32 0.5, %v4078_v12  ;;  %2787 = vmatmul.mubr.bf16.gmra.mxu1 %v3762_v54  ;;  %v2014_v54 = vadd.f32 0.5, %v1886_v52  ;;  %v5438_v31 = vadd.f32 0.5, %v1909_v56  ;;  %v2104_v51 = vpack.c.bf16 %v2018_v24, %v2016_v32 }
 0x200   : > { %v4080_v57 = vpop.eup %4079  ;;  %v5428_v33 = vpop.f32.mrf.mxu0  ;;  %2902 = vmatpush1.bf16.msra.mxu1 %v2106_v16  ;;  %2796 = vmatprep.mubr.bf16.mxu1 %v3763_v44  ;;  %v2103_v44 = vpack.c.bf16 %v2015_v9, %v2013_v3  ;;  %v2012_v10 = vadd.f32 0.5, %v1884_v49  ;;  %v2010_v52 = vadd.f32 0.5, %v1882_v39  ;;  %v3768_v49 = vld [vmem:[%s6188_s3 + $0xe0] ss:$16 sps:$4 sm:$0xff]  }
 0x201   : > { %v1911_v40 = vmul.f32 0.5, %v4080_v57  ;;  %v4082_v37 = vpop.eup %4081  ;;  %v5434_v20 = vadd.f32 0.5, %v1910_v36  ;;  %2903 = vmatprep.subr.bf16.mxu1 %v2105_v59 }
 0x202   : > { %v5436_v11 = vpop.f32.mrf.mxu0  ;;  %v1880_v19 = vmul.f32 0.5, %v4082_v37  ;;  %v2102_v24 = vpack.c.bf16 %v2014_v54, %v2012_v10  ;;  %v6217_v37 = vpack.c.bf16 %v5259_v17, %v5257_v18  ;;  %v6218_v54 = vpack.c.bf16 %v5250_v45, %v5248_v25  ;;  %v3772_v25 = vld [vmem:[%s6188_s3 + $0x124] ss:$16 sps:$4 sm:$0xff]  }
 0x203   : > { %v5440_v62 = vadd.f32 0.5, %v1911_v40  ;;  %v2114_v36 = vpack.c.bf16 %v5434_v20, %v5432_v63  ;;  %v2009_v40 = vadd.f32 0.5, %v1881_v53  ;;  %v3769_v53 = vld [vmem:[%s6188_s3 + $0x104] ss:$16 sps:$4 sm:$0xff]   ;;  %v6220_v17 = vpack.c.bf16 %v5223_v14, %v5221_v6  ;;  %v3798_v63 = vld [vmem:[%s6188_s3 + $0x28] ss:$16 sps:$4 sm:$0xff]  }
 0x204   : > { %v5442_v46 = vpop.f32.mrf.mxu0  ;;  %2904 = vmatpush1.bf16.msra.mxu1 %v2104_v51  ;;  %v2008_v57 = vadd.f32 0.5, %v1880_v19  ;;  %v6219_v51 = vpack.c.bf16 %v5229_v1, %v5227_v38  ;;  %v3805_v20 = vld [vmem:[%s6188_s3 + $0x8c] ss:$16 sps:$4 sm:$0xff]  }
 0x205   : > { %v2115_v32 = vpack.c.bf16 %v5440_v62, %v5438_v31  ;;  %2905 = vmatprep.subr.bf16.mxu1 %v2103_v44  ;;  %v2101_v16 = vpack.c.bf16 %v2011_v42, %v2009_v40  ;;  %v3796_v31 = vld [vmem:[%s6188_s3 + $0x2c] ss:$16 sps:$4 sm:$0xff]   ;;  %v3807_v62 = vld [vmem:[%s6188_s3 + $0x88] ss:$16 sps:$4 sm:$0xff]  }
 0x206   : > { %v1519_v12 = vpop.f32.mrf.mxu0  ;;  %v2100_v9 = vpack.c.bf16 %v2010_v52, %v2008_v57  ;;  %v3774_v57 = vld [vmem:[%s6188_s3 + $0x120] ss:$16 sps:$4 sm:$0xff]  }
 0x207   : > { %2797 = vmatmul.mubr.bf16.gmra.mxu1 %v3765_v48  ;;  %v3771_v48 = vld [vmem:[%s6188_s3 + $0x100] ss:$16 sps:$4 sm:$0xff]  }
 0x208   : > { %v1523_v56 = vpop.f32.mrf.mxu0  ;;  %2906 = vmatpush1.bf16.msra.mxu1 %v2102_v24  ;;  %2806 = vmatprep.mubr.bf16.mxu1 %v3766_v28 }
 0x209   : > { %2907 = vmatprep.subr.bf16.mxu1 %v2101_v16 }
 0x20a   : > { %v1525_v22 = vpop.f32.mrf.mxu0 }
 0x20c   : > { %v1527_v59 = vpop.f32.mrf.mxu0  ;;  %2908 = vmatpush1.bf16.msra.mxu1 %v2100_v9 }
 0x20d   : > { %2909 = vmatprep.subr.bf16.mxu1 %v6217_v37  ;;  %v3775_v37 = vld [vmem:[%s6188_s3 + $0x144] ss:$16 sps:$4 sm:$0xff]  }
 0x20e   : > { %v1529_v39 = vpop.f32.mrf.mxu0 }
 0x20f   : > { %2807 = vmatmul.mubr.bf16.gmra.mxu1 %v3768_v49  ;;  %v1530_v18 = vadd.f32 %v1529_v39, %v5267_v43 }
 0x210   : > { %v1533_v3 = vpop.f32.mrf.mxu0  ;;  %2910 = vmatpush1.bf16.msra.mxu1 %v6218_v54  ;;  %2816 = vmatprep.mubr.bf16.mxu1 %v3769_v53  ;;  %v1528_v54 = vadd.f32 %v1527_v59, %v5267_v43  ;;  %v1518_v59 = vadd.f32 %v5442_v46, %v5271_v2  ;;  %v1506_v46 = vadd.f32 %v5405_v55, %v5279_v47 }
 0x211   : > { %2911 = vmatprep.subr.bf16.mxu1 %v6219_v51  ;;  %v1671_v19 = vmul.f32 0.5, %v1530_v18  ;;  %v1534_v9 = vadd.f32 %v1533_v3, %v5231_v35  ;;  %v1524_v3 = vadd.f32 %v1523_v56, %v5252_v41 }
 0x212   : > { %v1535_v42 = vpop.f32.mrf.mxu0 }
 0x213   : > { %v1536_v10 = vadd.f32 %v1535_v42, %v5231_v35  ;;  %4083 = vtanh.f32 %v1671_v19  ;;  %v1668_v56 = vmul.f32 0.5, %v1524_v3  ;;  %v1496_v19 = vadd.f32 %v5383_v29, %v5302_v30 }
 0x214   : > { %v1537_v44 = vpop.f32.mrf.mxu0  ;;  %2912 = vmatpush1.bf16.msra.mxu1 %v6220_v17  ;;  %v1670_v17 = vmul.f32 0.5, %v1528_v54 }
 0x215   : > { %v1538_v6 = vadd.f32 %v1537_v44, %v5243_v15  ;;  %v1673_v39 = vmul.f32 0.5, %v1536_v10  ;;  %v1520_v44 = vadd.f32 %v1519_v12, %v5271_v2  ;;  %v3778_v2 = vld [vmem:[%s6188_s3 + $0x164] ss:$16 sps:$4 sm:$0xff]   ;;  %v1661_v10 = vmul.f32 0.5, %v1506_v46 }
 0x216   : > { %v1539_v45 = vpop.f32.mrf.mxu0 }
 0x217   : > { %v1540_v38 = vadd.f32 %v1539_v45, %v5243_v15  ;;  %2817 = vmatmul.mubr.bf16.gmra.mxu1 %v3771_v48  ;;  %v1526_v15 = vadd.f32 %v1525_v22, %v5252_v41  ;;  %v1674_v51 = vmul.f32 0.5, %v1538_v6  ;;  %v1672_v48 = vmul.f32 0.5, %v1534_v9  ;;  %v3777_v41 = vld [vmem:[%s6188_s3 + $0x140] ss:$16 sps:$4 sm:$0xff]   ;;  %v3781_v6 = vld [vmem:[%s6188_s3 + $0x184] ss:$16 sps:$4 sm:$0xff]  }
 0x218   : > { %v1543_v1 = vpop.f32.mrf.mxu0  ;;  %2826 = vmatprep.mubr.bf16.mxu1 %v3772_v25  ;;  %v1516_v22 = vadd.f32 %v5436_v11, %v5269_v34  ;;  %v1667_v12 = vmul.f32 0.5, %v1520_v44  ;;  %v1514_v11 = vadd.f32 %v5428_v33, %v5269_v34  ;;  %v1666_v45 = vmul.f32 0.5, %v1518_v59 }
 0x219   : > { %v1675_v28 = vmul.f32 0.5, %v1540_v38  ;;  %v1544_v40 = vadd.f32 %v1543_v1, %v5209_v58  ;;  %v1669_v18 = vmul.f32 0.5, %v1526_v15  ;;  %v1500_v38 = vadd.f32 %v5395_v21, %v5316_v4 }
 0x21a   : > { %v1545_v52 = vpop.f32.mrf.mxu0  ;;  %v1665_v25 = vmul.f32 0.5, %v1516_v22  ;;  %v1504_v33 = vadd.f32 %v5397_v26, %v5279_v47  ;;  %v1664_v1 = vmul.f32 0.5, %v1514_v11  ;;  %v3780_v47 = vld [vmem:[%s6188_s3 + $0x160] ss:$16 sps:$4 sm:$0xff]  }
 0x21b   : > { %v1546_v14 = vadd.f32 %v1545_v52, %v5209_v58  ;;  %v1676_v24 = vmul.f32 0.5, %v1544_v40  ;;  %4085 = vtanh.f32 %v1675_v28  ;;  %v1659_v40 = vmul.f32 0.5, %v1500_v38  ;;  %v3783_v22 = vld [vmem:[%s6188_s3 + $0x180] ss:$16 sps:$4 sm:$0xff]  }
 0x21c   : > { %v1547_v16 = vpop.f32.mrf.mxu0  ;;  %v1494_v52 = vadd.f32 %v5381_v50, %v5302_v30  ;;  %v1660_v29 = vmul.f32 0.5, %v1504_v33 }
 0x21d   : > { %v1677_v49 = vmul.f32 0.5, %v1546_v14  ;;  %v1548_v53 = vadd.f32 %v1547_v16, %v5218_v13  ;;  %4087 = vtanh.f32 %v1676_v24 }
 0x21e   : > { %v1549_v58 = vpop.f32.mrf.mxu0  ;;  %v1656_v30 = vmul.f32 0.5, %v1494_v52 }
 0x21f   : > { %v1678_v42 = vmul.f32 0.5, %v1548_v53  ;;  %4089 = vtanh.f32 %v1677_v49  ;;  %v1550_v35 = vadd.f32 %v1549_v58, %v5218_v13  ;;  %2827 = vmatmul.mubr.bf16.gmra.mxu1 %v3774_v57  ;;  %v1510_v13 = vadd.f32 %v5422_v23, %v5295_v0 }
 0x220   : > { %2836 = vmatprep.mubr.bf16.mxu1 %v3775_v37  ;;  %v1508_v23 = vadd.f32 %v5411_v60, %v5295_v0  ;;  %v4084_v55 = vpop.eup %4083  ;;  %v1498_v60 = vadd.f32 %v5385_v5, %v5316_v4  ;;  %v1657_v5 = vmul.f32 0.5, %v1496_v19 }
 0x221   : > { %4091 = vtanh.f32 %v1678_v42  ;;  %v1679_v43 = vmul.f32 0.5, %v1550_v35  ;;  %v1663_v34 = vmul.f32 0.5, %v1510_v13  ;;  %v1927_v44 = vmul.f32 0.5, %v4084_v55 }
 0x222   : > { %4093 = vtanh.f32 %v1673_v39  ;;  %v1662_v21 = vmul.f32 0.5, %v1508_v23  ;;  %v1658_v24 = vmul.f32 0.5, %v1498_v60 }
 0x223   : > { %4095 = vtanh.f32 %v1674_v51  ;;  %v2055_v38 = vadd.f32 0.5, %v1927_v44 }
 0x224   : > { %4097 = vtanh.f32 %v1679_v43 }
 0x225   : > { %4099 = vtanh.f32 %v1672_v48 }
 0x226   : > { %4101 = vtanh.f32 %v1669_v18 }
 0x227   : > { %4103 = vtanh.f32 %v1670_v17  ;;  %2837 = vmatmul.mubr.bf16.gmra.mxu1 %v3777_v41  ;;  %v3784_v17 = vld [vmem:[%s6188_s3 + $0x1a4] ss:$16 sps:$4 sm:$0xff]  }
 0x228   : > { %4105 = vtanh.f32 %v1667_v12  ;;  %2846 = vmatprep.mubr.bf16.mxu1 %v3778_v2  ;;  %v4086_v0 = vpop.eup %4085 }
 0x229   : > { %4107 = vtanh.f32 %v1668_v56  ;;  %v1931_v9 = vmul.f32 0.5, %v4086_v0 }
 0x22a   : > { %4109 = vtanh.f32 %v1665_v25  ;;  %v4088_v28 = vpop.eup %4087 }
 0x22b   : > { %4111 = vtanh.f32 %v1666_v45  ;;  %v1932_v50 = vmul.f32 0.5, %v4088_v28  ;;  %v2059_v35 = vadd.f32 0.5, %v1931_v9 }
 0x22c   : > { %4113 = vtanh.f32 %v1663_v34  ;;  %v4090_v26 = vpop.eup %4089 }
 0x22d   : > { %4115 = vtanh.f32 %v1664_v1  ;;  %v1933_v49 = vmul.f32 0.5, %v4090_v26  ;;  %v2060_v59 = vadd.f32 0.5, %v1932_v50 }
 0x22e   : > { %v4092_v4 = vpop.eup %4091  ;;  %4117 = vtanh.f32 %v1661_v10 }
 0x22f   : > { %v4094_v14 = vpop.eup %4093  ;;  %4119 = vtanh.f32 %v1662_v21  ;;  %v1934_v16 = vmul.f32 0.5, %v4092_v4  ;;  %2847 = vmatmul.mubr.bf16.gmra.mxu1 %v3780_v47  ;;  %v2061_v3 = vadd.f32 0.5, %v1933_v49 }
 0x230   : > { %v4096_v57 = vpop.eup %4095  ;;  %4121 = vtanh.f32 %v1659_v40  ;;  %2856 = vmatprep.mubr.bf16.mxu1 %v3781_v6  ;;  %v1929_v15 = vmul.f32 0.5, %v4094_v14  ;;  %v3786_v6 = vld [vmem:[%s6188_s3 + $0x1a0] ss:$16 sps:$4 sm:$0xff]  }
 0x231   : > { %v4098_v53 = vpop.eup %4097  ;;  %4123 = vtanh.f32 %v1660_v29  ;;  %v1930_v54 = vmul.f32 0.5, %v4096_v57  ;;  %v2062_v51 = vadd.f32 0.5, %v1934_v16 }
 0x232   : > { %v4100_v37 = vpop.eup %4099  ;;  %4125 = vtanh.f32 %v1657_v5  ;;  %v1935_v39 = vmul.f32 0.5, %v4098_v53  ;;  %v2057_v41 = vadd.f32 0.5, %v1929_v15 }
 0x233   : > { %v4102_v58 = vpop.eup %4101  ;;  %4127 = vtanh.f32 %v1658_v24  ;;  %v1928_v43 = vmul.f32 0.5, %v4100_v37  ;;  %v2058_v46 = vadd.f32 0.5, %v1930_v54  ;;  %v2126_v25 = vpack.c.bf16 %v2062_v51, %v2060_v59  ;;  %v3787_v24 = vld [vmem:[%s6188_s3 + $0x1c4] ss:$16 sps:$4 sm:$0xff]   ;;  %v3789_v59 = vld [vmem:[%s6188_s3 + $0x1c0] ss:$16 sps:$4 sm:$0xff]  }
 0x234   : > { %v4104_v42 = vpop.eup %4103  ;;  %v2063_v48 = vadd.f32 0.5, %v1935_v39  ;;  %4129 = vtanh.f32 %v1656_v30  ;;  %v1925_v12 = vmul.f32 0.5, %v4102_v58  ;;  %v2125_v34 = vpack.c.bf16 %v2059_v35, %v2057_v41 }
 0x235   : > { %v4106_v18 = vpop.eup %4105  ;;  %v1926_v2 = vmul.f32 0.5, %v4104_v42  ;;  %v2056_v55 = vadd.f32 0.5, %v1928_v43 }
 0x236   : > { %v4108_v13 = vpop.eup %4107  ;;  %v2127_v11 = vpack.c.bf16 %v2063_v48, %v2061_v3  ;;  %v1923_v45 = vmul.f32 0.5, %v4106_v18  ;;  %v2053_v0 = vadd.f32 0.5, %v1925_v12  ;;  %v3790_v12 = vld [vmem:[%s6188_s3 + $0x1e4] ss:$16 sps:$4 sm:$0xff]  }
 0x237   : > { %v4110_v56 = vpop.eup %4109  ;;  %2857 = vmatmul.mubr.bf16.gmra.mxu1 %v3783_v22  ;;  %v1924_v1 = vmul.f32 0.5, %v4108_v13  ;;  %v2054_v28 = vadd.f32 0.5, %v1926_v2  ;;  %v2124_v40 = vpack.c.bf16 %v2058_v46, %v2056_v55  ;;  %v3813_v55 = vld [vmem:[%s6188_s3 + $0xc8] ss:$16 sps:$4 sm:$0xff]  }
 0x238   : > { %v4112_v23 = vpop.eup %4111  ;;  %2913 = vmatprep.subr.bf16.mxu1 %v2127_v11  ;;  %2866 = vmatprep.mubr.bf16.mxu1 %v3784_v17  ;;  %v1921_v10 = vmul.f32 0.5, %v4110_v56  ;;  %v2051_v52 = vadd.f32 0.5, %v1923_v45  ;;  %v2123_v29 = vpack.c.bf16 %v2055_v38, %v2053_v0  ;;  %v3795_v45 = vld [vmem:[%s6188_s3 + $0xc] ss:$16 sps:$4 sm:$0xff]   ;;  %v6221_v38 = vpack.c.bf16 %v5409_v7, %v5407_v61  ;;  %v3804_v7 = vld [vmem:[%s6188_s3 + $0x68] ss:$16 sps:$4 sm:$0xff]  }
 0x239   : > { %v4114_v33 = vpop.eup %4113  ;;  %2914 = vmatpush2.bf16.msra.mxu1 %v2126_v25  ;;  %v1922_v21 = vmul.f32 0.5, %v4112_v23  ;;  %v2052_v14 = vadd.f32 0.5, %v1924_v1  ;;  %v3792_v23 = vld [vmem:[%s6188_s3 + $0x1e0] ss:$16 sps:$4 sm:$0xff]   ;;  %v3799_v61 = vld [vmem:[%s6188_s3 + $0x4c] ss:$16 sps:$4 sm:$0xff]  }
 0x23a   : > { %v4116_v19 = vpop.eup %4115  ;;  %2915 = vmatprep.subr.bf16.mxu1 %v2125_v34  ;;  %v1919_v26 = vmul.f32 0.5, %v4114_v33  ;;  %v2049_v9 = vadd.f32 0.5, %v1921_v10  ;;  %v3793_v34 = vld [vmem:[%s6188_s3 + $0x8] ss:$16 sps:$4 sm:$0xff]   ;;  %v6222_v33 = vpack.c.bf16 %v5401_v8, %v5403_v27  ;;  %v3802_v27 = vld [vmem:[%s6188_s3 + $0x6c] ss:$16 sps:$4 sm:$0xff]  }
 0x23b   : > { %v4118_v60 = vpop.eup %4117  ;;  %v1920_v5 = vmul.f32 0.5, %v4116_v19  ;;  %v2050_v30 = vadd.f32 0.5, %v1922_v21  ;;  %v2122_v50 = vpack.c.bf16 %v2054_v28, %v2052_v14  ;;  %v3801_v8 = vld [vmem:[%s6188_s3 + $0x48] ss:$16 sps:$4 sm:$0xff]   ;;  %v3811_v1 = vld [vmem:[%s6188_s3 + $0xcc] ss:$16 sps:$4 sm:$0xff]  }
 0x23c   : > { %v4120_v47 = vpop.eup %4119  ;;  %v1917_v57 = vmul.f32 0.5, %v4118_v60  ;;  %v2047_v39 = vadd.f32 0.5, %v1919_v26  ;;  %v2121_v58 = vpack.c.bf16 %v2051_v52, %v2049_v9  ;;  %v3814_v19 = vld [vmem:[%s6188_s3 + $0xec] ss:$16 sps:$4 sm:$0xff]   ;;  %v3816_v10 = vld [vmem:[%s6188_s3 + $0xe8] ss:$16 sps:$4 sm:$0xff]  }
 0x23d   : > { %v4122_v4 = vpop.eup %4121  ;;  %2916 = vmatpush2.bf16.msra.mxu1 %v2124_v40  ;;  %v1918_v53 = vmul.f32 0.5, %v4120_v47  ;;  %v2048_v51 = vadd.f32 0.5, %v1920_v5  ;;  %v3817_v0 = vld [vmem:[%s6188_s3 + $0x10c] ss:$16 sps:$4 sm:$0xff]   ;;  %v3819_v60 = vld [vmem:[%s6188_s3 + $0x108] ss:$16 sps:$4 sm:$0xff]  }
 0x23e   : > { %v4124_v16 = vpop.eup %4123  ;;  %2917 = vmatprep.subr.bf16.mxu1 %v2123_v29  ;;  %v1915_v15 = vmul.f32 0.5, %v4122_v4  ;;  %v2045_v35 = vadd.f32 0.5, %v1917_v57  ;;  %v3820_v21 = vld [vmem:[%s6188_s3 + $0x12c] ss:$16 sps:$4 sm:$0xff]   ;;  %v3822_v26 = vld [vmem:[%s6188_s3 + $0x128] ss:$16 sps:$4 sm:$0xff]  }
 0x23f   : > { %v4126_v49 = vpop.eup %4125  ;;  %2867 = vmatmul.mubr.bf16.gmra.mxu1 %v3786_v6  ;;  %v1916_v54 = vmul.f32 0.5, %v4124_v16  ;;  %v2046_v48 = vadd.f32 0.5, %v1918_v53  ;;  %v2120_v22 = vpack.c.bf16 %v2050_v30, %v2048_v51  ;;  %v3823_v52 = vld [vmem:[%s6188_s3 + $0x14c] ss:$16 sps:$4 sm:$0xff]   ;;  %v3825_v14 = vld [vmem:[%s6188_s3 + $0x148] ss:$16 sps:$4 sm:$0xff]  }
 0x240   : > { %v4128_v37 = vpop.eup %4127  ;;  %2876 = vmatprep.mubr.bf16.mxu1 %v3787_v24  ;;  %v1913_v44 = vmul.f32 0.5, %v4126_v49  ;;  %v2043_v18 = vadd.f32 0.5, %v1915_v15  ;;  %v2119_v43 = vpack.c.bf16 %v2047_v39, %v2045_v35  ;;  %v3826_v24 = vld [vmem:[%s6188_s3 + $0x16c] ss:$16 sps:$4 sm:$0xff]   ;;  %v3828_v53 = vld [vmem:[%s6188_s3 + $0x168] ss:$16 sps:$4 sm:$0xff]  }
 0x241   : > { %2918 = vmatpush2.bf16.msra.mxu1 %v2122_v50  ;;  %v4130_v42 = vpop.eup %4129  ;;  %v1914_v3 = vmul.f32 0.5, %v4128_v37  ;;  %v2044_v13 = vadd.f32 0.5, %v1916_v54  ;;  %v3831_v30 = vld [vmem:[%s6188_s3 + $0x18c] ss:$16 sps:$4 sm:$0xff]  }
 0x242   : > { %2919 = vmatprep.subr.bf16.mxu1 %v2121_v58  ;;  %v1912_v17 = vmul.f32 0.5, %v4130_v42  ;;  %v2041_v41 = vadd.f32 0.5, %v1913_v44  ;;  %v3829_v58 = vld [vmem:[%s6188_s3 + $0x188] ss:$16 sps:$4 sm:$0xff]   ;;  %v3834_v54 = vld [vmem:[%s6188_s3 + $0x1ac] ss:$16 sps:$4 sm:$0xff]  }
 0x243   : > { %v2042_v11 = vadd.f32 0.5, %v1914_v3  ;;  %v2118_v56 = vpack.c.bf16 %v2046_v48, %v2044_v13  ;;  %v3832_v3 = vld [vmem:[%s6188_s3 + $0x1a8] ss:$16 sps:$4 sm:$0xff]   ;;  %v3837_v48 = vld [vmem:[%s6188_s3 + $0x1cc] ss:$16 sps:$4 sm:$0xff]  }
 0x244   : > { %v2117_v2 = vpack.c.bf16 %v2043_v18, %v2041_v41  ;;  %v2040_v46 = vadd.f32 0.5, %v1912_v17  ;;  %v3835_v17 = vld [vmem:[%s6188_s3 + $0x1c8] ss:$16 sps:$4 sm:$0xff]   ;;  %v3840_v13 = vld [vmem:[%s6188_s3 + $0x1ec] ss:$16 sps:$4 sm:$0xff]  }
 0x245   : > { %2920 = vmatpush2.bf16.msra.mxu1 %v2120_v22 }
 0x246   : > { %2921 = vmatprep.subr.bf16.mxu1 %v2119_v43  ;;  %v2116_v25 = vpack.c.bf16 %v2042_v11, %v2040_v46 }
 0x247   : > { %2877 = vmatmul.mubr.bf16.gmra.mxu1 %v3789_v59 }
 0x248   : > { %2886 = vmatprep.mubr.bf16.mxu1 %v3790_v12 }
 0x249   : > { %2922 = vmatpush2.bf16.msra.mxu1 %v2118_v56 }
 0x24a   : > { %2923 = vmatprep.subr.bf16.mxu1 %v2117_v2  ;;  %v3838_v2 = vld [vmem:[%s6188_s3 + $0x1e8] ss:$16 sps:$4 sm:$0xff]  }
 0x24d   : > { %2924 = vmatpush2.bf16.msra.mxu1 %v2116_v25 }
 0x24e   : > { %2925 = vmatprep.subr.bf16.mxu1 %v2115_v32  ;;  %v3810_v32 = vld [vmem:[%s6188_s3 + $0xa8] ss:$16 sps:$4 sm:$0xff]  }
 0x24f   : > { %2887 = vmatmul.mubr.bf16.gmra.mxu1 %v3792_v23 }
 0x250   : > { %2929 = vmatprep.mubr.bf16.mxu1 %v3795_v45 }
 0x251   : > { %2926 = vmatpush2.bf16.msra.mxu1 %v2114_v36  ;;  %v3808_v36 = vld [vmem:[%s6188_s3 + $0xac] ss:$16 sps:$4 sm:$0xff]  }
 0x252   : > { %2927 = vmatprep.subr.bf16.mxu1 %v6221_v38 }
 0x255   : > { %2928 = vmatpush2.bf16.msra.mxu1 %v6222_v33 }
 0x258   : > { %2930 = vmatmul.mubr.bf16.vlgmr.msra.gmra.mxu1 %v3793_v34 }
 0x259   : > { %2939 = vmatprep.mubr.bf16.mxu1 %v3796_v31 }
 0x260   : > { %2940 = vmatmul.mubr.bf16.gmra.mxu1 %v3798_v63 }
 0x261   : > { %2949 = vmatprep.mubr.bf16.mxu1 %v3799_v61 }
 0x268   : > { %2950 = vmatmul.mubr.bf16.gmra.mxu1 %v3801_v8 }
 0x269   : > { %2959 = vmatprep.mubr.bf16.mxu1 %v3802_v27 }
 0x270   : > { %2960 = vmatmul.mubr.bf16.gmra.mxu1 %v3804_v7 }
 0x271   : > { %2969 = vmatprep.mubr.bf16.mxu1 %v3805_v20 }
 0x278   : > { %2970 = vmatmul.mubr.bf16.gmra.mxu1 %v3807_v62 }
 0x279   : > { %2979 = vmatprep.mubr.bf16.mxu1 %v3808_v36  ;;  %v5744_v36 = vpop.permute.xlu0 %2296 }
 0x280   : > { %2980 = vmatmul.mubr.bf16.gmra.mxu1 %v3810_v32 }
 0x281   : > { %2989 = vmatprep.mubr.bf16.mxu1 %v3811_v1 }
 0x288   : > { %2990 = vmatmul.mubr.bf16.gmra.mxu1 %v3813_v55  ;;  %v5750_v55 = vpop.permute.xlu1 %2301 }
 0x289   : > { %2999 = vmatprep.mubr.bf16.mxu1 %v3814_v19 }
 0x290   : > { %3000 = vmatmul.mubr.bf16.gmra.mxu1 %v3816_v10  ;;  %v5754_v10 = vpop.permute.xlu0 %2286 }
 0x291   : > { %3009 = vmatprep.mubr.bf16.mxu1 %v3817_v0 }
 0x297   : > { %v5621_v28 = vpop.f32.mrf.mxu1 }
 0x298   : > { %3010 = vmatmul.mubr.bf16.gmra.mxu1 %v3819_v60 }
 0x299   : > { %3019 = vmatprep.mubr.bf16.mxu1 %v3820_v21  ;;  %v5623_v40 = vpop.f32.mrf.mxu1  ;;  %v5760_v21 = vpop.permute.xlu1 %2291 }
 0x29b   : > { %v5625_v47 = vpop.f32.mrf.mxu1 }
 0x29d   : > { %v5633_v29 = vpop.f32.mrf.mxu1 }
 0x29f   : > { %v5635_v6 = vpop.f32.mrf.mxu1 }
 0x2a0   : > { %3020 = vmatmul.mubr.bf16.gmra.mxu1 %v3822_v26 }
 0x2a1   : > { %3029 = vmatprep.mubr.bf16.mxu1 %v3823_v52  ;;  %v5637_v4 = vpop.f32.mrf.mxu1  ;;  %v5764_v52 = vpop.permute.xlu0 %2276 }
 0x2a3   : > { %v5639_v5 = vpop.f32.mrf.mxu1 }
 0x2a5   : > { %v5647_v16 = vpop.f32.mrf.mxu1 }
 0x2a7   : > { %v5649_v57 = vpop.f32.mrf.mxu1 }
 0x2a8   : > { %3030 = vmatmul.mubr.bf16.gmra.mxu1 %v3825_v14 }
 0x2a9   : > { %3039 = vmatprep.mubr.bf16.mxu1 %v3826_v24  ;;  %v5651_v9 = vpop.f32.mrf.mxu1 }
 0x2ab   : > { %v5653_v49 = vpop.f32.mrf.mxu1 }
 0x2ad   : > { %v5661_v50 = vpop.f32.mrf.mxu1 }
 0x2af   : > { %v5663_v37 = vpop.f32.mrf.mxu1 }
 0x2b0   : > { %3040 = vmatmul.mubr.bf16.gmra.mxu1 %v3828_v53  ;;  %v5770_v53 = vpop.permute.xlu1 %2281 }
 0x2b1   : > { %3049 = vmatprep.mubr.bf16.mxu1 %v3831_v30  ;;  %v5665_v15 = vpop.f32.mrf.mxu1 }
 0x2b3   : > { %v5667_v39 = vpop.f32.mrf.mxu1 }
 0x2b5   : > { %v5675_v51 = vpop.f32.mrf.mxu1 }
 0x2b7   : > { %v5677_v42 = vpop.f32.mrf.mxu1 }
 0x2b8   : > { %3050 = vmatmul.mubr.bf16.gmra.mxu1 %v3829_v58  ;;  %v5774_v58 = vpop.permute.xlu0 %2266 }
 0x2b9   : > { %3059 = vmatprep.mubr.bf16.mxu1 %v3834_v54  ;;  %v5679_v44 = vpop.f32.mrf.mxu1 }
 0x2bb   : > { %v5681_v35 = vpop.f32.mrf.mxu1 }
 0x2bd   : > { %v5689_v22 = vpop.f32.mrf.mxu1 }
 0x2bf   : > { %v5691_v18 = vpop.f32.mrf.mxu1 }
 0x2c0   : > { %3060 = vmatmul.mubr.bf16.gmra.mxu1 %v3832_v3 }
 0x2c1   : > { %3069 = vmatprep.mubr.bf16.mxu1 %v3837_v48  ;;  %v5693_v43 = vpop.f32.mrf.mxu1  ;;  %v5780_v48 = vpop.permute.xlu1 %2271 }
 0x2c3   : > { %v5695_v59 = vpop.f32.mrf.mxu1 }
 0x2c5   : > { %v5703_v12 = vpop.f32.mrf.mxu1 }
 0x2c7   : > { %v5705_v41 = vpop.f32.mrf.mxu1 }
 0x2c8   : > { %3070 = vmatmul.mubr.bf16.gmra.mxu1 %v3835_v17 }
 0x2c9   : > { %3079 = vmatprep.mubr.bf16.mxu1 %v3840_v13  ;;  %v5707_v11 = vpop.f32.mrf.mxu1  ;;  %v5784_v13 = vpop.permute.xlu0 %2256 }
 0x2cb   : > { %v5709_v56 = vpop.f32.mrf.mxu1 }
 0x2cd   : > { %v5714_v46 = vpop.f32.mrf.mxu1 }
 0x2cf   : > { %v5716_v25 = vpop.f32.mrf.mxu1 }
 0x2d0   : > { %3080 = vmatmul.mubr.bf16.gmra.mxu1 %v3838_v2 }
 0x2d1   : > { %v5718_v23 = vpop.f32.mrf.mxu1 }
 0x2d3   : > { %v5720_v45 = vpop.f32.mrf.mxu1 }
 0x2d5   : > { %v5722_v38 = vpop.f32.mrf.mxu1 }
 0x2d7   : > { %v5724_v34 = vpop.f32.mrf.mxu1 }
 0x2d9   : > { %v5726_v33 = vpop.f32.mrf.mxu1 }
 0x2da   : > { %6223 = vst [vmem:[#allocation7_spill] sm:$0xff] %v5726_v33 }
 0x2db   : > { %v5728_v31 = vpop.f32.mrf.mxu1 }
 0x2dc   : > { %6224 = vst [vmem:[#allocation5_spill] sm:$0xff] %v5728_v31 }
 0x2dd   : > { %v5730_v63 = vpop.f32.mrf.mxu1 }
 0x2de   : > { %6225 = vst [vmem:[#allocation6_spill] sm:$0xff] %v5730_v63 }
 0x2df   : > { %v5732_v61 = vpop.f32.mrf.mxu1 }
 0x2e0   : > { %6226 = vst [vmem:[#allocation8_spill] sm:$0xff] %v5732_v61 }
 0x2e1   : > { %v5734_v8 = vpop.f32.mrf.mxu1 }
 0x2e2   : > { %6227 = vst [vmem:[#allocation9_spill] sm:$0xff] %v5734_v8 }
 0x2e3   : > { %v5736_v27 = vpop.f32.mrf.mxu1 }
 0x2e4   : > { %6228 = vst [vmem:[#allocation10_spill] sm:$0xff] %v5736_v27 }
 0x2e5   : > { %v5738_v7 = vpop.f32.mrf.mxu1 }
 0x2e6   : > { %6229 = vst [vmem:[#allocation11_spill] sm:$0xff] %v5738_v7 }
 0x2e7   : > { %v5740_v20 = vpop.f32.mrf.mxu1 }
 0x2e8   : > { %6230 = vst [vmem:[#allocation12_spill] sm:$0xff] %v5740_v20 }
 0x2e9   : > { %v5742_v62 = vpop.f32.mrf.mxu1 }
 0x2ea   : > { %6231 = vst [vmem:[#allocation13_spill] sm:$0xff] %v5742_v62 }
 0x2eb   : > { %v5746_v32 = vpop.f32.mrf.mxu1 }
 0x2ec   : > { %6232 = vst [vmem:[#allocation14_spill] sm:$0xff] %v5746_v32 }
 0x2ed   : > { %v5748_v1 = vpop.f32.mrf.mxu1 }
 0x2ee   : > { %6233 = vst [vmem:[#allocation15_spill] sm:$0xff] %v5748_v1 }
 0x2ef   : > { %v5752_v19 = vpop.f32.mrf.mxu1 }
 0x2f0   : > { %6234 = vst [vmem:[#allocation16_spill] sm:$0xff] %v5752_v19 }
 0x2f1   : > { %v5756_v0 = vpop.f32.mrf.mxu1 }
 0x2f2   : > { %6235 = vst [vmem:[#allocation17_spill] sm:$0xff] %v5756_v0 }
 0x2f3   : > { %v5758_v60 = vpop.f32.mrf.mxu1 }
 0x2f4   : > { %6236 = vst [vmem:[#allocation18_spill] sm:$0xff] %v5758_v60 }
 0x2f5   : > { %v5762_v26 = vpop.f32.mrf.mxu1 }
 0x2f6   : > { %6237 = vst [vmem:[#allocation19_spill] sm:$0xff] %v5762_v26 }
 0x2f7   : > { %v5766_v14 = vpop.f32.mrf.mxu1 }
 0x2f8   : > { %6238 = vst [vmem:[#allocation20_spill] sm:$0xff] %v5766_v14 }
 0x2f9   : > { %v5768_v24 = vpop.f32.mrf.mxu1 }
 0x2fa   : > { %6239 = vst [vmem:[#allocation21_spill] sm:$0xff] %v5768_v24  ;;  %v5790_v24 = vpop.permute.xlu1 %2261 }
 0x2fb   : > { %v5772_v30 = vpop.f32.mrf.mxu1 }
 0x2fc   : > { %6240 = vst [vmem:[#allocation22_spill] sm:$0xff] %v5772_v30  ;;  %v2247_v30 = vpop.permute.xlu0 %2246 }
 0x2fd   : > { %v5776_v54 = vpop.f32.mrf.mxu1 }
 0x2fe   : > { %6241 = vst [vmem:[#allocation23_spill] sm:$0xff] %v5776_v54 }
 0x2ff   : > { %v5778_v3 = vpop.f32.mrf.mxu1 }
 0x300   : > { %6242 = vst [vmem:[#allocation24_spill] sm:$0xff] %v5778_v3  ;;  %v2252_v3 = vpop.permute.xlu1 %2251  ;;  %v2237_v19 = vpop.permute.xlu0 %2236 }
 0x301   : > { %v5782_v17 = vpop.f32.mrf.mxu1 }
 0x302   : > { %6243 = vst [vmem:[#allocation25_spill] sm:$0xff] %v5782_v17 }
 0x303   : > { %v5786_v2 = vpop.f32.mrf.mxu1 }
 0x304   : > { %6244 = vst [vmem:[#allocation26_spill] sm:$0xff] %v5786_v2  ;;  %v2242_v2 = vpop.permute.xlu1 %2241 }
 0x305   : > { %v5788_v14 = vpop.f32.mrf.mxu1 }
 0x306   : > { %6245 = vst [vmem:[#allocation27_spill] sm:$0xff] %v5788_v14  ;;  %v2227_v14 = vpop.permute.xlu0 %2226 }
 0x307   : > { %v5792_v26 = vpop.f32.mrf.mxu1 }
 0x308   : > { %6246 = vst [vmem:[#allocation28_spill] sm:$0xff] %v5792_v26  ;;  %v2739_v26 = vadd.f32 %v5621_v28, %v2227_v14  ;;  %v2232_v7 = vpop.permute.xlu1 %2231 }
 0x309   : > { %v5794_v60 = vpop.f32.mrf.mxu1 }
 0x30a   : > { %6247 = vst [vmem:[#allocation29_spill] sm:$0xff] %v5794_v60  ;;  %v2741_v60 = vadd.f32 %v5623_v40, %v2227_v14 }
 0x30b   : > { %v5796_v54 = vpop.f32.mrf.mxu1 }
 0x30c   : > { %6248 = vst [vmem:[#allocation30_spill] sm:$0xff] %v5796_v54 }
 0x30d   : > { %v5798_v0 = vpop.f32.mrf.mxu1 }
 0x30e   : > { %6249 = vst [vmem:[#allocation31_spill] sm:$0xff] %v5798_v0  ;;  %v2743_v0 = vadd.f32 %v5625_v47, %v2232_v7 }
 0x30f   : > { %v5800_v17 = vpop.f32.mrf.mxu1 }
 0x310   : > { %6250 = vst [vmem:[#allocation32_spill] sm:$0xff] %v5800_v17 }
 0x311   : > { %v5802_v1 = vpop.f32.mrf.mxu1 }
 0x312   : > { %6251 = vst [vmem:[#allocation33_spill] sm:$0xff] %v5802_v1  ;;  %v2745_v1 = vadd.f32 %v5633_v29, %v2232_v7 }
 0x313   : > { %v5804_v32 = vpop.f32.mrf.mxu1 }
 0x314   : > { %6252 = vst [vmem:[#allocation34_spill] sm:$0xff] %v5804_v32 }
 0x315   : > { %v5806_v62 = vpop.f32.mrf.mxu1 }
 0x316   : > { %6253 = vst [vmem:[#allocation35_spill] sm:$0xff] %v5806_v62  ;;  %v2749_v62 = vadd.f32 %v5635_v6, %v2237_v19 }
 0x318   : > { %v2931_v20 = vpop.f32.mrf.mxu1 }
 0x319   : > { %v2932_v54 = vadd.f32 %v2931_v20, %v2739_v26  ;;  %v2751_v20 = vadd.f32 %v5637_v4, %v2237_v19 }
 0x31a   : > { %v2933_v27 = vpop.f32.mrf.mxu1 }
 0x31b   : > { %v3090_v8 = vmul.f32 0.5, %v2932_v54  ;;  %v2934_v17 = vadd.f32 %v2933_v27, %v2741_v60  ;;  %v2753_v27 = vadd.f32 %v5639_v5, %v2242_v2 }
 0x31c   : > { %v2935_v61 = vpop.f32.mrf.mxu1 }
 0x31d   : > { %v3091_v63 = vmul.f32 0.5, %v2934_v17  ;;  %v2936_v32 = vadd.f32 %v2935_v61, %v2743_v0  ;;  %4131 = vtanh.f32 %v3090_v8  ;;  %v2755_v8 = vadd.f32 %v5647_v16, %v2242_v2 }
 0x31e   : > { %v2937_v31 = vpop.f32.mrf.mxu1  ;;  %v2763_v17 = vadd.f32 %v5653_v49, %v2252_v3 }
 0x31f   : > { %v3092_v28 = vmul.f32 0.5, %v2936_v32  ;;  %v2938_v33 = vadd.f32 %v2937_v31, %v2745_v1  ;;  %4133 = vtanh.f32 %v3091_v63  ;;  %v2759_v63 = vadd.f32 %v5649_v57, %v2247_v30 }
 0x320   : > { %v2941_v40 = vpop.f32.mrf.mxu1  ;;  %v2765_v57 = vadd.f32 %v5661_v50, %v2252_v3 }
 0x321   : > { %4135 = vtanh.f32 %v3092_v28  ;;  %v3093_v26 = vmul.f32 0.5, %v2938_v33  ;;  %v2942_v47 = vadd.f32 %v2941_v40, %v2749_v62  ;;  %v2761_v62 = vadd.f32 %v5651_v9, %v2247_v30  ;;  %v5819_v40 = vpop.permute.xlu0 %2376 }
 0x322   : > { %v2943_v14 = vpop.f32.mrf.mxu1 }
 0x323   : > { %4137 = vtanh.f32 %v3093_v26  ;;  %v3094_v29 = vmul.f32 0.5, %v2942_v47  ;;  %v2944_v7 = vadd.f32 %v2943_v14, %v2751_v20  ;;  %v5822_v14 = vpop.permute.xlu1 %2381 }
 0x324   : > { %v2945_v61 = vpop.f32.mrf.mxu1 }
 0x325   : > { %v3095_v0 = vmul.f32 0.5, %v2944_v7  ;;  %v2946_v6 = vadd.f32 %v2945_v61, %v2753_v27  ;;  %4139 = vtanh.f32 %v3094_v29  ;;  %v2769_v27 = vadd.f32 %v5663_v37, %v5784_v13 }
 0x326   : > { %v2947_v31 = vpop.f32.mrf.mxu1 }
 0x327   : > { %v3096_v32 = vmul.f32 0.5, %v2946_v6  ;;  %v2948_v4 = vadd.f32 %v2947_v31, %v2755_v8  ;;  %4141 = vtanh.f32 %v3095_v0 }
 0x328   : > { %v2951_v33 = vpop.f32.mrf.mxu1 }
 0x329   : > { %4143 = vtanh.f32 %v3096_v32  ;;  %v3097_v5 = vmul.f32 0.5, %v2948_v4  ;;  %v2952_v1 = vadd.f32 %v2951_v33, %v2759_v63  ;;  %v2771_v63 = vadd.f32 %v5665_v15, %v5784_v13  ;;  %v5832_v33 = vpop.permute.xlu0 %2366 }
 0x32a   : > { %v2953_v19 = vpop.f32.mrf.mxu1  ;;  %v4132_v60 = vpop.eup %4131 }
 0x32b   : > { %4145 = vtanh.f32 %v3097_v5  ;;  %v3098_v54 = vmul.f32 0.5, %v2952_v1  ;;  %v2954_v16 = vadd.f32 %v2953_v19, %v2761_v62  ;;  %v3218_v47 = vmul.f32 0.5, %v4132_v60 }
 0x32c   : > { %v2955_v2 = vpop.f32.mrf.mxu1  ;;  %v4134_v28 = vpop.eup %4133  ;;  %v2773_v62 = vadd.f32 %v5667_v39, %v5790_v24 }
 0x32d   : > { %v3099_v20 = vmul.f32 0.5, %v2954_v16  ;;  %4147 = vtanh.f32 %v3098_v54  ;;  %v2956_v9 = vadd.f32 %v2955_v2, %v2763_v17  ;;  %v3219_v61 = vmul.f32 0.5, %v4134_v28  ;;  %v5842_v16 = vpop.permute.xlu1 %2371 }
 0x32e   : > { %v4136_v26 = vpop.eup %4135  ;;  %v2957_v30 = vpop.f32.mrf.mxu1  ;;  %v5830_v32 = vadd.f32 0.5, %v3218_v47  ;;  %v2775_v17 = vadd.f32 %v5675_v51, %v5790_v24 }
 0x32f   : > { %v3220_v29 = vmul.f32 0.5, %v4136_v26  ;;  %4149 = vtanh.f32 %v3099_v20  ;;  %v2958_v49 = vadd.f32 %v2957_v30, %v2765_v57  ;;  %v3100_v8 = vmul.f32 0.5, %v2956_v9 }
 0x330   : > { %v4138_v7 = vpop.eup %4137  ;;  %v2961_v0 = vpop.f32.mrf.mxu1  ;;  %v5838_v19 = vadd.f32 0.5, %v3219_v61 }
 0x331   : > { %v5826_v6 = vadd.f32 0.5, %v3220_v29  ;;  %v3221_v50 = vmul.f32 0.5, %v4138_v7  ;;  %v3101_v3 = vmul.f32 0.5, %v2958_v49  ;;  %v2962_v31 = vadd.f32 %v2961_v0, %v2769_v27  ;;  %v5852_v7 = vpop.permute.xlu0 %2356 }
 0x332   : > { %4151 = vtanh.f32 %v3100_v8  ;;  %v2963_v4 = vpop.f32.mrf.mxu1  ;;  %v4140_v37 = vpop.eup %4139  ;;  %v2779_v29 = vadd.f32 %v5677_v42, %v5774_v58  ;;  %v2781_v49 = vadd.f32 %v5679_v44, %v5774_v58  ;;  %v2783_v42 = vadd.f32 %v5681_v35, %v5780_v48 }
 0x333   : > { %v5836_v5 = vadd.f32 0.5, %v3221_v50  ;;  %4153 = vtanh.f32 %v3101_v3  ;;  %v3102_v1 = vmul.f32 0.5, %v2962_v31  ;;  %v2964_v60 = vadd.f32 %v2963_v4, %v2771_v63  ;;  %v5858_v4 = vpop.permute.xlu1 %2361 }
 0x334   : > { %v2965_v54 = vpop.f32.mrf.mxu1  ;;  %v4142_v13 = vpop.eup %4141  ;;  %v3222_v28 = vmul.f32 0.5, %v4140_v37 }
 0x335   : > { %4155 = vtanh.f32 %v3102_v1  ;;  %v2966_v2 = vadd.f32 %v2965_v54, %v2773_v62  ;;  %v3103_v57 = vmul.f32 0.5, %v2964_v60  ;;  %v3223_v51 = vmul.f32 0.5, %v4142_v13 }
 0x336   : > { %v4144_v39 = vpop.eup %4143  ;;  %v2967_v20 = vpop.f32.mrf.mxu1  ;;  %v5856_v50 = vadd.f32 0.5, %v3222_v28  ;;  %v2785_v13 = vadd.f32 %v5689_v22, %v5780_v48 }
 0x337   : > { %v3224_v47 = vmul.f32 0.5, %v4144_v39  ;;  %v3104_v9 = vmul.f32 0.5, %v2966_v2  ;;  %v2968_v30 = vadd.f32 %v2967_v20, %v2775_v17  ;;  %4157 = vtanh.f32 %v3103_v57  ;;  %v5872_v20 = vpop.permute.xlu0 %2346  ;;  %v5876_v48 = vpop.permute.xlu1 %2351 }
 0x338   : > { %v4146_v27 = vpop.eup %4145  ;;  %v2971_v24 = vpop.f32.mrf.mxu1  ;;  %v5864_v62 = vadd.f32 0.5, %v3223_v51 }
 0x339   : > { %v5854_v61 = vadd.f32 0.5, %v3224_v47  ;;  %v3225_v8 = vmul.f32 0.5, %v4146_v27  ;;  %4159 = vtanh.f32 %v3104_v9  ;;  %v3105_v0 = vmul.f32 0.5, %v2968_v30 }
 0x33a   : > { %v2972_v3 = vadd.f32 %v2971_v24, %v2779_v29  ;;  %v2973_v31 = vpop.f32.mrf.mxu1  ;;  %v4148_v63 = vpop.eup %4147  ;;  %v2789_v47 = vadd.f32 %v5691_v18, %v5764_v52  ;;  %v2793_v18 = vadd.f32 %v5695_v59, %v5770_v53  ;;  %v2795_v59 = vadd.f32 %v5703_v12, %v5770_v53 }
 0x33b   : > { %v5862_v44 = vadd.f32 0.5, %v3225_v8  ;;  %4161 = vtanh.f32 %v3105_v0  ;;  %v2974_v58 = vadd.f32 %v2973_v31, %v2781_v49  ;;  %v3226_v39 = vmul.f32 0.5, %v4148_v63 }
 0x33c   : > { %v4150_v37 = vpop.eup %4149  ;;  %v3106_v1 = vmul.f32 0.5, %v2972_v3  ;;  %v2975_v60 = vpop.f32.mrf.mxu1  ;;  %v2791_v3 = vadd.f32 %v5693_v43, %v5764_v52  ;;  %v2799_v12 = vadd.f32 %v5705_v41, %v5754_v10  ;;  %v2801_v53 = vadd.f32 %v5707_v11, %v5754_v10  ;;  %v5915_v41 = vld.sshfl [vmem:[%s6190_s5] sm:$0x11 pattern:$0x75316420] }
 0x33d   : > { %v3107_v17 = vmul.f32 0.5, %v2974_v58  ;;  %v2976_v2 = vadd.f32 %v2975_v60, %v2783_v42  ;;  %v3227_v9 = vmul.f32 0.5, %v4150_v37  ;;  %v5882_v31 = vadd.f32 0.5, %v3226_v39  ;;  %6254 = vst [vmem:[#allocation36_spill] sm:$0xff] %v5915_v41  ;;  %v6257_v43 = vld [vmem:[#allocation7_spill] sm:$0xff] }
 0x33e   : > { %4163 = vtanh.f32 %v3106_v1  ;;  %v2977_v35 = vpop.f32.mrf.mxu1 }
 0x33f   : > { %v4152_v57 = vpop.eup %4151  ;;  %v3108_v30 = vmul.f32 0.5, %v2976_v2  ;;  %v2978_v27 = vadd.f32 %v2977_v35, %v2785_v13  ;;  %4165 = vtanh.f32 %v3107_v17  ;;  %v5886_v58 = vadd.f32 0.5, %v3227_v9  ;;  %v5892_v2 = vpop.permute.xlu0 %2336 }
 0x340   : > { %v4154_v29 = vpop.eup %4153  ;;  %v3228_v49 = vmul.f32 0.5, %v4152_v57  ;;  %v2981_v22 = vpop.f32.mrf.mxu1 }
 0x341   : > { %v3229_v51 = vmul.f32 0.5, %v4154_v29  ;;  %4167 = vtanh.f32 %v3108_v30  ;;  %v3109_v24 = vmul.f32 0.5, %v2978_v27  ;;  %v2982_v8 = vadd.f32 %v2981_v22, %v2789_v47  ;;  %v5898_v27 = vpop.permute.xlu1 %2341 }
 0x342   : > { %v4156_v0 = vpop.eup %4155  ;;  %v5884_v63 = vadd.f32 0.5, %v3228_v49  ;;  %v2983_v42 = vpop.f32.mrf.mxu1 }
 0x343   : > { %v5888_v37 = vadd.f32 0.5, %v3229_v51  ;;  %4169 = vtanh.f32 %v3109_v24  ;;  %v3110_v1 = vmul.f32 0.5, %v2982_v8  ;;  %v3230_v60 = vmul.f32 0.5, %v4156_v0 }
 0x344   : > { %v2984_v13 = vadd.f32 %v2983_v42, %v2791_v3  ;;  %v2985_v17 = vpop.f32.mrf.mxu1  ;;  %v4158_v52 = vpop.eup %4157  ;;  %v4288_v51 = vmov 1966171168  }
 0x345   : > { %4171 = vtanh.f32 %v3110_v1  ;;  %v2986_v39 = vadd.f32 %v2985_v17, %v2793_v18  ;;  %v3231_v47 = vmul.f32 0.5, %v4158_v52  ;;  %v3399_v24 = vunpack.c.l.s4 %v4288_v51  ;;  %v5928_v51 = vpop.permute.xlu1 %2331 }
 0x346   : > { %v4160_v57 = vpop.eup %4159  ;;  %v3111_v9 = vmul.f32 0.5, %v2984_v13  ;;  %v2987_v30 = vpop.f32.mrf.mxu1  ;;  %v5904_v0 = vadd.f32 0.5, %v3230_v60  ;;  %v2803_v13 = vadd.f32 %v5709_v56, %v5760_v21 }
 0x347   : > { %v3232_v29 = vmul.f32 0.5, %v4160_v57  ;;  %v3112_v49 = vmul.f32 0.5, %v2986_v39  ;;  %v2988_v22 = vadd.f32 %v2987_v30, %v2795_v59  ;;  %v5910_v17 = vadd.f32 0.5, %v3231_v47  ;;  %v5917_v60 = vpop.permute.xlu0 %2326 }
 0x348   : > { %v4162_v8 = vpop.eup %4161  ;;  %4173 = vtanh.f32 %v3111_v9  ;;  %v2991_v3 = vpop.f32.mrf.mxu1  ;;  %v3400_v11 = vunpack.c.0.s8 %v3399_v24  ;;  %v3397_v30 = vcombine.high %v5915_v41, %v5915_v41 }
 0x349   : > { %v5906_v18 = vadd.f32 0.5, %v3232_v29  ;;  %v3233_v42 = vmul.f32 0.5, %v4162_v8  ;;  %4175 = vtanh.f32 %v3112_v49  ;;  %v3113_v1 = vmul.f32 0.5, %v2988_v22  ;;  %v6255_v29 = vld [vmem:[#allocation4_spill] sm:$0xff]  ;;  %v5945_v28 = vpop.permute.xlu1 %2321 }
 0x34a   : > { %v2992_v52 = vadd.f32 %v2991_v3, %v2799_v12  ;;  %v2993_v59 = vpop.f32.mrf.mxu1  ;;  %v5926_v49 = vsub.s32 %v3400_v11, %v6255_v29  ;;  %v2805_v3 = vadd.f32 %v5714_v46, %v5760_v21 }
 0x34b   : > { %v4164_v10 = vpop.eup %4163  ;;  %v5919_v39 = vadd.f32 0.5, %v3233_v42  ;;  %4177 = vtanh.f32 %v3113_v1  ;;  %v2994_v57 = vadd.f32 %v2993_v59, %v2801_v53  ;;  %v2809_v59 = vadd.f32 %v5716_v25, %v5744_v36  ;;  %v5939_v46 = vpop.permute.xlu0 %2316 }
 0x34c   : > { %v3114_v47 = vmul.f32 0.5, %v2992_v52  ;;  %v2995_v9 = vpop.f32.mrf.mxu1  ;;  %6256 = vst [vmem:[#allocation37_spill] sm:$0xff] %v5926_v49  ;;  %v4166_v22 = vpop.eup %4165  ;;  %v3234_v42 = vmul.f32 0.5, %v4164_v10  ;;  %v3411_v52 = vrot.slane %v3397_v30, %v5926_v49 }
 0x34d   : > { %v3115_v24 = vmul.f32 0.5, %v2994_v57  ;;  %v2996_v8 = vadd.f32 %v2995_v9, %v2803_v13  ;;  %v2811_v13 = vadd.f32 %v5718_v23, %v5744_v36  ;;  %v3235_v57 = vmul.f32 0.5, %v4166_v22 }
 0x34e   : > { %v4168_v53 = vpop.eup %4167  ;;  %4179 = vtanh.f32 %v3114_v47  ;;  %v2997_v1 = vpop.f32.mrf.mxu1  ;;  %3446 = vmatprep.mubr.bf16.mxu0 %v3411_v52  ;;  %v5943_v25 = vadd.f32 0.5, %v3234_v42  ;;  %v2813_v23 = vadd.f32 %v5720_v45, %v5750_v55  ;;  %v2815_v42 = vadd.f32 %v5722_v38, %v5750_v55 }
 0x34f   : > { %v3236_v11 = vmul.f32 0.5, %v4168_v53  ;;  %v3116_v15 = vmul.f32 0.5, %v2996_v8  ;;  %4181 = vtanh.f32 %v3115_v24  ;;  %v2998_v9 = vadd.f32 %v2997_v1, %v2805_v3  ;;  %v2312_v55 = vpop.permute.xlu1 %2311 }
 0x350   : > { %v4170_v26 = vpop.eup %4169  ;;  %v3001_v54 = vpop.f32.mrf.mxu1  ;;  %v5951_v3 = vadd.f32 0.5, %v3235_v57 }
 0x351   : > { %v5941_v21 = vadd.f32 0.5, %v3236_v11  ;;  %v3237_v10 = vmul.f32 0.5, %v4170_v26  ;;  %4183 = vtanh.f32 %v3116_v15  ;;  %v3002_v47 = vadd.f32 %v3001_v54, %v2809_v59  ;;  %v2307_v57 = vpop.permute.xlu0 %2306 }
 0x352   : > { %v4172_v30 = vpop.eup %4171  ;;  %v3117_v8 = vmul.f32 0.5, %v2998_v9  ;;  %v3003_v53 = vpop.f32.mrf.mxu1  ;;  %v2821_v35 = vadd.f32 %v6257_v43, %v2307_v57 }
 0x353   : > { %v5949_v36 = vadd.f32 0.5, %v3237_v10  ;;  %v3118_v22 = vmul.f32 0.5, %v3002_v47  ;;  %v3004_v24 = vadd.f32 %v3003_v53, %v2811_v13  ;;  %v3238_v1 = vmul.f32 0.5, %v4172_v30 }
 0x354   : > { %4185 = vtanh.f32 %v3117_v8  ;;  %v3005_v15 = vpop.f32.mrf.mxu1  ;;  %v2819_v53 = vadd.f32 %v5724_v34, %v2307_v57 }
 0x355   : > { %v4174_v54 = vpop.eup %4173  ;;  %v3119_v52 = vmul.f32 0.5, %v3004_v24  ;;  %v3006_v59 = vadd.f32 %v3005_v15, %v2813_v23  ;;  %4187 = vtanh.f32 %v3118_v22  ;;  %v5961_v56 = vadd.f32 0.5, %v3238_v1  ;;  %v6258_v15 = vld [vmem:[#allocation5_spill] sm:$0xff] }
 0x356   : > { %v4176_v11 = vpop.eup %4175  ;;  %v3239_v45 = vmul.f32 0.5, %v4174_v54  ;;  %v3007_v9 = vpop.f32.mrf.mxu1  ;;  %v2823_v54 = vadd.f32 %v6258_v15, %v2312_v55 }
 0x357   : > { %v3240_v10 = vmul.f32 0.5, %v4176_v11  ;;  %v3120_v47 = vmul.f32 0.5, %v3006_v59  ;;  %v3008_v30 = vadd.f32 %v3007_v9, %v2815_v42  ;;  %4189 = vtanh.f32 %v3119_v52 }
 0x358   : > { %v4178_v8 = vpop.eup %4177  ;;  %v3011_v38 = vpop.f32.mrf.mxu1  ;;  %v5966_v11 = vadd.f32 0.5, %v3239_v45 }
 0x359   : > { %v5963_v23 = vadd.f32 0.5, %v3240_v10  ;;  %v3241_v22 = vmul.f32 0.5, %v4178_v8  ;;  %4191 = vtanh.f32 %v3120_v47  ;;  %v3121_v24 = vmul.f32 0.5, %v3008_v30 }
 0x35a   : > { %v3012_v42 = vadd.f32 %v3011_v38, %v2819_v53  ;;  %v3013_v59 = vpop.f32.mrf.mxu1  ;;  %v6259_v53 = vld [vmem:[#allocation6_spill] sm:$0xff] }
 0x35b   : > { %v4180_v9 = vpop.eup %4179  ;;  %v5968_v34 = vadd.f32 0.5, %v3241_v22  ;;  %4193 = vtanh.f32 %v3121_v24  ;;  %v3014_v43 = vadd.f32 %v3013_v59, %v2821_v35  ;;  %v2825_v38 = vadd.f32 %v6259_v53, %v2312_v55  ;;  %v6260_v24 = vld [vmem:[#allocation8_spill] sm:$0xff] }
 0x35c   : > { %v3122_v52 = vmul.f32 0.5, %v3012_v42  ;;  %v3015_v57 = vpop.f32.mrf.mxu1  ;;  %v4182_v10 = vpop.eup %4181  ;;  %v3242_v8 = vmul.f32 0.5, %v4180_v9  ;;  %v2829_v35 = vadd.f32 %v6260_v24, %v5939_v46  ;;  %v6261_v42 = vld [vmem:[#allocation9_spill] sm:$0xff] }
 0x35d   : > { %v3123_v47 = vmul.f32 0.5, %v3014_v43  ;;  %v3016_v30 = vadd.f32 %v3015_v57, %v2823_v54  ;;  %v2831_v26 = vadd.f32 %v6261_v42, %v5939_v46  ;;  %v3243_v13 = vmul.f32 0.5, %v4182_v10  ;;  %v6262_v10 = vld [vmem:[#allocation10_spill] sm:$0xff]  ;;  %v6265_v46 = vld [vmem:[#allocation13_spill] sm:$0xff] }
 0x35e   : > { %v4184_v15 = vpop.eup %4183  ;;  %4195 = vtanh.f32 %v3122_v52  ;;  %v3017_v22 = vpop.f32.mrf.mxu1  ;;  %v5979_v57 = vadd.f32 0.5, %v3242_v8  ;;  %v2841_v29 = vadd.f32 %v6265_v46, %v5917_v60 }
 0x35f   : > { %v3244_v59 = vmul.f32 0.5, %v4184_v15  ;;  %v3124_v12 = vmul.f32 0.5, %v3016_v30  ;;  %4197 = vtanh.f32 %v3123_v47  ;;  %v3018_v9 = vadd.f32 %v3017_v22, %v2825_v38 }
 0x360   : > { %v3021_v54 = vpop.f32.mrf.mxu1  ;;  %v2833_v47 = vadd.f32 %v6262_v10, %v5945_v28  ;;  %v5987_v38 = vadd.f32 0.5, %v3243_v13  ;;  %v6264_v13 = vld [vmem:[#allocation12_spill] sm:$0xff] }
 0x361   : > { %v4186_v43 = vpop.eup %4185  ;;  %v5981_v1 = vadd.f32 0.5, %v3244_v59  ;;  %4199 = vtanh.f32 %v3124_v12  ;;  %v3022_v55 = vadd.f32 %v3021_v54, %v2829_v35  ;;  %v3125_v53 = vmul.f32 0.5, %v3018_v9  ;;  %v6263_v35 = vld [vmem:[#allocation11_spill] sm:$0xff] }
 0x362   : > { %v3245_v52 = vmul.f32 0.5, %v4186_v43  ;;  %v3023_v45 = vpop.f32.mrf.mxu1  ;;  %v4188_v24 = vpop.eup %4187  ;;  %v2835_v59 = vadd.f32 %v6263_v35, %v5945_v28  ;;  %v6266_v35 = vld [vmem:[#allocation14_spill] sm:$0xff] }
 0x363   : > { %v3126_v15 = vmul.f32 0.5, %v3022_v55  ;;  %v3024_v30 = vadd.f32 %v3023_v45, %v2831_v26  ;;  %4201 = vtanh.f32 %v3125_v53  ;;  %v3246_v54 = vmul.f32 0.5, %v4188_v24 }
 0x364   : > { %v5989_v8 = vadd.f32 0.5, %v3245_v52  ;;  %v3025_v22 = vpop.f32.mrf.mxu1  ;;  %v4190_v12 = vpop.eup %4189  ;;  %v2839_v55 = vadd.f32 %v6264_v13, %v5917_v60 }
 0x365   : > { %v3127_v42 = vmul.f32 0.5, %v3024_v30  ;;  %4203 = vtanh.f32 %v3126_v15  ;;  %v3026_v26 = vadd.f32 %v3025_v22, %v2833_v47  ;;  %v3247_v41 = vmul.f32 0.5, %v4190_v12 }
 0x366   : > { %v4192_v9 = vpop.eup %4191  ;;  %v3027_v45 = vpop.f32.mrf.mxu1  ;;  %v3359_v43 = vpack.c.bf16 %v5989_v8, %v5987_v38  ;;  %v2843_v38 = vadd.f32 %v6266_v35, %v5928_v51  ;;  %v3310_v8 = vadd.f32 0.5, %v3246_v54  ;;  %v6268_v35 = vld [vmem:[#allocation16_spill] sm:$0xff] }
 0x367   : > { %v3248_v52 = vmul.f32 0.5, %v4192_v9  ;;  %v3028_v10 = vadd.f32 %v3027_v45, %v2835_v59  ;;  %4205 = vtanh.f32 %v3127_v42  ;;  %v3128_v28 = vmul.f32 0.5, %v3026_v26 }
 0x368   : > { %v4194_v53 = vpop.eup %4193  ;;  %v3031_v30 = vpop.f32.mrf.mxu1  ;;  %v3311_v60 = vadd.f32 0.5, %v3247_v41  ;;  %v6269_v41 = vld [vmem:[#allocation17_spill] sm:$0xff] }
 0x369   : > { %v3312_v24 = vadd.f32 0.5, %v3248_v52  ;;  %v3249_v15 = vmul.f32 0.5, %v4194_v53  ;;  %v3129_v47 = vmul.f32 0.5, %v3028_v10  ;;  %v3032_v22 = vadd.f32 %v3031_v30, %v2839_v55  ;;  %v6267_v55 = vld [vmem:[#allocation15_spill] sm:$0xff] }
 0x36a   : > { %4207 = vtanh.f32 %v3128_v28  ;;  %v3033_v13 = vpop.f32.mrf.mxu1  ;;  %v2845_v30 = vadd.f32 %v6267_v55, %v5928_v51 }
 0x36b   : > { %v4196_v9 = vpop.eup %4195  ;;  %v3313_v59 = vadd.f32 0.5, %v3249_v15  ;;  %4209 = vtanh.f32 %v3129_v47  ;;  %v3130_v45 = vmul.f32 0.5, %v3032_v22  ;;  %v3034_v49 = vadd.f32 %v3033_v13, %v2841_v29 }
 0x36c   : > { %v3035_v46 = vpop.f32.mrf.mxu1  ;;  %v3360_v12 = vpack.c.bf16 %v3312_v24, %v3310_v8  ;;  %v4198_v42 = vpop.eup %4197  ;;  %v3250_v26 = vmul.f32 0.5, %v4196_v9  ;;  %v2849_v15 = vadd.f32 %v6268_v35, %v5892_v2  ;;  %v2851_v29 = vadd.f32 %v6269_v41, %v5892_v2 }
 0x36d   : > { %v3131_v52 = vmul.f32 0.5, %v3034_v49  ;;  %v3036_v53 = vadd.f32 %v3035_v46, %v2843_v38  ;;  %4211 = vtanh.f32 %v3130_v45  ;;  %v3361_v28 = vpack.c.bf16 %v3313_v59, %v3311_v60 }
 0x36e   : > { %v4200_v10 = vpop.eup %4199  ;;  %v3037_v54 = vpop.f32.mrf.mxu1  ;;  %v3251_v24 = vmul.f32 0.5, %v4198_v42  ;;  %v6007_v13 = vadd.f32 0.5, %v3250_v26  ;;  %v6272_v35 = vpack.c.bf16 %v5981_v1, %v5979_v57 }
 0x36f   : > { %v3252_v47 = vmul.f32 0.5, %v4200_v10  ;;  %v3132_v22 = vmul.f32 0.5, %v3036_v53  ;;  %4213 = vtanh.f32 %v3131_v52  ;;  %v3038_v8 = vadd.f32 %v3037_v54, %v2845_v30  ;;  %3414 = vmatprep.subr.bf16.mxu0 %v3361_v28  ;;  %v6270_v52 = vld [vmem:[#allocation18_spill] sm:$0xff]  ;;  %v6271_v54 = vld [vmem:[#allocation19_spill] sm:$0xff] }
 0x370   : > { %v3041_v49 = vpop.f32.mrf.mxu1  ;;  %v4202_v38 = vpop.eup %4201  ;;  %3415 = vmatpush1.bf16.msra.mxu0 %v3360_v12  ;;  %v2853_v10 = vadd.f32 %v6270_v52, %v5898_v27  ;;  %v6015_v26 = vadd.f32 0.5, %v3251_v24 }
 0x371   : > { %v6009_v51 = vadd.f32 0.5, %v3252_v47  ;;  %4215 = vtanh.f32 %v3132_v22  ;;  %v3042_v9 = vadd.f32 %v3041_v49, %v2849_v15  ;;  %v3253_v59 = vmul.f32 0.5, %v4202_v38  ;;  %3416 = vmatprep.subr.bf16.mxu0 %v3359_v43 }
 0x372   : > { %v3133_v45 = vmul.f32 0.5, %v3038_v8  ;;  %v3043_v60 = vpop.f32.mrf.mxu1  ;;  %v4204_v46 = vpop.eup %4203  ;;  %v2855_v43 = vadd.f32 %v6271_v54, %v5898_v27  ;;  %v6273_v22 = vpack.c.bf16 %v5968_v34, %v5966_v11  ;;  %v6274_v8 = vld [vmem:[#allocation20_spill] sm:$0xff]  ;;  %v6275_v11 = vpack.c.bf16 %v5963_v23, %v5961_v56  ;;  %v6276_v34 = vld [vmem:[#allocation21_spill] sm:$0xff]  ;;  %v6278_v54 = vld [vmem:[#allocation22_spill] sm:$0xff] }
 0x373   : > { %v3134_v53 = vmul.f32 0.5, %v3042_v9  ;;  %v3044_v2 = vadd.f32 %v3043_v60, %v2851_v29  ;;  %v3362_v42 = vpack.c.bf16 %v6009_v51, %v6007_v13  ;;  %v6017_v55 = vadd.f32 0.5, %v3253_v59 }
 0x374   : > { %4217 = vtanh.f32 %v3133_v45  ;;  %v3045_v30 = vpop.f32.mrf.mxu1  ;;  %v4206_v12 = vpop.eup %4205  ;;  %3417 = vmatpush1.bf16.msra.mxu0 %v6272_v35  ;;  %v3254_v15 = vmul.f32 0.5, %v4204_v46  ;;  %v2859_v27 = vadd.f32 %v6274_v8, %v5872_v20 }
 0x375   : > { %v3135_v28 = vmul.f32 0.5, %v3044_v2  ;;  %4219 = vtanh.f32 %v3134_v53  ;;  %v3046_v47 = vadd.f32 %v3045_v30, %v2853_v10  ;;  %3418 = vmatprep.subr.bf16.mxu0 %v6273_v22  ;;  %v3363_v29 = vpack.c.bf16 %v6017_v55, %v6015_v26 }
 0x376   : > { %v3047_v41 = vpop.f32.mrf.mxu1  ;;  %v3255_v1 = vmul.f32 0.5, %v4206_v12  ;;  %v2861_v53 = vadd.f32 %v6276_v34, %v5872_v20  ;;  %v6036_v2 = vadd.f32 0.5, %v3254_v15  ;;  %v6277_v10 = vpack.c.bf16 %v5949_v36, %v5951_v3  ;;  %v6279_v36 = vld [vmem:[#allocation23_spill] sm:$0xff] }
 0x377   : > { %v4208_v24 = vpop.eup %4207  ;;  %4221 = vtanh.f32 %v3135_v28  ;;  %v3048_v49 = vadd.f32 %v3047_v41, %v2855_v43  ;;  %v3136_v9 = vmul.f32 0.5, %v3046_v47  ;;  %v2863_v43 = vadd.f32 %v6278_v54, %v5876_v48 }
 0x378   : > { %v4210_v38 = vpop.eup %4209  ;;  %v3256_v57 = vmul.f32 0.5, %v4208_v24  ;;  %v3051_v59 = vpop.f32.mrf.mxu1  ;;  %3419 = vmatpush1.bf16.msra.mxu0 %v6275_v11  ;;  %v6047_v23 = vadd.f32 0.5, %v3255_v1  ;;  %v2865_v3 = vadd.f32 %v6279_v36, %v5876_v48  ;;  %v6280_v41 = vpack.c.bf16 %v5941_v21, %v5943_v25  ;;  %v6283_v21 = vld [vmem:[#allocation25_spill] sm:$0xff] }
 0x379   : > { %v3257_v45 = vmul.f32 0.5, %v4210_v38  ;;  %v3137_v60 = vmul.f32 0.5, %v3048_v49  ;;  %v3052_v46 = vadd.f32 %v3051_v59, %v2859_v27  ;;  %4223 = vtanh.f32 %v3136_v9  ;;  %3420 = vmatprep.subr.bf16.mxu0 %v6277_v10 }
 0x37a   : > { %v6038_v52 = vadd.f32 0.5, %v3256_v57  ;;  %v3053_v30 = vpop.f32.mrf.mxu1  ;;  %v4212_v12 = vpop.eup %4211  ;;  %v6281_v49 = vpack.c.bf16 %v5919_v39, %v5910_v17  ;;  %v6282_v57 = vld [vmem:[#allocation24_spill] sm:$0xff]  ;;  %v2871_v25 = vadd.f32 %v6283_v21, %v5852_v7 }
 0x37b   : > { %v6045_v28 = vadd.f32 0.5, %v3257_v45  ;;  %4225 = vtanh.f32 %v3137_v60  ;;  %v3138_v56 = vmul.f32 0.5, %v3052_v46  ;;  %v3054_v20 = vadd.f32 %v3053_v30, %v2861_v53 }
 0x37c   : > { %v3055_v35 = vpop.f32.mrf.mxu1  ;;  %v3364_v15 = vpack.c.bf16 %v6038_v52, %v6036_v2  ;;  %v4214_v47 = vpop.eup %4213  ;;  %3421 = vmatpush1.bf16.msra.mxu0 %v6280_v41  ;;  %v3258_v8 = vmul.f32 0.5, %v4212_v12  ;;  %v2869_v48 = vadd.f32 %v6282_v57, %v5852_v7  ;;  %v6284_v53 = vpack.c.bf16 %v5906_v18, %v5904_v0 }
 0x37d   : > { %v3056_v22 = vadd.f32 %v3055_v35, %v2863_v43  ;;  %4227 = vtanh.f32 %v3138_v56  ;;  %v3139_v27 = vmul.f32 0.5, %v3054_v20  ;;  %3422 = vmatprep.subr.bf16.mxu0 %v6281_v49  ;;  %v3365_v1 = vpack.c.bf16 %v6045_v28, %v6047_v23  ;;  %v6286_v35 = vld [vmem:[#allocation26_spill] sm:$0xff]  ;;  %v6303_v28 = vld [vmem:[#allocation4_spill] sm:$0xff] }
 0x37e   : > { %v4216_v24 = vpop.eup %4215  ;;  %v3057_v38 = vpop.f32.mrf.mxu1  ;;  %v3259_v60 = vmul.f32 0.5, %v4214_v47  ;;  %v6070_v10 = vadd.f32 0.5, %v3258_v8  ;;  %v6285_v12 = vpack.c.bf16 %v5888_v37, %v5886_v58  ;;  %v2873_v47 = vadd.f32 %v6286_v35, %v5858_v4  ;;  %v6287_v58 = vld [vmem:[#allocation27_spill] sm:$0xff] }
 0x37f   : > { %v3260_v9 = vmul.f32 0.5, %v4216_v24  ;;  %v3140_v59 = vmul.f32 0.5, %v3056_v22  ;;  %v3058_v45 = vadd.f32 %v3057_v38, %v2865_v3  ;;  %4229 = vtanh.f32 %v3139_v27 }
 0x380   : > { %v3061_v46 = vpop.f32.mrf.mxu1  ;;  %3423 = vmatpush1.bf16.msra.mxu0 %v6284_v53  ;;  %v6077_v36 = vadd.f32 0.5, %v3259_v60  ;;  %v2875_v37 = vadd.f32 %v6287_v58, %v5858_v4  ;;  %v6288_v41 = vpack.c.bf16 %v5884_v63, %v5882_v31  ;;  %v6289_v27 = vpack.c.bf16 %v5862_v44, %v5864_v62 }
 0x381   : > { %v4218_v11 = vpop.eup %4217  ;;  %v6065_v34 = vadd.f32 0.5, %v3260_v9  ;;  %4231 = vtanh.f32 %v3140_v59  ;;  %v3141_v17 = vmul.f32 0.5, %v3058_v45  ;;  %v3062_v39 = vadd.f32 %v3061_v46, %v2869_v48  ;;  %3424 = vmatprep.subr.bf16.mxu0 %v6285_v12  ;;  %v6290_v48 = vld [vmem:[#allocation28_spill] sm:$0xff] }
 0x382   : > { %v3261_v30 = vmul.f32 0.5, %v4218_v11  ;;  %v3063_v7 = vpop.f32.mrf.mxu1  ;;  %v4220_v54 = vpop.eup %4219  ;;  %v2879_v4 = vadd.f32 %v6290_v48, %v5832_v33  ;;  %v6292_v11 = vpack.c.bf16 %v5854_v61, %v5856_v50  ;;  %v6294_v12 = vpack.c.bf16 %v5836_v5, %v5838_v19  ;;  %v6297_v48 = vld [vmem:[#allocation32_spill] sm:$0xff] }
 0x383   : > { %4233 = vtanh.f32 %v3141_v17  ;;  %v3142_v43 = vmul.f32 0.5, %v3062_v39  ;;  %v3064_v56 = vadd.f32 %v3063_v7, %v2871_v25  ;;  %v3366_v3 = vpack.c.bf16 %v6065_v34, %v6070_v10  ;;  %v6291_v25 = vld [vmem:[#allocation29_spill] sm:$0xff]  ;;  %v6293_v17 = vld [vmem:[#allocation30_spill] sm:$0xff]  ;;  %v3383_v34 = vpop.permute.xlu0 %3382 }
 0x384   : > { %v4222_v20 = vpop.eup %4221  ;;  %v6079_v0 = vadd.f32 0.5, %v3261_v30  ;;  %v3065_v18 = vpop.f32.mrf.mxu1  ;;  %3425 = vmatpush1.bf16.msra.mxu0 %v6288_v41  ;;  %v3262_v24 = vmul.f32 0.5, %v4220_v54  ;;  %v2881_v60 = vadd.f32 %v6291_v25, %v5832_v33  ;;  %v2883_v39 = vadd.f32 %v6293_v17, %v5842_v16 }
 0x385   : > { %v3143_v22 = vmul.f32 0.5, %v3064_v56  ;;  %4235 = vtanh.f32 %v3142_v43  ;;  %v3066_v8 = vadd.f32 %v3065_v18, %v2873_v47  ;;  %3426 = vmatprep.subr.bf16.mxu0 %v6289_v27  ;;  %v3263_v9 = vmul.f32 0.5, %v4222_v20  ;;  %v6295_v47 = vld [vmem:[#allocation31_spill] sm:$0xff] }
 0x386   : > { %v3067_v49 = vpop.f32.mrf.mxu1  ;;  %v3367_v38 = vpack.c.bf16 %v6079_v0, %v6077_v36  ;;  %v4224_v57 = vpop.eup %4223  ;;  %v6102_v53 = vadd.f32 0.5, %v3262_v24  ;;  %v2885_v18 = vadd.f32 %v6295_v47, %v5842_v16  ;;  %v6296_v19 = vpack.c.bf16 %v5826_v6, %v5830_v32 }
 0x387   : > { %4237 = vtanh.f32 %v3143_v22  ;;  %v3068_v59 = vadd.f32 %v3067_v49, %v2875_v37  ;;  %v3264_v63 = vmul.f32 0.5, %v4224_v57  ;;  %v3144_v45 = vmul.f32 0.5, %v3066_v8 }
 0x388   : > { %v4226_v31 = vpop.eup %4225  ;;  %v3071_v21 = vpop.f32.mrf.mxu1  ;;  %3427 = vmatpush1.bf16.msra.mxu0 %v6292_v11  ;;  %v6109_v54 = vadd.f32 0.5, %v3263_v9  ;;  %v2889_v16 = vadd.f32 %v6297_v48, %v5819_v40  ;;  %v6304_v23 = vsub.s32 0, %v6303_v28 }
 0x389   : > { %v3265_v44 = vmul.f32 0.5, %v4226_v31  ;;  %v3145_v62 = vmul.f32 0.5, %v3068_v59  ;;  %v3072_v46 = vadd.f32 %v3071_v21, %v2879_v4  ;;  %v6104_v30 = vadd.f32 0.5, %v3264_v63  ;;  %3428 = vmatprep.subr.bf16.mxu0 %v6294_v12  ;;  %v6298_v4 = vld [vmem:[#allocation33_spill] sm:$0xff] }
 0x38a   : > { %4239 = vtanh.f32 %v3144_v45  ;;  %v3073_v33 = vpop.f32.mrf.mxu1  ;;  %v4228_v7 = vpop.eup %4227  ;;  %v2891_v9 = vadd.f32 %v6298_v4, %v5819_v40 }
 0x38b   : > { %v6111_v43 = vadd.f32 0.5, %v3265_v44  ;;  %4241 = vtanh.f32 %v3145_v62  ;;  %v3146_v61 = vmul.f32 0.5, %v3072_v46  ;;  %v3074_v50 = vadd.f32 %v3073_v33, %v2881_v60  ;;  %v6299_v44 = vld [vmem:[#allocation34_spill] sm:$0xff] }
 0x38c   : > { %v3075_v56 = vpop.f32.mrf.mxu1  ;;  %v3368_v20 = vpack.c.bf16 %v6104_v30, %v6102_v53  ;;  %v4230_v35 = vpop.eup %4229  ;;  %3429 = vmatpush1.bf16.msra.mxu0 %v6296_v19  ;;  %v3266_v22 = vmul.f32 0.5, %v4228_v7  ;;  %v2893_v62 = vadd.f32 %v6299_v44, %v5822_v14  ;;  %v6300_v7 = vld [vmem:[#allocation35_spill] sm:$0xff]  ;;  %v6301_v53 = vld [vmem:[#allocation37_spill] sm:$0xff]  ;;  %v6302_v30 = vld [vmem:[#allocation36_spill] sm:$0xff] }
 0x38d   : > { %4243 = vtanh.f32 %v3146_v61  ;;  %v3076_v5 = vadd.f32 %v3075_v56, %v2883_v39  ;;  %v3369_v58 = vpack.c.bf16 %v6111_v43, %v6109_v54  ;;  %v3147_v41 = vmul.f32 0.5, %v3074_v50 }
 0x38e   : > { %v4232_v37 = vpop.eup %4231  ;;  %v3077_v24 = vpop.f32.mrf.mxu1  ;;  %v3267_v59 = vmul.f32 0.5, %v4230_v35  ;;  %v6128_v45 = vadd.f32 0.5, %v3266_v22  ;;  %v2895_v61 = vadd.f32 %v6300_v7, %v5822_v14  ;;  %v3404_v36 = vrot.slane %v6302_v30, %v6301_v53 }
 0x38f   : > { %v3268_v8 = vmul.f32 0.5, %v4232_v37  ;;  %v3148_v27 = vmul.f32 0.5, %v3076_v5  ;;  %v3078_v49 = vadd.f32 %v3077_v24, %v2885_v18  ;;  %4245 = vtanh.f32 %v3147_v41 }
 0x390   : > { %v4234_v57 = vpop.eup %4233  ;;  %v3081_v6 = vpop.f32.mrf.mxu1  ;;  %v3331_v17 = vadd.f32 0.5, %v3267_v59 }
 0x391   : > { %v6126_v32 = vadd.f32 0.5, %v3268_v8  ;;  %v3269_v31 = vmul.f32 0.5, %v4234_v57  ;;  %4247 = vtanh.f32 %v3148_v27  ;;  %v3149_v63 = vmul.f32 0.5, %v3078_v49 }
 0x392   : > { %v3082_v21 = vadd.f32 %v3081_v6, %v2889_v16  ;;  %v3083_v25 = vpop.f32.mrf.mxu1  ;;  %v4236_v60 = vpop.eup %4235 }
 0x393   : > { %v6132_v46 = vadd.f32 0.5, %v3269_v31  ;;  %4249 = vtanh.f32 %v3149_v63  ;;  %v3084_v40 = vadd.f32 %v3083_v25, %v2891_v9  ;;  %v3370_v33 = vpack.c.bf16 %v6126_v32, %v6128_v45 }
 0x394   : > { %v4238_v11 = vpop.eup %4237  ;;  %v3150_v39 = vmul.f32 0.5, %v3082_v21  ;;  %v3085_v12 = vpop.f32.mrf.mxu1  ;;  %v3270_v35 = vmul.f32 0.5, %v4236_v60 }
 0x395   : > { %v3151_v50 = vmul.f32 0.5, %v3084_v40  ;;  %v3086_v56 = vadd.f32 %v3085_v12, %v2893_v62  ;;  %v3371_v18 = vpack.c.bf16 %v6132_v46, %v3331_v17  ;;  %v3271_v19 = vmul.f32 0.5, %v4238_v11 }
 0x396   : > { %4251 = vtanh.f32 %v3150_v39  ;;  %v3087_v47 = vpop.f32.mrf.mxu1  ;;  %v3334_v57 = vadd.f32 0.5, %v3270_v35 }
 0x397   : > { %v4240_v5 = vpop.eup %4239  ;;  %4253 = vtanh.f32 %v3151_v50  ;;  %v3152_v37 = vmul.f32 0.5, %v3086_v56  ;;  %v3088_v22 = vadd.f32 %v3087_v47, %v2895_v61  ;;  %v3335_v48 = vadd.f32 0.5, %v3271_v19 }
 0x398   : > { %v4242_v41 = vpop.eup %4241  ;;  %v3272_v24 = vmul.f32 0.5, %v4240_v5 }
 0x399   : > { %v3273_v8 = vmul.f32 0.5, %v4242_v41  ;;  %4255 = vtanh.f32 %v3152_v37  ;;  %v3153_v27 = vmul.f32 0.5, %v3088_v22 }
 0x39a   : > { %v4244_v49 = vpop.eup %4243  ;;  %v3336_v14 = vadd.f32 0.5, %v3272_v24 }
 0x39b   : > { %v3337_v16 = vadd.f32 0.5, %v3273_v8  ;;  %4257 = vtanh.f32 %v3153_v27  ;;  %v3274_v59 = vmul.f32 0.5, %v4244_v49 }
 0x39c   : > { %v3372_v4 = vpack.c.bf16 %v3336_v14, %v3334_v57  ;;  %v4246_v9 = vpop.eup %4245 }
 0x39d   : > { %v3373_v6 = vpack.c.bf16 %v3337_v16, %v3335_v48  ;;  %v3275_v31 = vmul.f32 0.5, %v4246_v9  ;;  %v3338_v21 = vadd.f32 0.5, %v3274_v59 }
 0x39e   : > { %v4248_v32 = vpop.eup %4247 }
 0x39f   : > { %v3276_v63 = vmul.f32 0.5, %v4248_v32  ;;  %v3339_v62 = vadd.f32 0.5, %v3275_v31 }
 0x3a0   : > { %v4250_v45 = vpop.eup %4249 }
 0x3a1   : > { %v3340_v25 = vadd.f32 0.5, %v3276_v63  ;;  %v3277_v60 = vmul.f32 0.5, %v4250_v45 }
 0x3a3   : > { %v4252_v44 = vpop.eup %4251  ;;  %v3341_v46 = vadd.f32 0.5, %v3277_v60  ;;  %v3374_v40 = vpack.c.bf16 %v3340_v25, %v3338_v21 }
 0x3a4   : > { %v4254_v11 = vpop.eup %4253  ;;  %v3278_v17 = vmul.f32 0.5, %v4252_v44 }
 0x3a5   : > { %v3375_v39 = vpack.c.bf16 %v3341_v46, %v3339_v62  ;;  %v3279_v7 = vmul.f32 0.5, %v4254_v11 }
 0x3a6   : > { %v4256_v12 = vpop.eup %4255  ;;  %v3342_v56 = vadd.f32 0.5, %v3278_v17 }
 0x3a7   : > { %v3280_v61 = vmul.f32 0.5, %v4256_v12  ;;  %v3343_v5 = vadd.f32 0.5, %v3279_v7 }
 0x3a8   : > { %v4258_v50 = vpop.eup %4257 }
 0x3a9   : > { %v3344_v35 = vadd.f32 0.5, %v3280_v61  ;;  %v3281_v47 = vmul.f32 0.5, %v4258_v50 }
 0x3ab   : > { %v3345_v19 = vadd.f32 0.5, %v3281_v47  ;;  %v3376_v37 = vpack.c.bf16 %v3344_v35, %v3342_v56 }
 0x3ad   : > { %v3377_v22 = vpack.c.bf16 %v3345_v19, %v3343_v5 }
 0x3af   : > { %3430 = vmatprep.subr.bf16.mxu0 %v3377_v22 }
 0x3b0   : > { %3431 = vmatpush2.bf16.msra.mxu0 %v3376_v37 }
 0x3b1   : > { %3432 = vmatprep.subr.bf16.mxu0 %v3375_v39 }
 0x3b4   : > { %3433 = vmatpush2.bf16.msra.mxu0 %v3374_v40 }
 0x3b5   : > { %3434 = vmatprep.subr.bf16.mxu0 %v3373_v6 }
 0x3b8   : > { %3435 = vmatpush2.bf16.msra.mxu0 %v3372_v4 }
 0x3b9   : > { %3436 = vmatprep.subr.bf16.mxu0 %v3371_v18 }
 0x3bc   : > { %3437 = vmatpush2.bf16.msra.mxu0 %v3370_v33 }
 0x3bd   : > { %3438 = vmatprep.subr.bf16.mxu0 %v3369_v58  ;;  %v6305_v58 = vlaneseq }
 0x3bf   : > { %vm3483_vm1 = vcmp.lt.s32.totalorder %v6305_v58, 256 }
 0x3c0   : > { %3439 = vmatpush2.bf16.msra.mxu0 %v3368_v20 }
 0x3c1   : > { %3440 = vmatprep.subr.bf16.mxu0 %v3367_v38 }
 0x3c4   : > { %3441 = vmatpush2.bf16.msra.mxu0 %v3366_v3 }
 0x3c5   : > { %3442 = vmatprep.subr.bf16.mxu0 %v3365_v1  ;;  %v3388_v1 = vrot.slane %v3383_v34, %v6304_v23 }
 0x3c8   : > { %3443 = vmatpush2.bf16.msra.mxu0 %v3364_v15 }
 0x3c9   : > { %3444 = vmatprep.subr.bf16.mxu0 %v3363_v29 }
 0x3cc   : > { %3445 = vmatpush2.bf16.msra.mxu0 %v3362_v42 }
 0x3cf   : > { %3447 = vmatmul.mubr.bf16.vlgmr.msra.gmra.mxu0 %v3404_v36 }
 0x48f   : > { %v3448_v10 = vpop.f32.mrf.mxu0 }
 0x490   : > { %v3449_v2 = vadd.f32 %v3448_v10, %v3388_v1 }
 0x491   : > { %v3450_v52 = vpop.f32.mrf.mxu0 }
 0x492   : > { %v3455_v15 = vmul.f32 0.5, %v3449_v2  ;;  %v3451_v0 = vadd.f32 %v3450_v52, %v3388_v1 }
 0x493   : > { %v3452_v26 = vpop.f32.mrf.mxu0 }
 0x494   : > { %4259 = vtanh.f32 %v3455_v15  ;;  %v3456_v55 = vmul.f32 0.5, %v3451_v0 }
 0x495   : > { %v3453_v29 = vpop.f32.mrf.mxu0 }
 0x496   : > { %4261 = vtanh.f32 %v3456_v55 }
 0x4a1   : > { %v4260_v3 = vpop.eup %4259 }
 0x4a2   : > { %v3459_v13 = vmul.f32 0.5, %v4260_v3 }
 0x4a3   : > { %v4262_v51 = vpop.eup %4261 }
 0x4a4   : > { %v3460_v42 = vmul.f32 0.5, %v4262_v51  ;;  %v3461_v38 = vadd.f32 0.5, %v3459_v13 }
 0x4a6   : > { %v3462_v54 = vadd.f32 0.5, %v3460_v42 }
 0x4a8   : > { %v3465_v43 = vcombine.low %v3461_v38, %v3462_v54 }
 0x4aa   : > { %v3472_v20 = vrot.slane %v3465_v43, %v6301_v53 }
 0x4ac   : > { %v3479_v33 = vrot.slane %v3472_v20, %v6301_v53 }
 0x4ae   : > { %3485 = vst.msk [vmem:[%s349_s11] sm:$0x3] %vm3483_vm1, %v3479_v33 }
 0x4af PF: > { %p16_p9 = scmp.ge.s32.totalorder %s4349_s29, 4   ;;  %s6306_s26 = smov %s4281_s27 }
 0x4b0   : > { %s6307_s27 = smov %s4358_s9  ;;  %s6308_s28 = smov %s4349_s29 }
 0x4b1   :  { %18 = sbr.rel (!%p16_p9) target bundleno = 5 (0x5), region = 107 }

</bundles_post_ra>
